<compile_context>
chip_gen: v7x
topology: tpu7x:2x2x1
jax: 0.10.0
libtpu: 0.0.40
codegen_flags: <defaults>
</compile_context>

<pallas_src>
import functools

import numpy as np
import jax
import jax.numpy as jnp
from jax import lax
from jax.experimental import pallas as pl
from jax.experimental.pallas import tpu as pltpu

KH = KW = 3            # kernel_size = 3, padding = 1 ("same"), RCAN default_conv
NTAP = KH * KW


# -----------------------------------------------------------------------------
# In-kernel 3x3 conv (kn2row)
# -----------------------------------------------------------------------------
def _conv3x3_kn2row(x_f32, w_all_ref, b_ref, masks_ref, img_w):
    """3x3 'same' conv: one bf16 MXU matmul + 9 shifted tap accumulations.

    x_f32     : (H*W, C) float32 activation, spatial flattened row-major
    w_all_ref : ref, block (1, C, 9*C) bf16 -- taps stacked along output cols
    b_ref     : ref, block (1, 1, C) float32 bias
    masks_ref : ref, (H*W, 9) float32 tap validity masks (1 = inside image)
    img_w     : python int, image width W (for the flattened row shift)
    returns   : (H*W, C) float32
    """
    hw, c = x_f32.shape
    # One matmul: M = H*W, K = C, N = 9C (bf16 operands, f32 accumulate).
    y = jnp.dot(x_f32.astype(jnp.bfloat16), w_all_ref[0],
                preferred_element_type=jnp.float32)          # (H*W, 9C)

    # Centre tap (kh=1, kw=1): zero shift, mask is all-ones.
    acc = y[:, 4 * c:5 * c]
    for kh in range(KH):
        for kw in range(KW):
            t = kh * KW + kw
            if t == 4:
                continue
            shift = (kh - 1) * img_w + (kw - 1)
            y_t = y[:, t * c:(t + 1) * c]
            # out[p] needs Y_t[p + shift]; pltpu.roll follows np.roll
            # semantics, so roll by (-shift) mod H*W.  Positions whose shift
            # wraps across rows / the image border are zeroed by the mask.
            y_t = pltpu.roll(y_t, shift=(-shift) % hw, axis=0)
            acc = acc + masks_ref[:, t:t + 1] * y_t
    return acc + b_ref[0]


# -----------------------------------------------------------------------------
# Pallas kernel: one grid step = one (batch element, block) pair
# -----------------------------------------------------------------------------
def _residual_group_kernel(x_ref, masks_ref, wA_ref, bA_ref, wB_ref, bB_ref,
                           wd_ref, bd_ref, wu_ref, bu_ref,
                           out_ref, h_ref, *, img_w):
    """block r <  n_blocks : RCAB  (conv1 -> relu -> conv2 -> CA -> + h)
       block r == n_blocks : group tail conv + group-input residual add
    """
    hw, _ = h_ref.shape
    r = pl.program_id(1)
    n_blocks = pl.num_programs(1) - 1

    @pl.when(r == 0)
    def _():
        # Fresh batch element: load the group input into the resident
        # activation scratch (flat buffer, always fully overwritten).
        h_ref[...] = x_ref[0]

    # Shared conv: RCAB conv1 for r < n_blocks, group tail conv at r == n_blocks.
    c1 = _conv3x3_kn2row(h_ref[...], wA_ref, bA_ref, masks_ref, img_w)

    @pl.when(r < n_blocks)
    def _():
        # ---- RCAB body: relu -> conv2 -> channel attention -> residual ----
        z = _conv3x3_kn2row(jnp.maximum(c1, 0.0), wB_ref, bB_ref,
                            masks_ref, img_w)                       # (H*W, C)

        # Channel attention: global avg pool -> 1x1 -> ReLU -> 1x1 -> sigmoid
        # (tiny M=1 dots; kept in f32 for gate accuracy, negligible cost).
        pool = jnp.sum(z, axis=0, keepdims=True) * (1.0 / float(hw))  # (1, C)
        hid = jnp.maximum(
            jnp.dot(pool, wd_ref[0], preferred_element_type=jnp.float32)
            + bd_ref[0], 0.0)
        gate = jax.nn.sigmoid(
            jnp.dot(hid, wu_ref[0], preferred_element_type=jnp.float32)
            + bu_ref[0])                                              # (1, C)

        # Residual update of the resident activation: h = h + z * gate
        h_ref[...] = h_ref[...] + z * gate

    @pl.when(r == n_blocks)
    def _():
        # ---- group tail: conv(h) + group input ----
        out_ref[0] = c1 + x_ref[0]


# -----------------------------------------------------------------------------
# Wrapper
# -----------------------------------------------------------------------------
@jax.jit
def residual_group_forward(x_nchw, params):
    f32, bf16 = jnp.float32, jnp.bfloat16
    B, C, H, W = x_nchw.shape
    HW = H * W
    blocks = params["blocks"]
    R = len(blocks)
    Cr = blocks[0]["wd"].shape[1]

    # NCHW (PyTorch) -> (B, H*W, C): channels on the lane axis (matmul K/N).
    # TODO(synk): a (B, H, W*C) lane-dense HBM layout would make the one
    # input/output DMA per batch element fully dense; skipped to avoid an
    # in-kernel (H, W*C) <-> (H*W, C) relayout on the compute path.
    x = jnp.transpose(x_nchw, (0, 2, 3, 1)).astype(f32).reshape(B, HW, C)

    def kn2row(w_hwio):  # (3, 3, Cin, Cout) HWIO -> (Cin, 9*Cout), bf16
        return jnp.transpose(w_hwio, (2, 0, 1, 3)).reshape(C, NTAP * C).astype(bf16)

    # conv1 of each RCAB and the group tail conv share the "A" slots.
    wA = jnp.stack([kn2row(p["w1"]) for p in blocks] + [kn2row(params["w_tail"])])
    bA = jnp.stack([p["b1"] for p in blocks] + [params["b_tail"]])
    # RCAB-only weights: no dummy tail slot -- index maps clamp to R-1 instead.
    wB = jnp.stack([kn2row(p["w2"]) for p in blocks])
    bB = jnp.stack([p["b2"] for p in blocks])
    wd = jnp.stack([p["wd"] for p in blocks])
    bd = jnp.stack([p["bd"] for p in blocks])
    wu = jnp.stack([p["wu"] for p in blocks])
    bu = jnp.stack([p["bu"] for p in blocks])

    # Tap validity masks: mask[p, t] = 1 iff the shifted source pixel of tap t
    # for flat position p lies inside the image (handles borders and the
    # row-wrap of the flattened +-1 column shift).
    masks_np = np.zeros((HW, NTAP), np.float32)
    for kh in range(KH):
        for kw in range(KW):
            t = kh * KW + kw
            dh, dw = kh - 1, kw - 1
            for hh in range(H):
                for ww in range(W):
                    if 0 <= hh + dh < H and 0 <= ww + dw < W:
                        masks_np[hh * W + ww, t] = 1.0
    masks = jnp.asarray(masks_np)

    img_spec = pl.BlockSpec((1, HW, C), lambda b, r: (b, 0, 0))

    def stacked_spec(shape, clamp):
        if clamp:  # clamp to R-1: no new weight DMA on the tail step
            idx = lambda b, r: (jnp.minimum(r, R - 1), 0, 0)
        else:
            idx = lambda b, r: (r, 0, 0)
        return pl.BlockSpec((1,) + shape, idx)

    # ---- VMEM budget estimate + limit (query physical capacity) ----
    def nbytes(n_elems, itemsize=4):
        return int(n_elems) * itemsize

    est = (4 * nbytes(HW * C)                     # x / out blocks, 2-buffered
           + 2 * nbytes(HW * NTAP)                # tap masks
           + 4 * nbytes(C * NTAP * C, 2)          # wA + wB (bf16), 2-buffered
           + 2 * nbytes(C * Cr + Cr * C)          # CA weights
           + 8 * nbytes(C) + 2 * nbytes(Cr)       # biases
           + nbytes(HW * C)                       # resident activation scratch
           + 2 * nbytes(HW * NTAP * C)            # kn2row matmul outputs
           + 8 * nbytes(HW * C))                  # misc f32 temporaries
    try:
        vmem_cap = int(pltpu.get_tpu_info().vmem_capacity_bytes)
    except Exception:
        vmem_cap = 64 * 2 ** 20                   # conservative fallback
    vmem_limit = int(min(max(2 * est, 16 * 2 ** 20), (3 * vmem_cap) // 4))

    conv_flops = 2 * HW * NTAP * C * C
    cost = pl.CostEstimate(
        flops=B * ((2 * R + 1) * conv_flops + R * 4 * C * Cr),
        transcendentals=B * R * C,
        bytes_accessed=(2 * B * nbytes(HW * C)
                        + B * (2 * R + 1) * nbytes(C * NTAP * C, 2)))

    kernel = functools.partial(_residual_group_kernel, img_w=W)

    out = pl.pallas_call(
        kernel,
        out_shape=jax.ShapeDtypeStruct((B, HW, C), f32),
        grid=(B, R + 1),
        in_specs=[
            img_spec,                                       # x (resident per b)
            pl.BlockSpec((HW, NTAP), lambda b, r: (0, 0)),  # tap masks
            stacked_spec((C, NTAP * C), clamp=False),       # wA: conv1 / tail
            stacked_spec((1, C), clamp=False),              # bA
            stacked_spec((C, NTAP * C), clamp=True),        # wB: conv2
            stacked_spec((1, C), clamp=True),               # bB
            stacked_spec((C, Cr), clamp=True),              # wd (CA down)
            stacked_spec((1, Cr), clamp=True),              # bd
            stacked_spec((Cr, C), clamp=True),              # wu (CA up)
            stacked_spec((1, C), clamp=True),               # bu
        ],
        out_specs=img_spec,
        scratch_shapes=[pltpu.VMEM((HW, C), f32)],          # resident activation
        compiler_params=pltpu.CompilerParams(
            dimension_semantics=("parallel", "arbitrary"),
            vmem_limit_bytes=vmem_limit),
        cost_estimate=cost,
    )(x, masks, wA, bA, wB, bB, wd, bd, wu, bu)

    # (B, H*W, C) -> NCHW
    return jnp.transpose(out.reshape(B, H, W, C), (0, 3, 1, 2))


# -----------------------------------------------------------------------------
# Deterministic parameter initialization (shapes from the module __init__)
# -----------------------------------------------------------------------------
def init_params(key, n_feat, reduction, n_resblocks):
    Cr = n_feat // reduction
    keys = jax.random.split(key, n_resblocks + 1)
    blocks = []
    for r in range(n_resblocks):
        k = jax.random.split(keys[r], 8)
        blocks.append(dict(
            w1=0.1 * jax.random.normal(k[0], (KH, KW, n_feat, n_feat), jnp.float32),
            b1=0.01 * jax.random.normal(k[1], (1, n_feat), jnp.float32),
            w2=0.1 * jax.random.normal(k[2], (KH, KW, n_feat, n_feat), jnp.float32),
            b2=0.01 * jax.random.normal(k[3], (1, n_feat), jnp.float32),
            wd=0.1 * jax.random.normal(k[4], (n_feat, Cr), jnp.float32),
            bd=0.01 * jax.random.normal(k[5], (1, Cr), jnp.float32),
            wu=0.1 * jax.random.normal(k[6], (Cr, n_feat), jnp.float32),
            bu=0.01 * jax.random.normal(k[7], (1, n_feat), jnp.float32),
        ))
    kt = jax.random.split(keys[-1], 2)
    return dict(
        blocks=blocks,
        w_tail=0.1 * jax.random.normal(kt[0], (KH, KW, n_feat, n_feat), jnp.float32),
        b_tail=0.01 * jax.random.normal(kt[1], (1, n_feat), jnp.float32),
    )


# -----------------------------------------------------------------------------
# Pure-JAX reference (f32 / HIGHEST precision)
# -----------------------------------------------------------------------------
def _conv_ref(x, w, b):
    y = lax.conv_general_dilated(
        x, w, window_strides=(1, 1), padding="SAME",
        dimension_numbers=("NHWC", "HWIO", "NHWC"),
        precision=lax.Precision.HIGHEST)
    return y + b.reshape(1, 1, 1, -1)


def residual_group_ref(x_nchw, params):
    x = jnp.transpose(x_nchw, (0, 2, 3, 1)).astype(jnp.float32)
    h = x
    for p in params["blocks"]:
        y = jnp.maximum(_conv_ref(h, p["w1"], p["b1"]), 0.0)
        y = _conv_ref(y, p["w2"], p["b2"])
        pooled = jnp.mean(y, axis=(1, 2), keepdims=True)              # (B,1,1,C)
        hid = jnp.maximum(
            jnp.einsum("bxyc,cr->bxyr", pooled, p["wd"],
                       precision=lax.Precision.HIGHEST)
            + p["bd"].reshape(1, 1, 1, -1), 0.0)
        gate = jax.nn.sigmoid(
            jnp.einsum("bxyr,rc->bxyc", hid, p["wu"],
                       precision=lax.Precision.HIGHEST)
            + p["bu"].reshape(1, 1, 1, -1))
        h = h + y * gate
    out = _conv_ref(h, params["w_tail"], params["b_tail"]) + x
    return jnp.transpose(out, (0, 3, 1, 2))


# -----------------------------------------------------------------------------
if __name__ == "__main__":
    B, C, H, W = 2, 16, 8, 8          # NCHW, as in PyTorch
    n_resblocks = 2
    reduction = 4                      # C // reduction = 4

    key = jax.random.PRNGKey(0)
    kx, kp = jax.random.split(key)
    x = jax.random.normal(kx, (B, C, H, W), jnp.float32)
    params = init_params(kp, C, reduction, n_resblocks)

    out = jax.block_until_ready(residual_group_forward(x, params))
    assert out.shape == (B, C, H, W)

    ref = residual_group_ref(x, params)
    err = float(jnp.max(jnp.abs(out - ref)))
    # Kernel uses bf16 MXU operands (per perf review); bound sized for bf16
    # operand rounding vs. the f32/HIGHEST reference through 5 chained convs.
    if err > 1e-1:
        raise AssertionError(f"kernel/reference mismatch, max abs err = {err}")

    print("KERNEL_OK")
</pallas_src>

<mosaic_0001>
module attributes {stable_mosaic.version = 11 : i64} {
  func.func @_residual_group_kernel(%arg0: i32, %arg1: i32, %arg2: memref<1x64x16xf32, #tpu.memory_space<vmem>>, %arg3: memref<64x9xf32, #tpu.memory_space<vmem>>, %arg4: memref<1x16x144xbf16, #tpu.memory_space<vmem>>, %arg5: memref<1x1x16xf32, #tpu.memory_space<vmem>>, %arg6: memref<1x16x144xbf16, #tpu.memory_space<vmem>>, %arg7: memref<1x1x16xf32, #tpu.memory_space<vmem>>, %arg8: memref<1x16x4xf32, #tpu.memory_space<vmem>>, %arg9: memref<1x1x4xf32, #tpu.memory_space<vmem>>, %arg10: memref<1x4x16xf32, #tpu.memory_space<vmem>>, %arg11: memref<1x1x16xf32, #tpu.memory_space<vmem>>, %arg12: memref<1x64x16xf32, #tpu.memory_space<vmem>>, %arg13: memref<64x16xf32, #tpu.memory_space<vmem>>) attributes {dimension_semantics = [#tpu.dimension_semantics<parallel>, #tpu.dimension_semantics<arbitrary>], iteration_bounds = array<i64: 2, 3>, scalar_prefetch = 0 : i64, scratch_operands = 1 : i64, tpu.core_type = #tpu.core_type<tc>, window_params = [{transform_indices = @transform_0, window_bounds = array<i64: 1, 64, 16>}, {pipeline_mode = #tpu.pipeline_mode<synchronous>, transform_indices = @transform_1, window_bounds = array<i64: 64, 9>}, {transform_indices = @transform_2, window_bounds = array<i64: 1, 16, 144>}, {transform_indices = @transform_3, window_bounds = array<i64: 1, 1, 16>}, {transform_indices = @transform_4, window_bounds = array<i64: 1, 16, 144>}, {transform_indices = @transform_5, window_bounds = array<i64: 1, 1, 16>}, {transform_indices = @transform_6, window_bounds = array<i64: 1, 16, 4>}, {transform_indices = @transform_7, window_bounds = array<i64: 1, 1, 4>}, {transform_indices = @transform_8, window_bounds = array<i64: 1, 4, 16>}, {transform_indices = @transform_9, window_bounds = array<i64: 1, 1, 16>}, {transform_indices = @transform_10, window_bounds = array<i64: 1, 64, 16>}]} {
    %c0_i32 = arith.constant 0 : i32
    %0 = arith.cmpi eq, %arg1, %c0_i32 : i32
    %1 = arith.extui %0 : i1 to i32
    %c0_i32_0 = arith.constant 0 : i32
    %2 = arith.cmpi ne, %1, %c0_i32_0 : i32
    scf.if %2 {
      %c0_20 = arith.constant 0 : index
      %c0_21 = arith.constant 0 : index
      %c0_22 = arith.constant 0 : index
      %67 = vector.load %arg2[%c0_20, %c0_21, %c0_22] : memref<1x64x16xf32, #tpu.memory_space<vmem>>, vector<1x64x16xf32>
      %68 = vector.shape_cast %67 : vector<1x64x16xf32> to vector<64x16xf32>
      %c0_23 = arith.constant 0 : index
      %c0_24 = arith.constant 0 : index
      %69 = vector.load %arg13[%c0_23, %c0_24] : memref<64x16xf32, #tpu.memory_space<vmem>>, vector<64x16xf32>
      tpu.vector_store %arg13[%c0_23, %c0_24], %68 {strides = array<i32>} : memref<64x16xf32, #tpu.memory_space<vmem>>, vector<64x16xf32>,
    } else {
    }
    %c0 = arith.constant 0 : index
    %c0_1 = arith.constant 0 : index
    %3 = vector.load %arg13[%c0, %c0_1] : memref<64x16xf32, #tpu.memory_space<vmem>>, vector<64x16xf32>
    %4 = arith.truncf %3 : vector<64x16xf32> to vector<64x16xbf16>
    %c0_2 = arith.constant 0 : index
    %c0_3 = arith.constant 0 : index
    %c0_4 = arith.constant 0 : index
    %5 = vector.load %arg4[%c0_2, %c0_3, %c0_4] : memref<1x16x144xbf16, #tpu.memory_space<vmem>>, vector<1x16x144xbf16>
    %6 = vector.shape_cast %5 : vector<1x16x144xbf16> to vector<16x144xbf16>
    %cst = arith.constant dense<0.000000e+00> : vector<64x144xf32>
    %7 = tpu.matmul %4, %6, %cst {dimension_numbers = #tpu.dot_dimension_numbers<[1], [0], [0], [1], [0, 0, 1, 1], [], []>} : vector<64x16xbf16>, vector<16x144xbf16>, vector<64x144xf32> -> vector<64x144xf32>
    %8 = vector.extract_strided_slice %7 {offsets = [0, 64], sizes = [64, 16], strides = [1, 1]} : vector<64x144xf32> to vector<64x16xf32>
    %9 = vector.extract_strided_slice %7 {offsets = [0, 0], sizes = [64, 16], strides = [1, 1]} : vector<64x144xf32> to vector<64x16xf32>
    %c9_i32 = arith.constant 9 : i32
    %10 = tpu.dynamic_rotate %9 by %c9_i32 dim 0 : vector<64x16xf32>, i32 -> vector<64x16xf32>
    %c0_5 = arith.constant 0 : index
    %c0_6 = arith.constant 0 : index
    %11 = vector.load %arg3[%c0_5, %c0_6] : memref<64x9xf32, #tpu.memory_space<vmem>>, vector<64x1xf32>
    %12 = vector.broadcast %11 : vector<64x1xf32> to vector<64x16xf32>
    %13 = arith.mulf %12, %10 : vector<64x16xf32>
    %14 = arith.addf %8, %13 : vector<64x16xf32>
    %15 = vector.extract_strided_slice %7 {offsets = [0, 16], sizes = [64, 16], strides = [1, 1]} : vector<64x144xf32> to vector<64x16xf32>
    %c8_i32 = arith.constant 8 : i32
    %16 = tpu.dynamic_rotate %15 by %c8_i32 dim 0 : vector<64x16xf32>, i32 -> vector<64x16xf32>
    %c0_7 = arith.constant 0 : index
    %c1 = arith.constant 1 : index
    %17 = vector.load %arg3[%c0_7, %c1] : memref<64x9xf32, #tpu.memory_space<vmem>>, vector<64x1xf32>
    %18 = vector.broadcast %17 : vector<64x1xf32> to vector<64x16xf32>
    %19 = arith.mulf %18, %16 : vector<64x16xf32>
    %20 = arith.addf %14, %19 : vector<64x16xf32>
    %21 = vector.extract_strided_slice %7 {offsets = [0, 32], sizes = [64, 16], strides = [1, 1]} : vector<64x144xf32> to vector<64x16xf32>
    %c7_i32 = arith.constant 7 : i32
    %22 = tpu.dynamic_rotate %21 by %c7_i32 dim 0 : vector<64x16xf32>, i32 -> vector<64x16xf32>
    %c0_8 = arith.constant 0 : index
    %c2 = arith.constant 2 : index
    %23 = vector.load %arg3[%c0_8, %c2] : memref<64x9xf32, #tpu.memory_space<vmem>>, vector<64x1xf32>
    %24 = vector.broadcast %23 : vector<64x1xf32> to vector<64x16xf32>
    %25 = arith.mulf %24, %22 : vector<64x16xf32>
    %26 = arith.addf %20, %25 : vector<64x16xf32>
    %27 = vector.extract_strided_slice %7 {offsets = [0, 48], sizes = [64, 16], strides = [1, 1]} : vector<64x144xf32> to vector<64x16xf32>
    %c1_i32 = arith.constant 1 : i32
    %28 = tpu.dynamic_rotate %27 by %c1_i32 dim 0 : vector<64x16xf32>, i32 -> vector<64x16xf32>
    %c0_9 = arith.constant 0 : index
    %c3 = arith.constant 3 : index
    %29 = vector.load %arg3[%c0_9, %c3] : memref<64x9xf32, #tpu.memory_space<vmem>>, vector<64x1xf32>
    %30 = vector.broadcast %29 : vector<64x1xf32> to vector<64x16xf32>
    %31 = arith.mulf %30, %28 : vector<64x16xf32>
    %32 = arith.addf %26, %31 : vector<64x16xf32>
    %33 = vector.extract_strided_slice %7 {offsets = [0, 80], sizes = [64, 16], strides = [1, 1]} : vector<64x144xf32> to vector<64x16xf32>
    %c63_i32 = arith.constant 63 : i32
    %34 = tpu.dynamic_rotate %33 by %c63_i32 dim 0 : vector<64x16xf32>, i32 -> vector<64x16xf32>
    %c0_10 = arith.constant 0 : index
    %c5 = arith.constant 5 : index
    %35 = vector.load %arg3[%c0_10, %c5] : memref<64x9xf32, #tpu.memory_space<vmem>>, vector<64x1xf32>
    %36 = vector.broadcast %35 : vector<64x1xf32> to vector<64x16xf32>
    %37 = arith.mulf %36, %34 : vector<64x16xf32>
    %38 = arith.addf %32, %37 : vector<64x16xf32>
    %39 = vector.extract_strided_slice %7 {offsets = [0, 96], sizes = [64, 16], strides = [1, 1]} : vector<64x144xf32> to vector<64x16xf32>
    %c57_i32 = arith.constant 57 : i32
    %40 = tpu.dynamic_rotate %39 by %c57_i32 dim 0 : vector<64x16xf32>, i32 -> vector<64x16xf32>
    %c0_11 = arith.constant 0 : index
    %c6 = arith.constant 6 : index
    %41 = vector.load %arg3[%c0_11, %c6] : memref<64x9xf32, #tpu.memory_space<vmem>>, vector<64x1xf32>
    %42 = vector.broadcast %41 : vector<64x1xf32> to vector<64x16xf32>
    %43 = arith.mulf %42, %40 : vector<64x16xf32>
    %44 = arith.addf %38, %43 : vector<64x16xf32>
    %45 = vector.extract_strided_slice %7 {offsets = [0, 112], sizes = [64, 16], strides = [1, 1]} : vector<64x144xf32> to vector<64x16xf32>
    %c56_i32 = arith.constant 56 : i32
    %46 = tpu.dynamic_rotate %45 by %c56_i32 dim 0 : vector<64x16xf32>, i32 -> vector<64x16xf32>
    %c0_12 = arith.constant 0 : index
    %c7 = arith.constant 7 : index
    %47 = vector.load %arg3[%c0_12, %c7] : memref<64x9xf32, #tpu.memory_space<vmem>>, vector<64x1xf32>
    %48 = vector.broadcast %47 : vector<64x1xf32> to vector<64x16xf32>
    %49 = arith.mulf %48, %46 : vector<64x16xf32>
    %50 = arith.addf %44, %49 : vector<64x16xf32>
    %51 = vector.extract_strided_slice %7 {offsets = [0, 128], sizes = [64, 16], strides = [1, 1]} : vector<64x144xf32> to vector<64x16xf32>
    %c55_i32 = arith.constant 55 : i32
    %52 = tpu.dynamic_rotate %51 by %c55_i32 dim 0 : vector<64x16xf32>, i32 -> vector<64x16xf32>
    %c0_13 = arith.constant 0 : index
    %c8 = arith.constant 8 : index
    %53 = vector.load %arg3[%c0_13, %c8] : memref<64x9xf32, #tpu.memory_space<vmem>>, vector<64x1xf32>
    %54 = vector.broadcast %53 : vector<64x1xf32> to vector<64x16xf32>
    %55 = arith.mulf %54, %52 : vector<64x16xf32>
    %56 = arith.addf %50, %55 : vector<64x16xf32>
    %c0_14 = arith.constant 0 : index
    %c0_15 = arith.constant 0 : index
    %c0_16 = arith.constant 0 : index
    %57 = vector.load %arg5[%c0_14, %c0_15, %c0_16] : memref<1x1x16xf32, #tpu.memory_space<vmem>>, vector<1x1x16xf32>
    %58 = vector.shape_cast %57 : vector<1x1x16xf32> to vector<1x16xf32>
    %59 = vector.broadcast %58 : vector<1x16xf32> to vector<64x16xf32>
    %60 = arith.addf %56, %59 : vector<64x16xf32>
    %c2_i32 = arith.constant 2 : i32
    %61 = arith.cmpi slt, %arg1, %c2_i32 : i32
    %62 = arith.extui %61 : i1 to i32
    %c0_i32_17 = arith.constant 0 : i32
    %63 = arith.cmpi ne, %62, %c0_i32_17 : i32
    scf.if %63 {
      %cst_20 = arith.constant 0.000000e+00 : f32
      %67 = vector.broadcast %cst_20 : f32 to vector<64x16xf32>
      %68 = arith.maximumf %60, %67 : vector<64x16xf32>
      %69 = arith.truncf %68 : vector<64x16xf32> to vector<64x16xbf16>
      %c0_21 = arith.constant 0 : index
      %c0_22 = arith.constant 0 : index
      %c0_23 = arith.constant 0 : index
      %70 = vector.load %arg6[%c0_21, %c0_22, %c0_23] : memref<1x16x144xbf16, #tpu.memory_space<vmem>>, vector<1x16x144xbf16>
      %71 = vector.shape_cast %70 : vector<1x16x144xbf16> to vector<16x144xbf16>
      %cst_24 = arith.constant dense<0.000000e+00> : vector<64x144xf32>
      %72 = tpu.matmul %69, %71, %cst_24 {dimension_numbers = #tpu.dot_dimension_numbers<[1], [0], [0], [1], [0, 0, 1, 1], [], []>} : vector<64x16xbf16>, vector<16x144xbf16>, vector<64x144xf32> -> vector<64x144xf32>
      %73 = vector.extract_strided_slice %72 {offsets = [0, 64], sizes = [64, 16], strides = [1, 1]} : vector<64x144xf32> to vector<64x16xf32>
      %74 = vector.extract_strided_slice %72 {offsets = [0, 0], sizes = [64, 16], strides = [1, 1]} : vector<64x144xf32> to vector<64x16xf32>
      %c9_i32_25 = arith.constant 9 : i32
      %75 = tpu.dynamic_rotate %74 by %c9_i32_25 dim 0 : vector<64x16xf32>, i32 -> vector<64x16xf32>
      %c0_26 = arith.constant 0 : index
      %c0_27 = arith.constant 0 : index
      %76 = vector.load %arg3[%c0_26, %c0_27] : memref<64x9xf32, #tpu.memory_space<vmem>>, vector<64x1xf32>
      %77 = vector.broadcast %76 : vector<64x1xf32> to vector<64x16xf32>
      %78 = arith.mulf %77, %75 : vector<64x16xf32>
      %79 = arith.addf %73, %78 : vector<64x16xf32>
      %80 = vector.extract_strided_slice %72 {offsets = [0, 16], sizes = [64, 16], strides = [1, 1]} : vector<64x144xf32> to vector<64x16xf32>
      %c8_i32_28 = arith.constant 8 : i32
      %81 = tpu.dynamic_rotate %80 by %c8_i32_28 dim 0 : vector<64x16xf32>, i32 -> vector<64x16xf32>
      %c0_29 = arith.constant 0 : index
      %c1_30 = arith.constant 1 : index
      %82 = vector.load %arg3[%c0_29, %c1_30] : memref<64x9xf32, #tpu.memory_space<vmem>>, vector<64x1xf32>
      %83 = vector.broadcast %82 : vector<64x1xf32> to vector<64x16xf32>
      %84 = arith.mulf %83, %81 : vector<64x16xf32>
      %85 = arith.addf %79, %84 : vector<64x16xf32>
      %86 = vector.extract_strided_slice %72 {offsets = [0, 32], sizes = [64, 16], strides = [1, 1]} : vector<64x144xf32> to vector<64x16xf32>
      %c7_i32_31 = arith.constant 7 : i32
      %87 = tpu.dynamic_rotate %86 by %c7_i32_31 dim 0 : vector<64x16xf32>, i32 -> vector<64x16xf32>
      %c0_32 = arith.constant 0 : index
      %c2_33 = arith.constant 2 : index
      %88 = vector.load %arg3[%c0_32, %c2_33] : memref<64x9xf32, #tpu.memory_space<vmem>>, vector<64x1xf32>
      %89 = vector.broadcast %88 : vector<64x1xf32> to vector<64x16xf32>
      %90 = arith.mulf %89, %87 : vector<64x16xf32>
      %91 = arith.addf %85, %90 : vector<64x16xf32>
      %92 = vector.extract_strided_slice %72 {offsets = [0, 48], sizes = [64, 16], strides = [1, 1]} : vector<64x144xf32> to vector<64x16xf32>
      %c1_i32_34 = arith.constant 1 : i32
      %93 = tpu.dynamic_rotate %92 by %c1_i32_34 dim 0 : vector<64x16xf32>, i32 -> vector<64x16xf32>
      %c0_35 = arith.constant 0 : index
      %c3_36 = arith.constant 3 : index
      %94 = vector.load %arg3[%c0_35, %c3_36] : memref<64x9xf32, #tpu.memory_space<vmem>>, vector<64x1xf32>
      %95 = vector.broadcast %94 : vector<64x1xf32> to vector<64x16xf32>
      %96 = arith.mulf %95, %93 : vector<64x16xf32>
      %97 = arith.addf %91, %96 : vector<64x16xf32>
      %98 = vector.extract_strided_slice %72 {offsets = [0, 80], sizes = [64, 16], strides = [1, 1]} : vector<64x144xf32> to vector<64x16xf32>
      %c63_i32_37 = arith.constant 63 : i32
      %99 = tpu.dynamic_rotate %98 by %c63_i32_37 dim 0 : vector<64x16xf32>, i32 -> vector<64x16xf32>
      %c0_38 = arith.constant 0 : index
      %c5_39 = arith.constant 5 : index
      %100 = vector.load %arg3[%c0_38, %c5_39] : memref<64x9xf32, #tpu.memory_space<vmem>>, vector<64x1xf32>
      %101 = vector.broadcast %100 : vector<64x1xf32> to vector<64x16xf32>
      %102 = arith.mulf %101, %99 : vector<64x16xf32>
      %103 = arith.addf %97, %102 : vector<64x16xf32>
      %104 = vector.extract_strided_slice %72 {offsets = [0, 96], sizes = [64, 16], strides = [1, 1]} : vector<64x144xf32> to vector<64x16xf32>
      %c57_i32_40 = arith.constant 57 : i32
      %105 = tpu.dynamic_rotate %104 by %c57_i32_40 dim 0 : vector<64x16xf32>, i32 -> vector<64x16xf32>
      %c0_41 = arith.constant 0 : index
      %c6_42 = arith.constant 6 : index
      %106 = vector.load %arg3[%c0_41, %c6_42] : memref<64x9xf32, #tpu.memory_space<vmem>>, vector<64x1xf32>
      %107 = vector.broadcast %106 : vector<64x1xf32> to vector<64x16xf32>
      %108 = arith.mulf %107, %105 : vector<64x16xf32>
      %109 = arith.addf %103, %108 : vector<64x16xf32>
      %110 = vector.extract_strided_slice %72 {offsets = [0, 112], sizes = [64, 16], strides = [1, 1]} : vector<64x144xf32> to vector<64x16xf32>
      %c56_i32_43 = arith.constant 56 : i32
      %111 = tpu.dynamic_rotate %110 by %c56_i32_43 dim 0 : vector<64x16xf32>, i32 -> vector<64x16xf32>
      %c0_44 = arith.constant 0 : index
      %c7_45 = arith.constant 7 : index
      %112 = vector.load %arg3[%c0_44, %c7_45] : memref<64x9xf32, #tpu.memory_space<vmem>>, vector<64x1xf32>
      %113 = vector.broadcast %112 : vector<64x1xf32> to vector<64x16xf32>
      %114 = arith.mulf %113, %111 : vector<64x16xf32>
      %115 = arith.addf %109, %114 : vector<64x16xf32>
      %116 = vector.extract_strided_slice %72 {offsets = [0, 128], sizes = [64, 16], strides = [1, 1]} : vector<64x144xf32> to vector<64x16xf32>
      %c55_i32_46 = arith.constant 55 : i32
      %117 = tpu.dynamic_rotate %116 by %c55_i32_46 dim 0 : vector<64x16xf32>, i32 -> vector<64x16xf32>
      %c0_47 = arith.constant 0 : index
      %c8_48 = arith.constant 8 : index
      %118 = vector.load %arg3[%c0_47, %c8_48] : memref<64x9xf32, #tpu.memory_space<vmem>>, vector<64x1xf32>
      %119 = vector.broadcast %118 : vector<64x1xf32> to vector<64x16xf32>
      %120 = arith.mulf %119, %117 : vector<64x16xf32>
      %121 = arith.addf %115, %120 : vector<64x16xf32>
      %c0_49 = arith.constant 0 : index
      %c0_50 = arith.constant 0 : index
      %c0_51 = arith.constant 0 : index
      %122 = vector.load %arg7[%c0_49, %c0_50, %c0_51] : memref<1x1x16xf32, #tpu.memory_space<vmem>>, vector<1x1x16xf32>
      %123 = vector.shape_cast %122 : vector<1x1x16xf32> to vector<1x16xf32>
      %124 = vector.broadcast %123 : vector<1x16xf32> to vector<64x16xf32>
      %125 = arith.addf %121, %124 : vector<64x16xf32>
      %cst_52 = arith.constant dense<0.000000e+00> : vector<16xf32>
      %126 = vector.multi_reduction <add>, %125, %cst_52 [0] : vector<64x16xf32> to vector<16xf32>
      %127 = vector.shape_cast %126 : vector<16xf32> to vector<1x16xf32>
      %cst_53 = arith.constant 1.562500e-02 : f32
      %128 = vector.broadcast %cst_53 : f32 to vector<1x16xf32>
      %129 = arith.mulf %127, %128 : vector<1x16xf32>
      %c0_54 = arith.constant 0 : index
      %c0_55 = arith.constant 0 : index
      %c0_56 = arith.constant 0 : index
      %130 = vector.load %arg8[%c0_54, %c0_55, %c0_56] : memref<1x16x4xf32, #tpu.memory_space<vmem>>, vector<1x16x4xf32>
      %131 = vector.shape_cast %130 : vector<1x16x4xf32> to vector<16x4xf32>
      %cst_57 = arith.constant dense<0.000000e+00> : vector<1x4xf32>
      %132 = tpu.matmul %129, %131, %cst_57 {dimension_numbers = #tpu.dot_dimension_numbers<[1], [0], [0], [1], [0, 0, 1, 1], [], []>} : vector<1x16xf32>, vector<16x4xf32>, vector<1x4xf32> -> vector<1x4xf32>
      %c0_58 = arith.constant 0 : index
      %c0_59 = arith.constant 0 : index
      %c0_60 = arith.constant 0 : index
      %133 = vector.load %arg9[%c0_58, %c0_59, %c0_60] : memref<1x1x4xf32, #tpu.memory_space<vmem>>, vector<1x1x4xf32>
      %134 = vector.shape_cast %133 : vector<1x1x4xf32> to vector<1x4xf32>
      %135 = arith.addf %132, %134 : vector<1x4xf32>
      %cst_61 = arith.constant 0.000000e+00 : f32
      %136 = vector.broadcast %cst_61 : f32 to vector<1x4xf32>
      %137 = arith.maximumf %135, %136 : vector<1x4xf32>
      %c0_62 = arith.constant 0 : index
      %c0_63 = arith.constant 0 : index
      %c0_64 = arith.constant 0 : index
      %138 = vector.load %arg10[%c0_62, %c0_63, %c0_64] : memref<1x4x16xf32, #tpu.memory_space<vmem>>, vector<1x4x16xf32>
      %139 = vector.shape_cast %138 : vector<1x4x16xf32> to vector<4x16xf32>
      %cst_65 = arith.constant dense<0.000000e+00> : vector<1x16xf32>
      %140 = tpu.matmul %137, %139, %cst_65 {dimension_numbers = #tpu.dot_dimension_numbers<[1], [0], [0], [1], [0, 0, 1, 1], [], []>} : vector<1x4xf32>, vector<4x16xf32>, vector<1x16xf32> -> vector<1x16xf32>
      %c0_66 = arith.constant 0 : index
      %c0_67 = arith.constant 0 : index
      %c0_68 = arith.constant 0 : index
      %141 = vector.load %arg11[%c0_66, %c0_67, %c0_68] : memref<1x1x16xf32, #tpu.memory_space<vmem>>, vector<1x1x16xf32>
      %142 = vector.shape_cast %141 : vector<1x1x16xf32> to vector<1x16xf32>
      %143 = arith.addf %140, %142 : vector<1x16xf32>
      %144 = arith.negf %143 : vector<1x16xf32>
      %145 = math.exp %144 : vector<1x16xf32>
      %cst_69 = arith.constant 1.000000e+00 : f32
      %146 = vector.broadcast %cst_69 : f32 to vector<1x16xf32>
      %147 = arith.addf %146, %145 : vector<1x16xf32>
      %148 = arith.divf %146, %147 : vector<1x16xf32>
      %c0_70 = arith.constant 0 : index
      %c0_71 = arith.constant 0 : index
      %149 = vector.load %arg13[%c0_70, %c0_71] : memref<64x16xf32, #tpu.memory_space<vmem>>, vector<64x16xf32>
      %150 = vector.broadcast %148 : vector<1x16xf32> to vector<64x16xf32>
      %151 = arith.mulf %125, %150 : vector<64x16xf32>
      %152 = arith.addf %149, %151 : vector<64x16xf32>
      %c0_72 = arith.constant 0 : index
      %c0_73 = arith.constant 0 : index
      %153 = vector.load %arg13[%c0_72, %c0_73] : memref<64x16xf32, #tpu.memory_space<vmem>>, vector<64x16xf32>
      tpu.vector_store %arg13[%c0_72, %c0_73], %152 {strides = array<i32>} : memref<64x16xf32, #tpu.memory_space<vmem>>, vector<64x16xf32>,
    } else {
    }
    %c2_i32_18 = arith.constant 2 : i32
    %64 = arith.cmpi eq, %arg1, %c2_i32_18 : i32
    %65 = arith.extui %64 : i1 to i32
    %c0_i32_19 = arith.constant 0 : i32
    %66 = arith.cmpi ne, %65, %c0_i32_19 : i32
    scf.if %66 {
      %c0_20 = arith.constant 0 : index
      %c0_21 = arith.constant 0 : index
      %c0_22 = arith.constant 0 : index
      %67 = vector.load %arg2[%c0_20, %c0_21, %c0_22] : memref<1x64x16xf32, #tpu.memory_space<vmem>>, vector<1x64x16xf32>
      %68 = vector.shape_cast %67 : vector<1x64x16xf32> to vector<64x16xf32>
      %69 = arith.addf %60, %68 : vector<64x16xf32>
      %c0_23 = arith.constant 0 : index
      %c0_24 = arith.constant 0 : index
      %c0_25 = arith.constant 0 : index
      %70 = vector.load %arg12[%c0_23, %c0_24, %c0_25] : memref<1x64x16xf32, #tpu.memory_space<vmem>>, vector<1x64x16xf32>
      %71 = vector.shape_cast %70 : vector<1x64x16xf32> to vector<64x16xf32>
      %72 = vector.shape_cast %69 : vector<64x16xf32> to vector<1x64x16xf32>
      tpu.vector_store %arg12[%c0_23, %c0_24, %c0_25], %72 {strides = array<i32>} : memref<1x64x16xf32, #tpu.memory_space<vmem>>, vector<1x64x16xf32>,
    } else {
    }
    return
  }
  func.func @transform_0(%arg0: i32, %arg1: i32) -> (i32, i32, i32) {
    %c0_i32 = arith.constant 0 : i32
    %c0_i32_0 = arith.constant 0 : i32
    %c0_i32_1 = arith.constant 0 : i32
    return %arg0, %c0_i32, %c0_i32_0 : i32, i32, i32
  }
  func.func @transform_1(%arg0: i32, %arg1: i32) -> (i32, i32) {
    %c0_i32 = arith.constant 0 : i32
    %c0_i32_0 = arith.constant 0 : i32
    %c0_i32_1 = arith.constant 0 : i32
    return %c0_i32, %c0_i32_0 : i32, i32
  }
  func.func @transform_2(%arg0: i32, %arg1: i32) -> (i32, i32, i32) {
    %c0_i32 = arith.constant 0 : i32
    %c0_i32_0 = arith.constant 0 : i32
    %c0_i32_1 = arith.constant 0 : i32
    return %arg1, %c0_i32, %c0_i32_0 : i32, i32, i32
  }
  func.func @transform_3(%arg0: i32, %arg1: i32) -> (i32, i32, i32) {
    %c0_i32 = arith.constant 0 : i32
    %c0_i32_0 = arith.constant 0 : i32
    %c0_i32_1 = arith.constant 0 : i32
    return %arg1, %c0_i32, %c0_i32_0 : i32, i32, i32
  }
  func.func @transform_4(%arg0: i32, %arg1: i32) -> (i32, i32, i32) {
    %c1_i32 = arith.constant 1 : i32
    %0 = arith.minsi %arg1, %c1_i32 : i32
    %c0_i32 = arith.constant 0 : i32
    %c0_i32_0 = arith.constant 0 : i32
    %c0_i32_1 = arith.constant 0 : i32
    return %0, %c0_i32, %c0_i32_0 : i32, i32, i32
  }
  func.func @transform_5(%arg0: i32, %arg1: i32) -> (i32, i32, i32) {
    %c1_i32 = arith.constant 1 : i32
    %0 = arith.minsi %arg1, %c1_i32 : i32
    %c0_i32 = arith.constant 0 : i32
    %c0_i32_0 = arith.constant 0 : i32
    %c0_i32_1 = arith.constant 0 : i32
    return %0, %c0_i32, %c0_i32_0 : i32, i32, i32
  }
  func.func @transform_6(%arg0: i32, %arg1: i32) -> (i32, i32, i32) {
    %c1_i32 = arith.constant 1 : i32
    %0 = arith.minsi %arg1, %c1_i32 : i32
    %c0_i32 = arith.constant 0 : i32
    %c0_i32_0 = arith.constant 0 : i32
    %c0_i32_1 = arith.constant 0 : i32
    return %0, %c0_i32, %c0_i32_0 : i32, i32, i32
  }
  func.func @transform_7(%arg0: i32, %arg1: i32) -> (i32, i32, i32) {
    %c1_i32 = arith.constant 1 : i32
    %0 = arith.minsi %arg1, %c1_i32 : i32
    %c0_i32 = arith.constant 0 : i32
    %c0_i32_0 = arith.constant 0 : i32
    %c0_i32_1 = arith.constant 0 : i32
    return %0, %c0_i32, %c0_i32_0 : i32, i32, i32
  }
  func.func @transform_8(%arg0: i32, %arg1: i32) -> (i32, i32, i32) {
    %c1_i32 = arith.constant 1 : i32
    %0 = arith.minsi %arg1, %c1_i32 : i32
    %c0_i32 = arith.constant 0 : i32
    %c0_i32_0 = arith.constant 0 : i32
    %c0_i32_1 = arith.constant 0 : i32
    return %0, %c0_i32, %c0_i32_0 : i32, i32, i32
  }
  func.func @transform_9(%arg0: i32, %arg1: i32) -> (i32, i32, i32) {
    %c1_i32 = arith.constant 1 : i32
    %0 = arith.minsi %arg1, %c1_i32 : i32
    %c0_i32 = arith.constant 0 : i32
    %c0_i32_0 = arith.constant 0 : i32
    %c0_i32_1 = arith.constant 0 : i32
    return %0, %c0_i32, %c0_i32_0 : i32, i32, i32
  }
  func.func @transform_10(%arg0: i32, %arg1: i32) -> (i32, i32, i32) {
    %c0_i32 = arith.constant 0 : i32
    %c0_i32_0 = arith.constant 0 : i32
    %c0_i32_1 = arith.constant 0 : i32
    return %arg0, %c0_i32, %c0_i32_0 : i32, i32, i32
  }
}

</mosaic_0001>

<bundles_post_ra>
// kernel: residual_group_forward.1
= control target key start
LH: loop header
LB: loop body
LE: loop exit
PB: predicated region body
PF: predicated region fallthrough
CT: control target
= control target key end

     0   :  { %s5776_s0 = inlined_call_operand.vmem [shape: f32[2,64,16], index: 0, kind: input, shape index: {}]   ;;  %s5777_s1 = inlined_call_operand.vmem [shape: f32[64,9], index: 1, kind: input, shape index: {}]   ;;  %s5778_s2 = inlined_call_operand.vmem [shape: bf16[3,16,144], index: 2, kind: input, shape index: {}]   ;;  %s5779_s3 = inlined_call_operand.vmem [shape: f32[3,1,16], index: 3, kind: input, shape index: {}]   ;;  %s5780_s4 = inlined_call_operand.vmem [shape: bf16[2,16,144], index: 4, kind: input, shape index: {}]   ;;  %s5781_s5 = inlined_call_operand.vmem [shape: f32[2,1,16], index: 5, kind: input, shape index: {}]   ;;  %s5782_s6 = inlined_call_operand.vmem [shape: f32[2,16,4], index: 6, kind: input, shape index: {}]   ;;  %s5783_s7 = inlined_call_operand.vmem [shape: f32[2,1,4], index: 7, kind: input, shape index: {}]   ;;  %s5784_s8 = inlined_call_operand.vmem [shape: f32[2,4,16], index: 8, kind: input, shape index: {}]   ;;  %s5785_s9 = inlined_call_operand.vmem [shape: f32[2,1,16], index: 9, kind: input, shape index: {}]   ;;  %s5786_s10 = inlined_call_operand.hbm [shape: f32[2,64,16], index: 10, kind: output, shape index: {}]  }
   0x1   :  { %5837 = sst [smem:[#allocation99_spill]] %s5776_s0 }
   0x2   :  { %5838 = sst [smem:[#allocation100_spill]] %s5778_s2 }
   0x3   :  { %5839 = sst [smem:[#allocation101_spill]] %s5786_s10 }
   0x4   :  { %15 = vsyncpa [#allocation4], 0 }
   0x5   :  { %17 = vsyncpa [#allocation4 + $0x1], 0  ;;  %s3666_s13 = smov 0   ;;  %s3668_s14 = smov 0  }
   0x6   :  { %s3670_s15 = smov 0   ;;  %s3672_s16 = smov 0  }
   0x7   :  { %s3674_s17 = smov 0   ;;  %s3676_s18 = smov 0  }
   0x8   :  { %s3678_s19 = smov 0   ;;  %s3680_s20 = smov 0  }
   0x9 LB: > { %5840 = sst [smem:[#allocation6_spill]] %s3544_s13  ;;  %s3213_s21 = sadd.s32 4294967295, %s3572_s20   ;;  %s3572_s20 = sphi %s3680_s20, %s23_s20   ;;  %s3568_s19 = sphi %s3678_s19, %s6071_s19   ;;  %s3564_s18 = sphi %s3676_s18, %s6070_s18   ;;  %s3560_s17 = sphi %s3674_s17, %s6069_s17   ;;  %s3556_s16 = sphi %s3672_s16, %s6068_s16   ;;  %s3552_s15 = sphi %s3670_s15, %s6067_s15   ;;  %s3548_s14 = sphi %s3668_s14, %s6066_s14   ;;  %s3544_s13 = sphi %s3666_s13, %s6065_s13  }
   0xa   : > { %5841 = sst [smem:[#allocation7_spill]] %s3548_s14  ;;  %s3214_s22 = sadd.s32 4294967294, %s3572_s20  }
   0xb   : > { %5842 = sst [smem:[#allocation8_spill]] %s3552_s15  ;;  %s32_s23 = sadd.s32 1, %s3564_s18 }
   0xc   : > { %5843 = sst [smem:[#allocation9_spill]] %s3564_s18  ;;  %p33_p0 = scmp.ge.s32.totalorder %s32_s23, 3 }
   0xd   : > { %5844 = sst [smem:[#allocation10_spill]] %s3568_s19  ;;  %s35_s24 = sadd.s32 1, %s3568_s19 }
   0xe   : > { %5845 = sst [smem:[#allocation11_spill]] %s3572_s20  ;;  %p331_p1 = scmp.ne.s32.totalorder %s3552_s15, %s3548_s14 }
   0xf   : > { %p332_p2 = scmp.eq.s32.totalorder %s3213_s21, 5  ;;  %s6073_s23 = smov (%p33_p0, %s32_s23), 0 }
  0x10   : > { %5846 = sst [smem:[#allocation12_spill]] %s6073_s23  ;;  %s6075_s24 = smov (!%p33_p0, %s35_s24), %s3568_s19 }
  0x11   : > { %p3715_p3 = por %p332_p2, %p331_p1  ;;  %p337_p4 = scmp.ne.s32.totalorder %s3548_s14, %s3544_s13 }
  0x12   : > { %p37_p5 = scmp.ge.s32.totalorder %s6075_s24, 2  ;;  %p338_p6 = scmp.eq.s32.totalorder %s3214_s22, 5 }
  0x13   : > { %s5847_s25 = scalar_select %p3715_p3, 1, 0 }
  0x14   : > { %p3217_p7 = scmp.ge.s32.totalorder %s3572_s20, 1  ;;  %p446_p8 = scmp.lt.s32.totalorder %s3572_s20, 7 }
  0x15   : > { %5848 = sst [smem:[#allocation13_spill]] %s5847_s25  ;;  %s6077_s24 = smov (%p37_p5, %s6075_s24), 0 }
  0x16   : > { %5849 = sst [smem:[#allocation14_spill]] %s6077_s24  ;;  %p3725_p9 = por %p338_p6, %p337_p4 }
  0x17   : > { %p447_p10 = pnand %p3217_p7, %p446_p8  ;;  %s318_s27 = ssub.s32 %s3568_s19, %s6077_s24 }
  0x18   : > { %s5850_s26 = scalar_select %p3725_p9, 1, 0 }
  0x19   : > { %s321_s28 = sadd.s32 1, %s3552_s15  ;;  %p319_p11 = scmp.eq.s32.totalorder %s318_s27, 0 }
  0x1a   : > { %5851 = sst [smem:[#allocation15_spill]] %s5850_s26  ;;  %450 = sbr.rel (%p447_p10) target bundleno = 2559 (0x9ff), region = 60 }
  0x1b   : > { %s3733_s29 = scalar_select %p319_p11, %s3552_s15, %s321_s28  }
  0x1d   : > { %5852 = sst [smem:[#allocation16_spill]] %s3733_s29 }
  0x21   : > { %s5790_s30 = sand.u32 1, %s3548_s14   ;;  %p527_p12 = scmp.lt.s32.totalorder %s3560_s17, 1 }
  0x22   : > { %s3218_s11 = sshll.u32 %s5790_s30, 6  ;;  %p532_p13 = scmp.lt.s32.totalorder %s3556_s16, 2 }
  0x23   : > { %p540_p0 = scmp.lt.s32.totalorder %s3556_s16, 1  ;;  %s5853_s0 = sld [smem:[#allocation99_spill]] }
  0x24   : > { %s528_s12 = scalar_select %p527_p12, %s3560_s17, 1 }
  0x25   : > { %s3743_s21 = scalar_select %p532_p13, %s3556_s16, 2 }
  0x26   : > { %s3272_s22 = sshll.u32 %s528_s12, 6  ;;  %s5854_s2 = sld [smem:[#allocation100_spill]] }
  0x27   : > { %s3273_s23 = sshll.u32 %s3743_s21, 4  ;;  %s3792_s19 = scalar_lea.vmem [#allocation3], %s3218_s11 }
  0x28   : > { %s541_s13 = scalar_select %p540_p0, %s3556_s16, 1 }
  0x29   : > { %s3748_s24 = scalar_lea.vmem %s5853_s0, %s3272_s22  ;;  %p3246_p1 = scmp.ne.s32.totalorder %s3556_s16, 0 }
  0x2a   : > { %s6079_s13 = smov (!%p540_p0, %s541_s13), 1  ;;  %v592_v0 = vld [vmem:[%s3748_s24] sm:$0xff] (!%p3246_p1)  ;;  %vm600_vm0 = vcmask (!%p3246_p1), 130048   ;;  %v593_v1 = vld [vmem:[%s3748_s24 + $0x8] sm:$0xff] (!%p3246_p1)  ;;  %v594_v2 = vld [vmem:[%s3748_s24 + $0x10] sm:$0xff] (!%p3246_p1) }
  0x2b   : > { %s3274_s12 = sshll.u32 %s6079_s13, 4  ;;  %s569_s20 = scalar_lea.vmem %s5783_s7, %s6079_s13  ;;  %601 = vst.msk [vmem:[#allocation2] sm:$0xff] (!%p3246_p1), %vm600_vm0, %v592_v0  ;;  %602 = vst.msk [vmem:[#allocation2 + $0x8] sm:$0xff] (!%p3246_p1), %vm600_vm0, %v593_v1  ;;  %v595_v3 = vld [vmem:[%s3748_s24 + $0x18] sm:$0xff] (!%p3246_p1)  ;;  %v596_v4 = vld [vmem:[%s3748_s24 + $0x20] sm:$0xff] (!%p3246_p1) }
  0x2c   : > { %s3754_s29 = scalar_lea.vmem %s5854_s2, %s3273_s23  ;;  %s3771_s23 = scalar_lea.vmem %s5780_s4, %s3274_s12  ;;  %603 = vst.msk [vmem:[#allocation2 + $0x10] sm:$0xff] (!%p3246_p1), %vm600_vm0, %v594_v2  ;;  %v597_v5 = vld [vmem:[%s3748_s24 + $0x28] sm:$0xff] (!%p3246_p1)  ;;  %604 = vst.msk [vmem:[#allocation2 + $0x18] sm:$0xff] (!%p3246_p1), %vm600_vm0, %v595_v3  ;;  %v598_v6 = vld [vmem:[%s3748_s24 + $0x30] sm:$0xff] (!%p3246_p1) }
  0x2d   : > { %s3776_s26 = scalar_lea.vmem %s5782_s6, %s3274_s12  ;;  %s3242_s10 = sshll.u32 %s6079_s13, 2  ;;  %605 = vst.msk [vmem:[#allocation2 + $0x20] sm:$0xff] (!%p3246_p1), %vm600_vm0, %v596_v4  ;;  %606 = vst.msk [vmem:[#allocation2 + $0x28] sm:$0xff] (!%p3246_p1), %vm600_vm0, %v597_v5  ;;  %v599_v7 = vld [vmem:[%s3748_s24 + $0x38] sm:$0xff] (!%p3246_p1) }
  0x2e   : > { %s3786_s22 = scalar_lea.vmem %s5784_s8, %s3242_s10  ;;  %s584_s18 = scalar_lea.vmem %s5785_s9, %s6079_s13  ;;  %607 = vst.msk [vmem:[#allocation2 + $0x30] sm:$0xff] (!%p3246_p1), %vm600_vm0, %v598_v6  ;;  %608 = vst.msk [vmem:[#allocation2 + $0x38] sm:$0xff] (!%p3246_p1), %vm600_vm0, %v599_v7 }
  0x2f   : > { %591 = sbr.rel (%p3246_p1) target bundleno = 54 (0x36), region = 64 }
  0x36 PF: > { %v3806_v8 = vld [vmem:[%s5777_s1 + $0x10] sm:$0xff]  ;;  %v3811_v9 = vld [vmem:[%s5777_s1] sm:$0xff]  ;;  %v3574_v10 = vmov 0   ;;  %v3820_v13 = vld [vmem:[%s5777_s1 + $0x18] sm:$0xff]  ;;  %vm633_vm1 = vcmask 130048   ;;  %v3575_v31 = vmov 1   ;;  %v727_v60 = vlaneseq  ;;  %s5984_s2 = scalar_lea.vmem %s5779_s3, %s3743_s21 }
  0x37   : > { %3409 = vset.pattern.permute.xlu1 %v3574_v10  ;;  %3408 = vset.pattern.permute.xlu0 %v3574_v10  ;;  %v3424_v11 = vld [vmem:[%s3754_s29 + $0x4] ss:$8 sps:$4 sm:$0xff]   ;;  %v3426_v12 = vld [vmem:[%s3754_s29] ss:$8 sps:$4 sm:$0xff]   ;;  %v611_v23 = vld [vmem:[#allocation2 + $0x10] sm:$0xff]  ;;  %v3576_v32 = vmov 2  }
  0x38   : > { %758 = vperm.xlu1 %3409, %v3806_v8   ;;  %748 = vperm.xlu0 %3408, %v3811_v9   ;;  %v3825_v14 = vld [vmem:[%s5777_s1 + $0x8] sm:$0xff]  ;;  %v609_v15 = vld [vmem:[#allocation2] sm:$0xff]  ;;  %v612_v24 = vld [vmem:[#allocation2 + $0x18] sm:$0xff]  ;;  %v3577_v33 = vmov 3   ;;  %v3578_v34 = vmov 5   ;;  %v3579_v35 = vmov 6  }
  0x39   : > { %646 = vmatprep.subr.bf16.mxu0 %v3424_v11  ;;  %3297 = vmatprep.subr.bf16.mxu1 %v3424_v11  ;;  %v610_v16 = vld [vmem:[#allocation2 + $0x8] sm:$0xff]  ;;  %v613_v17 = vld [vmem:[#allocation2 + $0x20] sm:$0xff]  ;;  %v615_v25 = vld [vmem:[#allocation2 + $0x30] sm:$0xff]  ;;  %v618_v29 = vpack.c.bf16 %v612_v24, %v611_v23  ;;  %v3580_v36 = vmov 7   ;;  %v3581_v37 = vmov 8   ;;  %v3959_v63 = vshrl.u32 %v727_v60, 7 }
  0x3a   : > { %v614_v18 = vld [vmem:[#allocation2 + $0x28] sm:$0xff]  ;;  %647 = vmatpush1.bf16.msra.mxu0 %v3426_v12  ;;  %3298 = vmatpush1.bf16.msra.mxu1 %v3426_v12  ;;  %v617_v19 = vpack.c.bf16 %v610_v16, %v609_v15  ;;  %v3839_v22 = vld [vmem:[%s5777_s1 + $0x20] sm:$0xff]  ;;  %v616_v26 = vld [vmem:[#allocation2 + $0x38] sm:$0xff]  ;;  %s3582_s25 = smov 96   ;;  %s3583_s11 = smov 112  }
  0x3b   : > { %v619_v20 = vpack.c.bf16 %v614_v18, %v613_v17  ;;  %678 = vmatprep.mubr.bf16.mxu0 %v3574_v10  ;;  %698 = vmatprep.mubr.bf16.mxu1 %v3574_v10  ;;  %v3834_v21 = vld [vmem:[%s5777_s1 + $0x28] sm:$0xff]  ;;  %v3846_v27 = vld [vmem:[%s5777_s1 + $0x38] sm:$0xff]  ;;  %v3851_v28 = vld [vmem:[%s5777_s1 + $0x30] sm:$0xff]  ;;  %v620_v30 = vpack.c.bf16 %v616_v26, %v615_v25  ;;  %vm729_vm2 = vcmp.lt.s32.totalorder %v3959_v63, 1  ;;  %vm978_vm3 = vcmp.lt.s32.totalorder %v3959_v63, 7  ;;  %s3584_s12 = smov 48  }
  0x3c   : > { %763 = vperm.xlu1 %3409, %v3820_v13   ;;  %753 = vperm.xlu0 %3408, %v3825_v14   ;;  %s3585_s28 = smov 80   ;;  %s3586_s29 = smov 32  }
  0x3d   : > { %3249 = vmatmul.mubr.msk.bf16.vlgmr.msra.gmra.mrb[0].mxu0 %vm633_vm1, %v617_v19  ;;  %3251 = vmatmul.mubr.msk.bf16.vlgmr.msra.gmra.mrb[0].mxu1 %vm633_vm1, %v619_v20  ;;  %s3587_s15 = smov 64   ;;  %s3588_s30 = smov 16  }
  0x3e   : > { %688 = vmatprep.mubr.bf16.mxu0 %v3574_v10  ;;  %708 = vmatprep.mubr.bf16.mxu1 %v3574_v10  ;;  %p3254_p2 = scmp.ge.s32.totalorder %s3556_s16, 2 }
  0x40   : > { %773 = vperm.xlu1 %3409, %v3834_v21   ;;  %768 = vperm.xlu0 %3408, %v3839_v22  }
  0x44   : > { %783 = vperm.xlu1 %3409, %v3846_v27   ;;  %778 = vperm.xlu0 %3408, %v3851_v28  }
  0x45   : > { %3250 = vmatmul.mubr.msk.bf16.gmra.mrb[4].mxu0 %vm633_vm1, %v618_v29  ;;  %3252 = vmatmul.mubr.msk.bf16.gmra.mrb[4].mxu1 %vm633_vm1, %v620_v30 }
  0x48   : > { %3411 = vset.pattern.permute.xlu1 %v3575_v31  ;;  %3410 = vset.pattern.permute.xlu0 %v3575_v31 }
  0x49   : > { %871 = vperm.xlu1 %3411, %v3825_v14   ;;  %867 = vperm.xlu0 %3410, %v3811_v9  }
  0x4d   : > { %875 = vperm.xlu1 %3411, %v3806_v8   ;;  %879 = vperm.xlu0 %3410, %v3820_v13  }
  0x51   : > { %883 = vperm.xlu1 %3411, %v3839_v22   ;;  %887 = vperm.xlu0 %3410, %v3834_v21  }
  0x55   : > { %891 = vperm.xlu1 %3411, %v3851_v28   ;;  %895 = vperm.xlu0 %3410, %v3846_v27  }
  0x59   : > { %3412 = vset.pattern.permute.xlu1 %v3576_v32  ;;  %3413 = vset.pattern.permute.xlu0 %v3576_v32 }
  0x5a   : > { %988 = vperm.xlu1 %3412, %v3811_v9   ;;  %992 = vperm.xlu0 %3413, %v3825_v14  }
  0x5e   : > { %996 = vperm.xlu1 %3412, %v3806_v8   ;;  %1004 = vperm.xlu0 %3413, %v3839_v22  }
  0x62   : > { %1000 = vperm.xlu1 %3412, %v3820_v13   ;;  %1012 = vperm.xlu0 %3413, %v3851_v28  }
  0x66   : > { %1008 = vperm.xlu1 %3412, %v3834_v21   ;;  %3414 = vset.pattern.permute.xlu0 %v3577_v33 }
  0x67   : > { %1108 = vperm.xlu0 %3414, %v3811_v9  }
  0x6a   : > { %1016 = vperm.xlu1 %3412, %v3846_v27  }
  0x6b   : > { %1120 = vperm.xlu0 %3414, %v3820_v13  }
  0x6e   : > { %3415 = vset.pattern.permute.xlu1 %v3577_v33 }
  0x6f   : > { %1112 = vperm.xlu1 %3415, %v3825_v14   ;;  %1128 = vperm.xlu0 %3414, %v3834_v21  }
  0x73   : > { %1116 = vperm.xlu1 %3415, %v3806_v8   ;;  %1136 = vperm.xlu0 %3414, %v3846_v27  }
  0x77   : > { %1124 = vperm.xlu1 %3415, %v3839_v22   ;;  %3417 = vset.pattern.permute.xlu0 %v3578_v34 }
  0x78   : > { %1232 = vperm.xlu0 %3417, %v3825_v14  }
  0x7b   : > { %1132 = vperm.xlu1 %3415, %v3851_v28  }
  0x7c   : > { %1244 = vperm.xlu0 %3417, %v3839_v22  }
  0x7f   : > { %3416 = vset.pattern.permute.xlu1 %v3578_v34 }
  0x80   : > { %1228 = vperm.xlu1 %3416, %v3811_v9   ;;  %1252 = vperm.xlu0 %3417, %v3851_v28  }
  0x84   : > { %1236 = vperm.xlu1 %3416, %v3806_v8   ;;  %3418 = vset.pattern.permute.xlu0 %v3579_v35 }
  0x85   : > { %1348 = vperm.xlu0 %3418, %v3811_v9  }
  0x88   : > { %1240 = vperm.xlu1 %3416, %v3820_v13  }
  0x89   : > { %1360 = vperm.xlu0 %3418, %v3820_v13  }
  0x8c   : > { %1248 = vperm.xlu1 %3416, %v3834_v21  }
  0x8d   : > { %1368 = vperm.xlu0 %3418, %v3834_v21  }
  0x90   : > { %1256 = vperm.xlu1 %3416, %v3846_v27  }
  0x91   : > { %1376 = vperm.xlu0 %3418, %v3846_v27  }
  0x94   : > { %3419 = vset.pattern.permute.xlu1 %v3579_v35 }
  0x95   : > { %1352 = vperm.xlu1 %3419, %v3825_v14   ;;  %3420 = vset.pattern.permute.xlu0 %v3580_v36 }
  0x96   : > { %1452 = vperm.xlu0 %3420, %v3811_v9  }
  0x99   : > { %1356 = vperm.xlu1 %3419, %v3806_v8  }
  0x9a   : > { %1464 = vperm.xlu0 %3420, %v3820_v13  }
  0x9d   : > { %1364 = vperm.xlu1 %3419, %v3839_v22  }
  0x9e   : > { %1472 = vperm.xlu0 %3420, %v3834_v21  }
  0xa1   : > { %1372 = vperm.xlu1 %3419, %v3851_v28  }
  0xa2   : > { %1480 = vperm.xlu0 %3420, %v3846_v27  }
  0xa5   : > { %3421 = vset.pattern.permute.xlu1 %v3580_v36 }
  0xa6   : > { %1456 = vperm.xlu1 %3421, %v3825_v14   ;;  %3423 = vset.pattern.permute.xlu0 %v3581_v37 }
  0xa7   : > { %1552 = vperm.xlu0 %3423, %v3825_v14  }
  0xaa   : > { %1460 = vperm.xlu1 %3421, %v3806_v8  }
  0xab   : > { %1564 = vperm.xlu0 %3423, %v3839_v22  }
  0xae   : > { %1468 = vperm.xlu1 %3421, %v3839_v22  }
  0xb2   : > { %1476 = vperm.xlu1 %3421, %v3851_v28  }
  0xb6   : > { %3422 = vset.pattern.permute.xlu1 %v3581_v37 }
  0xb7   : > { %1548 = vperm.xlu1 %3422, %v3811_v9   ;;  %v3908_v38 = vpop.permute.xlu1 %758  ;;  %v3923_v44 = vpop.permute.xlu0 %748 }
  0xbb   : > { %1556 = vperm.xlu1 %3422, %v3806_v8   ;;  %v3912_v39 = vpop.permute.xlu1 %763  ;;  %v3927_v46 = vpop.permute.xlu0 %753 }
  0xbf   : > { %1560 = vperm.xlu1 %3422, %v3820_v13   ;;  %v3915_v40 = vpop.permute.xlu1 %773  ;;  %v3931_v48 = vpop.permute.xlu0 %768 }
  0xc3   : > { %1568 = vperm.xlu1 %3422, %v3834_v21   ;;  %v3917_v41 = vpop.permute.xlu1 %783  ;;  %v3935_v50 = vpop.permute.xlu0 %778 }
  0xc8   : > { %v3919_v42 = vpop.permute.xlu1 %871  ;;  %v3939_v52 = vpop.permute.xlu0 %867 }
  0xcc   : > { %v3921_v43 = vpop.permute.xlu1 %875  ;;  %v3943_v54 = vpop.permute.xlu0 %879 }
  0xd0   : > { %v3925_v45 = vpop.permute.xlu1 %883  ;;  %v3947_v56 = vpop.permute.xlu0 %887 }
  0xd4   : > { %v3929_v47 = vpop.permute.xlu1 %891  ;;  %v3951_v58 = vpop.permute.xlu0 %895 }
  0xd9   : > { %v3933_v49 = vpop.permute.xlu1 %988  ;;  %v3955_v61 = vpop.permute.xlu0 %992 }
  0xda   : > { %5855 = vst [vmem:[#allocation17_spill] sm:$0xff] %v3933_v49 }
  0xdd   : > { %v3937_v51 = vpop.permute.xlu1 %996  ;;  %v3965_v2 = vpop.permute.xlu0 %1004 }
  0xde   : > { %5856 = vst [vmem:[#allocation18_spill] sm:$0xff] %v3937_v51  ;;  %5860 = vst [vmem:[#allocation22_spill] sm:$0xff] %v3965_v2 }
  0xe1   : > { %v3941_v53 = vpop.permute.xlu1 %1000  ;;  %v4000_v21 = vpop.permute.xlu0 %1012 }
  0xe2   : > { %5857 = vst [vmem:[#allocation19_spill] sm:$0xff] %v3941_v53  ;;  %5862 = vst [vmem:[#allocation24_spill] sm:$0xff] %v4000_v21 }
  0xe5   : > { %v3945_v55 = vpop.permute.xlu1 %1008 }
  0xe9   : > { %v3949_v57 = vpop.permute.xlu1 %1016 }
  0xea   : > { %5858 = vst [vmem:[#allocation20_spill] sm:$0xff] %v3949_v57 }
  0xee   : > { %v3953_v59 = vpop.permute.xlu1 %1112 }
  0xf2   : > { %v3957_v62 = vpop.permute.xlu1 %1116 }
  0xf3   : > { %5859 = vst [vmem:[#allocation21_spill] sm:$0xff] %v3957_v62 }
  0xf6   : > { %v3982_v12 = vpop.permute.xlu1 %1124 }
  0xf7   : > { %5861 = vst [vmem:[#allocation23_spill] sm:$0xff] %v3982_v12 }
  0xfa   : > { %v4016_v31 = vpop.permute.xlu1 %1132 }
  0xfb   : > { %5864 = vst [vmem:[#allocation26_spill] sm:$0xff] %v4016_v31 }
 0x110   : > { %v3961_v0 = vpop.f32.mrb[0].mxu0  ;;  %v3963_v1 = vpop.f32.mrb[0].mxu1 }
 0x111   : > { %946 = vrot.lane.b32.xlu1 %v3961_v0, %s3582_s25  ;;  %842 = vrot.lane.b32.xlu0 %v3961_v0, %s3583_s11  ;;  %v3971_v3 = vpop.f32.mrb[1].mxu0  ;;  %v702_v5 = vpop.f32.mrb[1].mxu1  ;;  %v723_v6 = vrot.slane %v3963_v1, 7  ;;  %v719_v10 = vrot.slane %v3961_v0, 7 }
 0x112   : > { %v3973_v4 = vpop.f32.mrb[2].mxu0  ;;  %v1535_v7 = vrot.slane %v702_v5, 1  ;;  %v3977_v9 = vpop.f32.mrb[2].mxu1  ;;  %v1531_v13 = vrot.slane %v3971_v3, 1 }
 0x113   : > { %v686_v8 = vpop.f32.mrb[3].mxu0  ;;  %v720_v11 = vrot.slane %v3973_v4, 7  ;;  %v706_v15 = vpop.f32.mrb[3].mxu1  ;;  %v724_v16 = vrot.slane %v3977_v9, 7 }
 0x114   : > { %v1532_v14 = vrot.slane %v686_v8, 1  ;;  %v1536_v17 = vrot.slane %v706_v15, 1 }
 0x115   : > { %954 = vrot.lane.b32.xlu1 %v3963_v1, %s3582_s25  ;;  %850 = vrot.lane.b32.xlu0 %v3963_v1, %s3583_s11  ;;  %v736_v18 = vsel %vm729_vm2, %v719_v10, %v720_v11  ;;  %v3994_v19 = vsel %vm729_vm2, %v723_v6, %v724_v16 }
 0x116   : > { %v3998_v20 = vsel %vm978_vm3, %v1531_v13, %v1532_v14  ;;  %v4004_v22 = vsel %vm978_vm3, %v1535_v7, %v1536_v17 }
 0x117   : > { %5863 = vst [vmem:[#allocation25_spill] sm:$0xff] %v4004_v22 }
 0x118   : > { %v4006_v23 = vpop.f32.mrb[4].mxu0  ;;  %v4008_v24 = vpop.f32.mrb[4].mxu1 }
 0x119   : > { %v712_v25 = vpop.f32.mrb[5].mxu1  ;;  %1187 = vrot.lane.b32.xlu1 %v3961_v0, %s3584_s12  ;;  %1067 = vrot.lane.b32.xlu0 %v3961_v0, %s3585_s28  ;;  %v692_v26 = vpop.f32.mrb[5].mxu0  ;;  %v721_v29 = vrot.slane %v4006_v23, 7  ;;  %v725_v30 = vrot.slane %v4008_v24, 7 }
 0x11a   : > { %v1537_v32 = vrot.slane %v712_v25, 1  ;;  %v1533_v33 = vrot.slane %v692_v26, 1  ;;  %v4018_v34 = vpop.f32.mrb[6].mxu0  ;;  %v4020_v35 = vpop.f32.mrb[6].mxu1 }
 0x11b   : > { %v4024_v36 = vsel %vm729_vm2, %v720_v11, %v721_v29  ;;  %v4028_v37 = vsel %vm729_vm2, %v724_v16, %v725_v30  ;;  %v696_v60 = vpop.f32.mrb[7].mxu0  ;;  %v716_v3 = vpop.f32.mrb[7].mxu1  ;;  %v726_v11 = vrot.slane %v4020_v35, 7  ;;  %v722_v16 = vrot.slane %v4018_v34, 7 }
 0x11c   : > { %v4032_v5 = vsel %vm978_vm3, %v1536_v17, %v1537_v32  ;;  %v4036_v8 = vsel %vm978_vm3, %v1532_v14, %v1533_v33  ;;  %v1534_v15 = vrot.slane %v696_v60, 1  ;;  %v1538_v25 = vrot.slane %v716_v3, 1  ;;  %v4044_v26 = vpop.permute.xlu0 %1108 }
 0x11d   : > { %5865 = vst [vmem:[#allocation27_spill] sm:$0xff] %v4032_v5  ;;  %1195 = vrot.lane.b32.xlu1 %v3963_v1, %s3584_s12  ;;  %1075 = vrot.lane.b32.xlu0 %v3963_v1, %s3585_s28  ;;  %5866 = vst [vmem:[#allocation28_spill] sm:$0xff] %v4044_v26  ;;  %v4060_v3 = vsel %vm729_vm2, %v725_v30, %v726_v11  ;;  %v4064_v22 = vsel %vm729_vm2, %v726_v11, %v719_v10 }
 0x11e   : > { %v4048_v17 = vsel %vm978_vm3, %v1533_v33, %v1534_v15  ;;  %v4052_v14 = vsel %vm978_vm3, %v1534_v15, %v1535_v7  ;;  %v4056_v60 = vsel %vm978_vm3, %v1537_v32, %v1538_v25  ;;  %v4068_v33 = vsel %vm729_vm2, %v721_v29, %v722_v16  ;;  %v4074_v15 = vpop.permute.xlu1 %1228 }
 0x11f   : > { %5867 = vst [vmem:[#allocation29_spill] sm:$0xff] %v4048_v17  ;;  %5868 = vst [vmem:[#allocation30_spill] sm:$0xff] %v4052_v14  ;;  %v4072_v7 = vsel %vm729_vm2, %v722_v16, %v723_v6  ;;  %v4082_v10 = vsel %vm978_vm3, %v1538_v25, %v1531_v13  ;;  %v788_v16 = vmul.f32 %v3908_v38, %v736_v18 }
 0x120   : > { %5869 = vst [vmem:[#allocation31_spill] sm:$0xff] %v4056_v60  ;;  %v4084_v30 = vpop.permute.xlu0 %1120  ;;  %v792_v5 = vmul.f32 %v3935_v50, %v3994_v19 }
 0x121   : > { %1307 = vrot.lane.b32.xlu0 %v3961_v0, %s3586_s29  ;;  %844 = vrot.lane.b32.xlu1 %v3973_v4, %s3583_s11  ;;  %5870 = vst [vmem:[#allocation32_spill] sm:$0xff] %v4084_v30 }
 0x122   : > { %v4090_v6 = vpop.permute.xlu1 %1236 }
 0x123   : > { %5871 = vst [vmem:[#allocation33_spill] sm:$0xff] %v4090_v6 }
 0x124   : > { %v4096_v29 = vpop.permute.xlu0 %1128 }
 0x125   : > { %1315 = vrot.lane.b32.xlu0 %v3963_v1, %s3586_s29  ;;  %852 = vrot.lane.b32.xlu1 %v3977_v9, %s3583_s11 }
 0x126   : > { %v4098_v13 = vpop.permute.xlu1 %1240 }
 0x127   : > { %5872 = vst [vmem:[#allocation34_spill] sm:$0xff] %v4098_v13 }
 0x128   : > { %v4104_v32 = vpop.permute.xlu0 %1136 }
 0x129   : > { %948 = vrot.lane.b32.xlu0 %v3973_v4, %s3582_s25  ;;  %1069 = vrot.lane.b32.xlu1 %v3973_v4, %s3585_s28  ;;  %5873 = vst [vmem:[#allocation35_spill] sm:$0xff] %v4104_v32 }
 0x12a   : > { %v4110_v25 = vpop.permute.xlu1 %1248 }
 0x12b   : > { %5874 = vst [vmem:[#allocation36_spill] sm:$0xff] %v4110_v25 }
 0x12c   : > { %v4116_v11 = vpop.permute.xlu0 %1232 }
 0x12d   : > { %956 = vrot.lane.b32.xlu0 %v3977_v9, %s3582_s25  ;;  %1077 = vrot.lane.b32.xlu1 %v3977_v9, %s3585_s28  ;;  %5875 = vst [vmem:[#allocation37_spill] sm:$0xff] %v4116_v11 }
 0x12e   : > { %v4119_v60 = vpop.permute.xlu1 %1256 }
 0x12f   : > { %5876 = vst [vmem:[#allocation38_spill] sm:$0xff] %v4119_v60  ;;  %v789_v60 = vmul.f32 %v3912_v39, %v4024_v36  ;;  %v786_v39 = vmul.f32 %v3923_v44, %v4060_v3  ;;  %v787_v36 = vmul.f32 %v3927_v46, %v4064_v22  ;;  %v791_v44 = vmul.f32 %v3915_v40, %v4072_v7 }
 0x130   : > { %v4126_v17 = vpop.permute.xlu0 %1244 }
 0x131   : > { %1189 = vrot.lane.b32.xlu0 %v3973_v4, %s3584_s12  ;;  %1309 = vrot.lane.b32.xlu1 %v3973_v4, %s3586_s29 }
 0x132   : > { %v4131_v14 = vpop.permute.xlu1 %1352 }
 0x133   : > { %5877 = vst [vmem:[#allocation39_spill] sm:$0xff] %v4131_v14 }
 0x134   : > { %v4137_v38 = vpop.permute.xlu0 %1252 }
 0x135   : > { %1197 = vrot.lane.b32.xlu0 %v3977_v9, %s3584_s12  ;;  %1317 = vrot.lane.b32.xlu1 %v3977_v9, %s3586_s29  ;;  %5878 = vst [vmem:[#allocation40_spill] sm:$0xff] %v4137_v38 }
 0x136   : > { %v4139_v18 = vpop.permute.xlu1 %1356 }
 0x137   : > { %5879 = vst [vmem:[#allocation41_spill] sm:$0xff] %v4139_v18 }
 0x138   : > { %v4145_v50 = vpop.permute.xlu0 %1348 }
 0x139   : > { %806 = vrot.lane.b32.xlu0 %v788_v16, %s3587_s15  ;;  %950 = vrot.lane.b32.xlu1 %v4006_v23, %s3582_s25 }
 0x13a   : > { %v4151_v19 = vpop.permute.xlu1 %1364 }
 0x13d   : > { %814 = vrot.lane.b32.xlu0 %v792_v5, %s3587_s15  ;;  %958 = vrot.lane.b32.xlu1 %v4008_v24, %s3582_s25  ;;  %v4157_v5 = vpop.permute.xlu0 %1360 }
 0x13e   : > { %5880 = vst [vmem:[#allocation42_spill] sm:$0xff] %v4157_v5  ;;  %v4159_v16 = vpop.permute.xlu1 %1372 }
 0x13f   : > { %5881 = vst [vmem:[#allocation43_spill] sm:$0xff] %v4159_v16 }
 0x141   : > { %1191 = vrot.lane.b32.xlu1 %v4006_v23, %s3584_s12  ;;  %846 = vrot.lane.b32.xlu0 %v4006_v23, %s3583_s11  ;;  %v4165_v38 = vpop.permute.xlu0 %1368 }
 0x142   : > { %5882 = vst [vmem:[#allocation44_spill] sm:$0xff] %v4165_v38  ;;  %v4171_v18 = vpop.permute.xlu1 %1456 }
 0x143   : > { %5883 = vst [vmem:[#allocation45_spill] sm:$0xff] %v4171_v18 }
 0x145   : > { %1199 = vrot.lane.b32.xlu1 %v4008_v24, %s3584_s12  ;;  %854 = vrot.lane.b32.xlu0 %v4008_v24, %s3583_s11  ;;  %v4177_v16 = vpop.permute.xlu0 %1376 }
 0x146   : > { %5884 = vst [vmem:[#allocation46_spill] sm:$0xff] %v4177_v16  ;;  %v4179_v5 = vpop.permute.xlu1 %1460  ;;  %v793_v16 = vmul.f32 %v3917_v41, %v4028_v37  ;;  %v790_v41 = vmul.f32 %v3931_v48, %v4068_v33 }
 0x147   : > { %5885 = vst [vmem:[#allocation47_spill] sm:$0xff] %v4179_v5 }
 0x149   : > { %1071 = vrot.lane.b32.xlu0 %v4006_v23, %s3585_s28  ;;  %848 = vrot.lane.b32.xlu1 %v4018_v34, %s3583_s11  ;;  %v4187_v6 = vpop.permute.xlu0 %1452 }
 0x14a   : > { %v4192_v13 = vpop.permute.xlu1 %1468 }
 0x14d   : > { %1079 = vrot.lane.b32.xlu0 %v4008_v24, %s3585_s28  ;;  %856 = vrot.lane.b32.xlu1 %v4020_v35, %s3583_s11  ;;  %v4199_v32 = vpop.permute.xlu0 %1464 }
 0x14e   : > { %v4205_v12 = vpop.permute.xlu1 %1476 }
 0x14f   : > { %5886 = vst [vmem:[#allocation48_spill] sm:$0xff] %v4205_v12 }
 0x151   : > { %1311 = vrot.lane.b32.xlu0 %v4006_v23, %s3586_s29  ;;  %1073 = vrot.lane.b32.xlu1 %v4018_v34, %s3585_s28  ;;  %v4211_v37 = vpop.permute.xlu0 %1472 }
 0x152   : > { %5887 = vst [vmem:[#allocation49_spill] sm:$0xff] %v4211_v37 }
 0x155   : > { %1319 = vrot.lane.b32.xlu0 %v4008_v24, %s3586_s29  ;;  %1081 = vrot.lane.b32.xlu1 %v4020_v35, %s3585_s28  ;;  %v4219_v46 = vpop.permute.xlu0 %1480 }
 0x159   : > { %952 = vrot.lane.b32.xlu0 %v4018_v34, %s3582_s25  ;;  %1313 = vrot.lane.b32.xlu1 %v4018_v34, %s3586_s29 }
 0x15d   : > { %960 = vrot.lane.b32.xlu0 %v4020_v35, %s3582_s25  ;;  %1321 = vrot.lane.b32.xlu1 %v4020_v35, %s3586_s29 }
 0x161   : > { %1193 = vrot.lane.b32.xlu0 %v4018_v34, %s3584_s12  ;;  %808 = vrot.lane.b32.xlu1 %v789_v60, %s3587_s15  ;;  %v1549_v60 = vpop.permute.xlu1 %1548 }
 0x162   : > { %v1579_v3 = vmul.f32 %v1549_v60, %v4036_v8 }
 0x165   : > { %1201 = vrot.lane.b32.xlu0 %v4020_v35, %s3584_s12  ;;  %816 = vrot.lane.b32.xlu1 %v793_v16, %s3587_s15  ;;  %v4221_v22 = vpop.permute.xlu1 %1556 }
 0x166   : > { %5888 = vst [vmem:[#allocation50_spill] sm:$0xff] %v4221_v22 }
 0x169   : > { %802 = vrot.lane.b32.xlu0 %v786_v39, %s3587_s15  ;;  %804 = vrot.lane.b32.xlu1 %v787_v36, %s3587_s15  ;;  %v4229_v40 = vpop.permute.xlu1 %1560 }
 0x16a   : > { %5890 = vst [vmem:[#allocation52_spill] sm:$0xff] %v4229_v40 }
 0x16d   : > { %1576 = vperm.xlu1 %3422, %v3846_v27   ;;  %810 = vrot.lane.b32.xlu0 %v790_v41, %s3587_s15  ;;  %v4225_v27 = vpop.permute.xlu0 %1552  ;;  %v4235_v48 = vpop.permute.xlu1 %1568 }
 0x16e   : > { %5889 = vst [vmem:[#allocation51_spill] sm:$0xff] %v4225_v27  ;;  %5892 = vst [vmem:[#allocation54_spill] sm:$0xff] %v4235_v48 }
 0x171   : > { %1572 = vperm.xlu0 %3423, %v3851_v28   ;;  %812 = vrot.lane.b32.xlu1 %v791_v44, %s3587_s15  ;;  %v4233_v28 = vpop.permute.xlu0 %1564 }
 0x172   : > { %5891 = vst [vmem:[#allocation53_spill] sm:$0xff] %v4233_v28 }
 0x175   : > { %1427 = vrot.lane.b32.xlu0 %v3961_v0, %s3588_s30  ;;  %1429 = vrot.lane.b32.xlu1 %v3973_v4, %s3588_s30 }
 0x179   : > { %1431 = vrot.lane.b32.xlu0 %v4006_v23, %s3588_s30  ;;  %1433 = vrot.lane.b32.xlu1 %v4018_v34, %s3588_s30 }
 0x17d   : > { %1435 = vrot.lane.b32.xlu0 %v3963_v1, %s3588_s30  ;;  %1437 = vrot.lane.b32.xlu1 %v3977_v9, %s3588_s30 }
 0x181   : > { %1439 = vrot.lane.b32.xlu0 %v4008_v24, %s3588_s30  ;;  %1441 = vrot.lane.b32.xlu1 %v4020_v35, %s3588_s30 }
 0x183   : > { %v4240_v33 = vpop.permute.xlu1 %946  ;;  %v843_v7 = vpop.permute.xlu0 %842 }
 0x184   : > { %v899_v16 = vmul.f32 %v3919_v42, %v843_v7 }
 0x185   : > { %1595 = vrot.lane.b32.xlu1 %v1579_v3, %s3587_s15 }
 0x186   : > { %916 = vrot.lane.b32.xlu0 %v899_v16, %s3587_s15 }
 0x187   : > { %v4245_v39 = vpop.permute.xlu1 %954  ;;  %v851_v36 = vpop.permute.xlu0 %850 }
 0x188   : > { %v903_v41 = vmul.f32 %v3947_v56, %v851_v36 }
 0x18a   : > { %924 = vrot.lane.b32.xlu0 %v903_v41, %s3587_s15 }
 0x18b   : > { %v4249_v44 = vpop.permute.xlu1 %1187  ;;  %v4251_v48 = vpop.permute.xlu0 %1067 }
 0x18f   : > { %v4253_v8 = vpop.permute.xlu1 %1195  ;;  %v4255_v60 = vpop.permute.xlu0 %1075 }
 0x193   : > { %v4257_v42 = vpop.permute.xlu0 %1307  ;;  %v845_v3 = vpop.permute.xlu1 %844 }
 0x194   : > { %v900_v7 = vmul.f32 %v3921_v43, %v845_v3 }
 0x196   : > { %918 = vrot.lane.b32.xlu1 %v900_v7, %s3587_s15 }
 0x197   : > { %v4261_v16 = vpop.permute.xlu0 %1315  ;;  %v853_v56 = vpop.permute.xlu1 %852 }
 0x198   : > { %v904_v36 = vmul.f32 %v3929_v47, %v853_v56 }
 0x19a   : > { %926 = vrot.lane.b32.xlu1 %v904_v36, %s3587_s15 }
 0x19b   : > { %v4265_v41 = vpop.permute.xlu0 %948  ;;  %v4267_v40 = vpop.permute.xlu1 %1069 }
 0x19f   : > { %v4269_v28 = vpop.permute.xlu0 %956  ;;  %v4271_v27 = vpop.permute.xlu1 %1077 }
 0x1a3   : > { %v4273_v22 = vpop.permute.xlu0 %1189  ;;  %v4275_v43 = vpop.permute.xlu1 %1309 }
 0x1a4   : > { %v5800_v53 = vrot.slane %v4273_v22, 1 }
 0x1a7   : > { %v4277_v3 = vpop.permute.xlu0 %1197  ;;  %v4279_v7 = vpop.permute.xlu1 %1317 }
 0x1a8   : > { %v5801_v25 = vrot.slane %v4277_v3, 1  ;;  %v5806_v37 = vrot.slane %v4279_v7, 7 }
 0x1ab   : > { %v807_v30 = vpop.permute.xlu0 %806  ;;  %v4281_v47 = vpop.permute.xlu1 %950 }
 0x1ac   : > { %v4284_v56 = vadd.f32 %v807_v30, %v4006_v23 }
 0x1af   : > { %v815_v36 = vpop.permute.xlu0 %814  ;;  %v4286_v2 = vpop.permute.xlu1 %958 }
 0x1b0   : > { %v4289_v26 = vadd.f32 %v815_v36, %v4008_v24 }
 0x1b2   : > { %5893 = vst [vmem:[#allocation55_spill] sm:$0xff] %v4289_v26 }
 0x1b3   : > { %v1192_v57 = vpop.permute.xlu1 %1191  ;;  %v4291_v49 = vpop.permute.xlu0 %846 }
 0x1b4   : > { %v1213_v38 = vrot.slane %v1192_v57, 1 }
 0x1b6   : > { %v4298_v14 = vsel %vm978_vm3, %v5800_v53, %v1213_v38 }
 0x1b7   : > { %5894 = vst [vmem:[#allocation56_spill] sm:$0xff] %v4298_v14  ;;  %v1200_v23 = vpop.permute.xlu1 %1199  ;;  %v4300_v30 = vpop.permute.xlu0 %854 }
 0x1b8   : > { %v1217_v11 = vrot.slane %v1200_v23, 1 }
 0x1ba   : > { %v4307_v24 = vsel %vm978_vm3, %v5801_v25, %v1217_v11 }
 0x1bb   : > { %5895 = vst [vmem:[#allocation57_spill] sm:$0xff] %v4307_v24  ;;  %v4309_v36 = vpop.permute.xlu0 %1071  ;;  %v4311_v57 = vpop.permute.xlu1 %848 }
 0x1bc   : > { %5896 = vst [vmem:[#allocation58_spill] sm:$0xff] %v4309_v36  ;;  %v5804_v23 = vrot.slane %v4309_v36, 7  ;;  %v5812_v36 = vrot.slane %v4281_v47, 1 }
 0x1bf   : > { %v4313_v26 = vpop.permute.xlu0 %1079  ;;  %v4315_v53 = vpop.permute.xlu1 %856 }
 0x1c0   : > { %v5808_v62 = vrot.slane %v4313_v26, 7 }
 0x1c3   : > { %v4317_v14 = vpop.permute.xlu0 %1311  ;;  %v4319_v21 = vpop.permute.xlu1 %1073 }
 0x1c4   : > { %5897 = vst [vmem:[#allocation59_spill] sm:$0xff] %v4319_v21  ;;  %v5803_v31 = vrot.slane %v4319_v21, 7  ;;  %v5814_v5 = vrot.slane %v4317_v14, 7 }
 0x1c6   : > { %v4329_v25 = vsel %vm729_vm2, %v5804_v23, %v5803_v31  ;;  %v5813_v23 = vrot.slane %v4261_v16, 7 }
 0x1c7   : > { %5898 = vst [vmem:[#allocation60_spill] sm:$0xff] %v4329_v25  ;;  %v1320_v24 = vpop.permute.xlu0 %1319  ;;  %v4331_v51 = vpop.permute.xlu1 %1081 }
 0x1c8   : > { %5899 = vst [vmem:[#allocation61_spill] sm:$0xff] %v4331_v51  ;;  %v1337_v12 = vrot.slane %v1320_v24, 7  ;;  %v5807_v18 = vrot.slane %v4331_v51, 7  ;;  %v5818_v51 = vrot.slane %v4257_v42, 7 }
 0x1ca   : > { %v4340_v21 = vsel %vm729_vm2, %v5806_v37, %v1337_v12  ;;  %v4348_v31 = vsel %vm729_vm2, %v5808_v62, %v5807_v18 }
 0x1cb   : > { %5900 = vst [vmem:[#allocation62_spill] sm:$0xff] %v4340_v21  ;;  %5901 = vst [vmem:[#allocation63_spill] sm:$0xff] %v4348_v31  ;;  %v4351_v25 = vpop.permute.xlu0 %952  ;;  %v1314_v24 = vpop.permute.xlu1 %1313 }
 0x1cc   : > { %5902 = vst [vmem:[#allocation64_spill] sm:$0xff] %v4351_v25  ;;  %v5811_v37 = vrot.slane %v4351_v25, 1  ;;  %v1334_v21 = vrot.slane %v1314_v24, 7 }
 0x1ce   : > { %v4362_v18 = vsel %vm978_vm3, %v5812_v36, %v5811_v37  ;;  %v4368_v62 = vsel %vm729_vm2, %v1334_v21, %v5813_v23  ;;  %v4374_v31 = vsel %vm729_vm2, %v5814_v5, %v1334_v21  ;;  %v5817_v37 = vrot.slane %v4286_v2, 1 }
 0x1cf   : > { %5903 = vst [vmem:[#allocation65_spill] sm:$0xff] %v4362_v18  ;;  %5904 = vst [vmem:[#allocation66_spill] sm:$0xff] %v4368_v62  ;;  %v4376_v24 = vpop.permute.xlu0 %960  ;;  %v1322_v25 = vpop.permute.xlu1 %1321 }
 0x1d0   : > { %5905 = vst [vmem:[#allocation67_spill] sm:$0xff] %v4374_v31  ;;  %5906 = vst [vmem:[#allocation68_spill] sm:$0xff] %v4376_v24  ;;  %v5816_v36 = vrot.slane %v4376_v24, 1  ;;  %v1338_v18 = vrot.slane %v1322_v25, 7 }
 0x1d2   : > { %v4387_v23 = vsel %vm978_vm3, %v5817_v37, %v5816_v36  ;;  %v4391_v21 = vsel %vm729_vm2, %v1337_v12, %v1338_v18  ;;  %v4397_v5 = vsel %vm729_vm2, %v1338_v18, %v5818_v51 }
 0x1d3   : > { %5907 = vst [vmem:[#allocation69_spill] sm:$0xff] %v4391_v21  ;;  %5908 = vst [vmem:[#allocation70_spill] sm:$0xff] %v4397_v5  ;;  %v4399_v62 = vpop.permute.xlu0 %1193  ;;  %v809_v25 = vpop.permute.xlu1 %808 }
 0x1d4   : > { %v5819_v31 = vrot.slane %v4399_v62, 1  ;;  %v4403_v24 = vadd.f32 %v809_v25, %v4018_v34 }
 0x1d6   : > { %5909 = vst [vmem:[#allocation71_spill] sm:$0xff] %v4403_v24  ;;  %v4409_v12 = vsel %vm978_vm3, %v1213_v38, %v5819_v31 }
 0x1d7   : > { %5910 = vst [vmem:[#allocation72_spill] sm:$0xff] %v4409_v12  ;;  %v4411_v36 = vpop.permute.xlu0 %1201  ;;  %v817_v37 = vpop.permute.xlu1 %816 }
 0x1d8   : > { %v5820_v18 = vrot.slane %v4411_v36, 1  ;;  %v4415_v51 = vadd.f32 %v817_v37, %v4020_v35 }
 0x1da   : > { %5911 = vst [vmem:[#allocation73_spill] sm:$0xff] %v4415_v51  ;;  %v4421_v34 = vsel %vm978_vm3, %v1217_v11, %v5820_v18 }
 0x1db   : > { %v803_v25 = vpop.permute.xlu0 %802  ;;  %v805_v24 = vpop.permute.xlu1 %804 }
 0x1dc   : > { %v4424_v5 = vadd.f32 %v803_v25, %v3961_v0  ;;  %v827_v38 = vadd.f32 %v805_v24, %v3973_v4  ;;  %v5823_v24 = vrot.slane %v4265_v41, 1 }
 0x1df   : > { %v811_v31 = vpop.permute.xlu0 %810 }
 0x1e0   : > { %v4428_v21 = vadd.f32 %v811_v31, %v3963_v1 }
 0x1e2   : > { %5912 = vst [vmem:[#allocation74_spill] sm:$0xff] %v4428_v21 }
 0x1ec   : > { %v1577_v12 = vpop.permute.xlu1 %1576 }
 0x1ed   : > { %v4431_v35 = vmul.f32 %v1577_v12, %v3998_v20  ;;  %v5821_v20 = vrot.slane %v4240_v33, 1 }
 0x1f0   : > { %v1573_v37 = vpop.permute.xlu0 %1572  ;;  %v813_v51 = vpop.permute.xlu1 %812 }
 0x1f1   : > { %v4434_v11 = vmul.f32 %v1573_v37, %v4082_v10  ;;  %v4437_v18 = vadd.f32 %v813_v51, %v3977_v9  ;;  %v985_v51 = vsel %vm978_vm3, %v5821_v20, %v5823_v24  ;;  %v1092_v9 = vrot.slane %v4267_v40, 7 }
 0x1f2   : > { %v1332_v20 = vrot.slane %v4275_v43, 7  ;;  %v5913_v43 = vrot.slane %v4257_v42, 7 }
 0x1f4   : > { %v1428_v0 = vpop.permute.xlu0 %1427  ;;  %v1430_v25 = vpop.permute.xlu1 %1429 }
 0x1f5   : > { %v1483_v4 = vmul.f32 %v4187_v6, %v1430_v25  ;;  %v975_v6 = vrot.slane %v4269_v28, 1  ;;  %v974_v25 = vrot.slane %v4245_v39, 1  ;;  %v5936_v28 = vld [vmem:[#allocation36_spill] sm:$0xff] }
 0x1f7   : > { %1499 = vrot.lane.b32.xlu1 %v1483_v4, %s3587_s15  ;;  %v1020_v4 = vmul.f32 %v3955_v61, %v985_v51  ;;  %v1095_v61 = vrot.slane %v4255_v60, 7  ;;  %v5960_v60 = vld [vmem:[#allocation63_spill] sm:$0xff] }
 0x1f8   : > { %v1432_v1 = vpop.permute.xlu0 %1431  ;;  %v1434_v31 = vpop.permute.xlu1 %1433 }
 0x1fc   : > { %v1436_v12 = vpop.permute.xlu0 %1435  ;;  %v1438_v21 = vpop.permute.xlu1 %1437 }
 0x1fd   : > { %v1486_v10 = vmul.f32 %v4199_v32, %v1436_v12  ;;  %v1487_v37 = vmul.f32 %v4192_v13, %v1438_v21  ;;  %v5822_v32 = vrot.slane %v4251_v48, 7  ;;  %v1490_v12 = vmul.f32 %v4219_v46, %v1428_v0 }
 0x1ff   : > { %1505 = vrot.lane.b32.xlu0 %v1486_v10, %s3587_s15  ;;  %1507 = vrot.lane.b32.xlu1 %v1487_v37, %s3587_s15  ;;  %v1105_v40 = vsel %vm729_vm2, %v5822_v32, %v1092_v9  ;;  %v981_v10 = vsel %vm978_vm3, %v974_v25, %v975_v6  ;;  %v1096_v37 = vrot.slane %v4271_v27, 7 }
 0x200   : > { %v1440_v13 = vpop.permute.xlu0 %1439  ;;  %v1442_v21 = vpop.permute.xlu1 %1441  ;;  %v1140_v51 = vmul.f32 %v3953_v59, %v1105_v40  ;;  %v1024_v32 = vmul.f32 %v3945_v55, %v981_v10  ;;  %v1211_v59 = vrot.slane %v4249_v44, 1  ;;  %v5914_v10 = vrot.slane %v4273_v22, 1  ;;  %v5968_v44 = vld [vmem:[#allocation41_spill] sm:$0xff] }
 0x201   : > { %v1101_v27 = vsel %vm729_vm2, %v1095_v61, %v1096_v37 }
 0x202   : > { %v1144_v55 = vmul.f32 %v4096_v29, %v1101_v27  ;;  %v1225_v42 = vsel %vm978_vm3, %v1211_v59, %v5914_v10  ;;  %v1215_v29 = vrot.slane %v4253_v8, 1  ;;  %v898_v27 = vmul.f32 %v3939_v52, %v4315_v53  ;;  %v5918_v8 = vld [vmem:[#allocation47_spill] sm:$0xff]  ;;  %v5919_v52 = vld [vmem:[#allocation45_spill] sm:$0xff] }
 0x203   : > { %1513 = vrot.lane.b32.xlu0 %v1490_v12, %s3587_s15  ;;  %1037 = vrot.lane.b32.xlu1 %v1020_v4, %s3587_s15  ;;  %v1345_v4 = vsel %vm729_vm2, %v5913_v43, %v1332_v20  ;;  %v1484_v53 = vmul.f32 %v5919_v52, %v1432_v1  ;;  %v5920_v43 = vld [vmem:[#allocation48_spill] sm:$0xff] }
 0x204   : > { %v917_v46 = vpop.permute.xlu0 %916  ;;  %v4474_v0 = vpop.permute.xlu1 %1595 }
 0x205   : > { %v4478_v24 = vadd.f32 %v917_v46, %v827_v38  ;;  %v1379_v38 = vmul.f32 %v4145_v50, %v1345_v4  ;;  %v5915_v46 = vrot.slane %v4279_v7, 7  ;;  %v1259_v50 = vmul.f32 %v4074_v15, %v1225_v42  ;;  %v5929_v42 = vld [vmem:[#allocation26_spill] sm:$0xff] }
 0x206   : > { %v901_v15 = vmul.f32 %v3943_v54, %v4291_v49  ;;  %v1489_v49 = vmul.f32 %v5920_v43, %v1442_v21  ;;  %v5921_v54 = vld [vmem:[#allocation58_spill] sm:$0xff]  ;;  %v5927_v21 = vrot.slane %v4313_v26, 7  ;;  %v5931_v26 = vld [vmem:[#allocation24_spill] sm:$0xff] }
 0x207   : > { %1157 = vrot.lane.b32.xlu0 %v1140_v51, %s3587_s15  ;;  %1045 = vrot.lane.b32.xlu1 %v1024_v32, %s3587_s15  ;;  %v5916_v32 = vrot.slane %v4261_v16, 7  ;;  %v5922_v4 = vrot.slane %v5921_v54, 7 }
 0x208   : > { %v919_v12 = vpop.permute.xlu1 %918 }
 0x209   : > { %v4494_v40 = vadd.f32 %v919_v12, %v4284_v56  ;;  %v1341_v51 = vsel %vm729_vm2, %v5916_v32, %v5915_v46  ;;  %v5917_v56 = vrot.slane %v4277_v3, 1  ;;  %v1485_v3 = vmul.f32 %v5918_v8, %v1434_v31  ;;  %v5932_v46 = vld [vmem:[#allocation56_spill] sm:$0xff]  ;;  %v5933_v32 = vld [vmem:[#allocation37_spill] sm:$0xff] }
 0x20a   : > { %v1383_v22 = vmul.f32 %v4151_v19, %v1341_v51  ;;  %v902_v19 = vmul.f32 %v3925_v45, %v4311_v57  ;;  %v1104_v45 = vsel %vm729_vm2, %v1092_v9, %v5922_v4  ;;  %v5924_v57 = vld [vmem:[#allocation49_spill] sm:$0xff]  ;;  %v5925_v12 = vrot.slane %v4281_v47, 1  ;;  %v5943_v8 = vld [vmem:[#allocation68_spill] sm:$0xff] }
 0x20b   : > { %1165 = vrot.lane.b32.xlu0 %v1144_v55, %s3587_s15  ;;  %1395 = vrot.lane.b32.xlu1 %v1379_v38, %s3587_s15  ;;  %v1221_v7 = vsel %vm978_vm3, %v1215_v29, %v5917_v56  ;;  %v1488_v31 = vmul.f32 %v5924_v57, %v1440_v13  ;;  %v5926_v55 = vrot.slane %v4265_v41, 1  ;;  %v1100_v9 = vsel %vm729_vm2, %v1096_v37, %v5927_v21  ;;  %v5928_v38 = vld [vmem:[#allocation18_spill] sm:$0xff]  ;;  %v5937_v56 = vld [vmem:[#allocation39_spill] sm:$0xff] }
 0x20c   : > { %v1263_v16 = vmul.f32 %v4126_v17, %v1221_v7  ;;  %v905_v17 = vmul.f32 %v3951_v58, %v4300_v30  ;;  %v5923_v58 = vld [vmem:[#allocation21_spill] sm:$0xff]  ;;  %v1145_v13 = vmul.f32 %v5929_v42, %v1100_v9  ;;  %v5930_v47 = vrot.slane %v4286_v2, 1  ;;  %v5957_v9 = vld [vmem:[#allocation32_spill] sm:$0xff] }
 0x20d   : > { %v1141_v30 = vmul.f32 %v5923_v58, %v1104_v45  ;;  %v984_v1 = vsel %vm978_vm3, %v5926_v55, %v5925_v12  ;;  %v1260_v51 = vmul.f32 %v5933_v32, %v5932_v46  ;;  %v5935_v2 = vld [vmem:[#allocation57_spill] sm:$0xff]  ;;  %v5947_v4 = vrot.slane %v4251_v48, 7  ;;  %v5952_v12 = vld [vmem:[#allocation28_spill] sm:$0xff]  ;;  %v5953_v55 = vld [vmem:[#allocation22_spill] sm:$0xff] }
 0x20e   : > { %v1021_v10 = vmul.f32 %v5928_v38, %v984_v1  ;;  %v980_v41 = vsel %vm978_vm3, %v975_v6, %v5930_v47  ;;  %v1264_v6 = vmul.f32 %v5936_v28, %v5935_v2  ;;  %v5948_v45 = vld [vmem:[#allocation61_spill] sm:$0xff]  ;;  %v5954_v1 = vld [vmem:[#allocation59_spill] sm:$0xff]  ;;  %v5963_v46 = vrot.slane %v4411_v36, 1  ;;  %v5969_v36 = vld [vmem:[#allocation40_spill] sm:$0xff] }
 0x20f   : > { %1275 = vrot.lane.b32.xlu0 %v1259_v50, %s3587_s15  ;;  %1403 = vrot.lane.b32.xlu1 %v1383_v22, %s3587_s15  ;;  %v1025_v37 = vmul.f32 %v5931_v26, %v980_v41  ;;  %v5934_v50 = vrot.slane %v4317_v14, 7  ;;  %v5940_v14 = vld [vmem:[#allocation65_spill] sm:$0xff]  ;;  %v5949_v58 = vrot.slane %v5948_v45, 7  ;;  %v5955_v21 = vrot.slane %v5954_v1, 7  ;;  %v5962_v26 = vld [vmem:[#allocation34_spill] sm:$0xff]  ;;  %v5967_v2 = vld [vmem:[#allocation67_spill] sm:$0xff] }
 0x210   : > { %v1226_v32 = vsel %vm978_vm3, %v5963_v46, %v1211_v59  ;;  %v1381_v28 = vmul.f32 %v5968_v44, %v5967_v2  ;;  %v5970_v59 = vld [vmem:[#allocation66_spill] sm:$0xff]  ;;  %v5983_v45 = vld [vmem:[#allocation52_spill] sm:$0xff] }
 0x211   : > { %v1344_v22 = vsel %vm729_vm2, %v1332_v20, %v5934_v50  ;;  %v5942_v20 = vrot.slane %v4240_v33, 1  ;;  %v1106_v33 = vsel %vm729_vm2, %v5949_v58, %v5947_v4  ;;  %v1102_v39 = vsel %vm729_vm2, %v5955_v21, %v1095_v61  ;;  %v5961_v61 = vld [vmem:[#allocation35_spill] sm:$0xff]  ;;  %v5966_v50 = vld [vmem:[#allocation38_spill] sm:$0xff]  ;;  %v5982_v4 = vld [vmem:[#allocation25_spill] sm:$0xff] }
 0x212   : > { %v1380_v7 = vmul.f32 %v5937_v56, %v1344_v22  ;;  %v1146_v41 = vmul.f32 %v5961_v61, %v5960_v60  ;;  %v1266_v22 = vmul.f32 %v5966_v50, %v1226_v32  ;;  %v5971_v56 = vld [vmem:[#allocation42_spill] sm:$0xff]  ;;  %v1582_v58 = vmul.f32 %v5983_v45, %v5982_v4  ;;  %v5987_v32 = vld [vmem:[#allocation71_spill] sm:$0xff] }
 0x213   : > { %1283 = vrot.lane.b32.xlu0 %v1263_v16, %s3587_s15  ;;  %914 = vrot.lane.b32.xlu1 %v898_v27, %s3587_s15  ;;  %v5938_v16 = vld [vmem:[#allocation62_spill] sm:$0xff]  ;;  %v5939_v27 = vld [vmem:[#allocation44_spill] sm:$0xff] }
 0x217   : > { %920 = vrot.lane.b32.xlu0 %v901_v15, %s3587_s15  ;;  %922 = vrot.lane.b32.xlu1 %v902_v19, %s3587_s15  ;;  %v1384_v15 = vmul.f32 %v5939_v27, %v5938_v16  ;;  %v5941_v19 = vld [vmem:[#allocation19_spill] sm:$0xff]  ;;  %v5972_v16 = vld [vmem:[#allocation69_spill] sm:$0xff] }
 0x218   : > { %v5973_v27 = vld [vmem:[#allocation43_spill] sm:$0xff] }
 0x21b   : > { %928 = vrot.lane.b32.xlu0 %v905_v17, %s3587_s15  ;;  %1503 = vrot.lane.b32.xlu1 %v1485_v3, %s3587_s15  ;;  %v1022_v17 = vmul.f32 %v5941_v19, %v5940_v14  ;;  %v5944_v3 = vrot.slane %v5943_v8, 1  ;;  %v5974_v14 = vld [vmem:[#allocation30_spill] sm:$0xff] }
 0x21c   : > { %v5975_v19 = vld [vmem:[#allocation50_spill] sm:$0xff] }
 0x21d   : > { %v986_v52 = vsel %vm978_vm3, %v5944_v3, %v5942_v20  ;;  %v5976_v20 = vld [vmem:[#allocation70_spill] sm:$0xff]  ;;  %v5978_v3 = vld [vmem:[#allocation29_spill] sm:$0xff] }
 0x21f   : > { %1501 = vrot.lane.b32.xlu0 %v1484_v53, %s3587_s15  ;;  %1511 = vrot.lane.b32.xlu1 %v1489_v49, %s3587_s15  ;;  %v5945_v53 = vld [vmem:[#allocation17_spill] sm:$0xff]  ;;  %v5946_v49 = vld [vmem:[#allocation20_spill] sm:$0xff] }
 0x220   : > { %v1019_v43 = vmul.f32 %v5945_v53, %v986_v52  ;;  %v1026_v54 = vmul.f32 %v5946_v49, %v4387_v23  ;;  %v1139_v23 = vmul.f32 %v5952_v12, %v1106_v33  ;;  %v5979_v52 = vld [vmem:[#allocation51_spill] sm:$0xff]  ;;  %v5981_v49 = vld [vmem:[#allocation53_spill] sm:$0xff]  ;;  %v4685_v12 = vpop.permute.xlu1 %926 }
 0x221   : > { %v1580_v53 = vmul.f32 %v5979_v52, %v5978_v3  ;;  %v3253_v33 = vld [vmem:[%s5984_s2] ss:$0 sm:$0xff]  ;;  %v5988_v3 = vld [vmem:[#allocation74_spill] sm:$0xff] }
 0x223   : > { %1509 = vrot.lane.b32.xlu0 %v1488_v31, %s3587_s15  ;;  %1159 = vrot.lane.b32.xlu1 %v1141_v30, %s3587_s15  ;;  %v5950_v30 = vld [vmem:[#allocation64_spill] sm:$0xff] }
 0x224   : > { %v5951_v57 = vrot.slane %v5950_v30, 1  ;;  %v5985_v30 = vld [vmem:[#allocation31_spill] sm:$0xff] }
 0x226   : > { %v982_v31 = vsel %vm978_vm3, %v5951_v57, %v974_v25  ;;  %v5956_v25 = vld [vmem:[#allocation60_spill] sm:$0xff]  ;;  %v5986_v57 = vld [vmem:[#allocation54_spill] sm:$0xff] }
 0x227   : > { %1039 = vrot.lane.b32.xlu0 %v1021_v10, %s3587_s15  ;;  %1167 = vrot.lane.b32.xlu1 %v1145_v13, %s3587_s15  ;;  %v1023_v48 = vmul.f32 %v5953_v55, %v982_v31  ;;  %v1142_v38 = vmul.f32 %v5957_v9, %v5956_v25  ;;  %v5958_v10 = vld [vmem:[#allocation23_spill] sm:$0xff]  ;;  %v5959_v13 = vrot.slane %v4399_v62, 1  ;;  %v5964_v62 = vld [vmem:[#allocation72_spill] sm:$0xff]  ;;  %v1584_v31 = vmul.f32 %v5986_v57, %v5985_v30 }
 0x228   : > { %v1143_v42 = vmul.f32 %v5958_v10, %v1102_v39 }
 0x229   : > { %v1222_v47 = vsel %vm978_vm3, %v5959_v13, %v1215_v29  ;;  %v5965_v29 = vld [vmem:[#allocation33_spill] sm:$0xff] }
 0x22b   : > { %1047 = vrot.lane.b32.xlu0 %v1025_v37, %s3587_s15  ;;  %1277 = vrot.lane.b32.xlu1 %v1260_v51, %s3587_s15  ;;  %v1262_v37 = vmul.f32 %v5962_v26, %v1222_v47  ;;  %v1261_v51 = vmul.f32 %v5965_v29, %v5964_v62 }
 0x22f   : > { %1397 = vrot.lane.b32.xlu0 %v1380_v7, %s3587_s15  ;;  %1285 = vrot.lane.b32.xlu1 %v1264_v6, %s3587_s15  ;;  %v1265_v6 = vmul.f32 %v5969_v36, %v4421_v34  ;;  %v1382_v7 = vmul.f32 %v5971_v56, %v5970_v59  ;;  %v5977_v34 = vld [vmem:[#allocation46_spill] sm:$0xff] }
 0x230   : > { %v1386_v8 = vmul.f32 %v5977_v34, %v5976_v20 }
 0x233   : > { %1405 = vrot.lane.b32.xlu0 %v1384_v15, %s3587_s15  ;;  %1041 = vrot.lane.b32.xlu1 %v1022_v17, %s3587_s15  ;;  %v1385_v15 = vmul.f32 %v5973_v27, %v5972_v16  ;;  %v1581_v17 = vmul.f32 %v5975_v19, %v5974_v14 }
 0x237   : > { %1035 = vrot.lane.b32.xlu0 %v1019_v43, %s3587_s15  ;;  %1049 = vrot.lane.b32.xlu1 %v1026_v54, %s3587_s15  ;;  %v5980_v43 = vld [vmem:[#allocation27_spill] sm:$0xff] }
 0x238   : > { %v1583_v54 = vmul.f32 %v5981_v49, %v5980_v43 }
 0x23b   : > { %1043 = vrot.lane.b32.xlu0 %v1023_v48, %s3587_s15  ;;  %1155 = vrot.lane.b32.xlu1 %v1139_v23, %s3587_s15  ;;  %v925_v23 = vpop.permute.xlu0 %924 }
 0x23c   : > { %v943_v25 = vadd.f32 %v925_v23, %v4437_v18 }
 0x23f   : > { %1161 = vrot.lane.b32.xlu0 %v1142_v38, %s3587_s15  ;;  %1163 = vrot.lane.b32.xlu1 %v1143_v42, %s3587_s15 }
 0x243   : > { %1169 = vrot.lane.b32.xlu0 %v1146_v41, %s3587_s15  ;;  %1281 = vrot.lane.b32.xlu1 %v1262_v37, %s3587_s15 }
 0x247   : > { %1279 = vrot.lane.b32.xlu0 %v1261_v51, %s3587_s15  ;;  %1289 = vrot.lane.b32.xlu1 %v1266_v22, %s3587_s15 }
 0x24b   : > { %1287 = vrot.lane.b32.xlu0 %v1265_v6, %s3587_s15  ;;  %1399 = vrot.lane.b32.xlu1 %v1381_v28, %s3587_s15 }
 0x24f   : > { %1401 = vrot.lane.b32.xlu0 %v1382_v7, %s3587_s15  ;;  %1407 = vrot.lane.b32.xlu1 %v1385_v15, %s3587_s15 }
 0x253   : > { %1409 = vrot.lane.b32.xlu0 %v1386_v8, %s3587_s15  ;;  %1599 = vrot.lane.b32.xlu1 %v1581_v17, %s3587_s15 }
 0x257   : > { %1597 = vrot.lane.b32.xlu0 %v1580_v53, %s3587_s15  ;;  %1603 = vrot.lane.b32.xlu1 %v1583_v54, %s3587_s15 }
 0x25b   : > { %1601 = vrot.lane.b32.xlu0 %v1582_v58, %s3587_s15  ;;  %1607 = vrot.lane.b32.xlu1 %v4434_v11, %s3587_s15 }
 0x25f   : > { %1605 = vrot.lane.b32.xlu0 %v1584_v31, %s3587_s15  ;;  %1633 = vrot.lane.b32.xlu1 %v3253_v33, %s3587_s15 }
 0x263   : > { %1609 = vrot.lane.b32.xlu0 %v4431_v35, %s3587_s15 }
 0x269   : > { %v4687_v55 = vpop.permute.xlu1 %1499 }
 0x271   : > { %v4689_v11 = vpop.permute.xlu0 %1505  ;;  %v4691_v48 = vpop.permute.xlu1 %1507 }
 0x275   : > { %v4693_v1 = vpop.permute.xlu0 %1513  ;;  %v1038_v21 = vpop.permute.xlu1 %1037 }
 0x276   : > { %v1060_v39 = vadd.f32 %v1038_v21, %v4478_v24 }
 0x279   : > { %v1158_v9 = vpop.permute.xlu0 %1157  ;;  %v1046_v38 = vpop.permute.xlu1 %1045 }
 0x27a   : > { %v1180_v10 = vadd.f32 %v1158_v9, %v1060_v39  ;;  %v1064_v35 = vadd.f32 %v1046_v38, %v943_v25 }
 0x27d   : > { %v1166_v42 = vpop.permute.xlu0 %1165  ;;  %v1396_v13 = vpop.permute.xlu1 %1395 }
 0x27e   : > { %v1184_v47 = vadd.f32 %v1166_v42, %v1064_v35  ;;  %v5989_v42 = vld [vmem:[#allocation55_spill] sm:$0xff] }
 0x281   : > { %v1276_v60 = vpop.permute.xlu0 %1275  ;;  %v1404_v61 = vpop.permute.xlu1 %1403 }
 0x285   : > { %v1284_v41 = vpop.permute.xlu0 %1283  ;;  %v915_v26 = vpop.permute.xlu1 %914 }
 0x286   : > { %v938_v17 = vadd.f32 %v915_v26, %v4424_v5 }
 0x289   : > { %v921_v37 = vpop.permute.xlu0 %920  ;;  %v923_v46 = vpop.permute.xlu1 %922 }
 0x28a   : > { %v941_v62 = vadd.f32 %v921_v37, %v5987_v32  ;;  %v942_v52 = vadd.f32 %v923_v46, %v5988_v3 }
 0x28d   : > { %v929_v29 = vpop.permute.xlu0 %928  ;;  %v1504_v51 = vpop.permute.xlu1 %1503 }
 0x291   : > { %v1502_v24 = vpop.permute.xlu0 %1501  ;;  %v4698_v50 = vpop.permute.xlu1 %1511 }
 0x295   : > { %v4700_v18 = vpop.permute.xlu0 %1509  ;;  %v1160_v22 = vpop.permute.xlu1 %1159 }
 0x299   : > { %v1040_v2 = vpop.permute.xlu0 %1039  ;;  %v1168_v44 = vpop.permute.xlu1 %1167 }
 0x29a   : > { %v1061_v31 = vadd.f32 %v1040_v2, %v4494_v40 }
 0x29c   : > { %v1181_v39 = vadd.f32 %v1160_v22, %v1061_v31 }
 0x29d   : > { %v1048_v28 = vpop.permute.xlu0 %1047  ;;  %v1278_v36 = vpop.permute.xlu1 %1277 }
 0x29e   : > { %v1300_v6 = vadd.f32 %v1278_v36, %v1180_v10 }
 0x2a1   : > { %v1398_v59 = vpop.permute.xlu0 %1397  ;;  %v1286_v56 = vpop.permute.xlu1 %1285 }
 0x2a2   : > { %v1420_v7 = vadd.f32 %v1398_v59, %v1300_v6  ;;  %v1304_v36 = vadd.f32 %v1286_v56, %v1184_v47 }
 0x2a4   : > { %v1524_v16 = vadd.f32 %v1502_v24, %v1420_v7 }
 0x2a5   : > { %v1406_v27 = vpop.permute.xlu0 %1405  ;;  %v1042_v15 = vpop.permute.xlu1 %1041 }
 0x2a9   : > { %v1036_v14 = vpop.permute.xlu0 %1035  ;;  %v1050_v19 = vpop.permute.xlu1 %1049 }
 0x2aa   : > { %v1059_v20 = vadd.f32 %v1036_v14, %v938_v17 }
 0x2ad   : > { %v1044_v34 = vpop.permute.xlu0 %1043  ;;  %v1156_v8 = vpop.permute.xlu1 %1155 }
 0x2ae   : > { %v1179_v53 = vadd.f32 %v1156_v8, %v1059_v20  ;;  %v1063_v43 = vadd.f32 %v1044_v34, %v942_v52 }
 0x2b0   : > { %v1299_v49 = vadd.f32 %v1276_v60, %v1179_v53  ;;  %v944_v60 = vadd.f32 %v4685_v12, %v5989_v42 }
 0x2b1   : > { %v1162_v54 = vpop.permute.xlu0 %1161  ;;  %v1164_v4 = vpop.permute.xlu1 %1163 }
 0x2b2   : > { %v1419_v45 = vadd.f32 %v1396_v13, %v1299_v49  ;;  %v1183_v58 = vadd.f32 %v1164_v4, %v1063_v43  ;;  %v1065_v37 = vadd.f32 %v1048_v28, %v944_v60 }
 0x2b4   : > { %v1303_v33 = vadd.f32 %v1284_v41, %v1183_v58  ;;  %v1062_v41 = vadd.f32 %v1042_v15, %v941_v62  ;;  %v1185_v40 = vadd.f32 %v1168_v44, %v1065_v37  ;;  %v1523_v12 = vadd.f32 %v4687_v55, %v1419_v45 }
 0x2b5   : > { %v1170_v30 = vpop.permute.xlu0 %1169  ;;  %v1282_v57 = vpop.permute.xlu1 %1281 }
 0x2b6   : > { %v1423_v23 = vadd.f32 %v1404_v61, %v1303_v33  ;;  %v1182_v24 = vadd.f32 %v1162_v54, %v1062_v41  ;;  %v5990_v61 = vld [vmem:[#allocation73_spill] sm:$0xff]  ;;  %v1619_v56 = vadd.f32 %v4474_v0, %v1523_v12 }
 0x2b7   : > { %v945_v2 = vadd.f32 %v929_v29, %v5990_v61 }
 0x2b8   : > { %v1302_v22 = vadd.f32 %v1282_v57, %v1182_v24  ;;  %v1527_v8 = vadd.f32 %v4691_v48, %v1423_v23 }
 0x2b9   : > { %v1280_v21 = vpop.permute.xlu0 %1279  ;;  %v1290_v5 = vpop.permute.xlu1 %1289  ;;  %v1066_v14 = vadd.f32 %v1050_v19, %v945_v2 }
 0x2ba   : > { %v1301_v25 = vadd.f32 %v1280_v21, %v1181_v39 }
 0x2bb   : > { %v1186_v34 = vadd.f32 %v1170_v30, %v1066_v14 }
 0x2bd   : > { %v1288_v9 = vpop.permute.xlu0 %1287  ;;  %v1400_v38 = vpop.permute.xlu1 %1399  ;;  %v1306_v15 = vadd.f32 %v1290_v5, %v1186_v34 }
 0x2be   : > { %v1421_v10 = vadd.f32 %v1400_v38, %v1301_v25  ;;  %v1305_v6 = vadd.f32 %v1288_v9, %v1185_v40 }
 0x2c0   : > { %v1525_v35 = vadd.f32 %v1504_v51, %v1421_v10  ;;  %v1424_v51 = vadd.f32 %v1406_v27, %v1304_v36 }
 0x2c1   : > { %v1402_v26 = vpop.permute.xlu0 %1401  ;;  %v1408_v13 = vpop.permute.xlu1 %1407 }
 0x2c2   : > { %v1422_v17 = vadd.f32 %v1402_v26, %v1302_v22  ;;  %v1425_v20 = vadd.f32 %v1408_v13, %v1305_v6  ;;  %v1528_v29 = vadd.f32 %v4700_v18, %v1424_v51 }
 0x2c4   : > { %v1526_v44 = vadd.f32 %v4689_v11, %v1422_v17  ;;  %v1529_v47 = vadd.f32 %v4698_v50, %v1425_v20 }
 0x2c5   : > { %v1410_v46 = vpop.permute.xlu0 %1409  ;;  %v1600_v32 = vpop.permute.xlu1 %1599 }
 0x2c6   : > { %v1426_v19 = vadd.f32 %v1410_v46, %v1306_v15  ;;  %v1621_v27 = vadd.f32 %v1600_v32, %v1525_v35 }
 0x2c9   : > { %v1598_v59 = vpop.permute.xlu0 %1597  ;;  %v1604_v7 = vpop.permute.xlu1 %1603 }
 0x2ca   : > { %v1620_v3 = vadd.f32 %v1598_v59, %v1524_v16  ;;  %v1623_v52 = vadd.f32 %v1604_v7, %v1527_v8  ;;  %v1530_v16 = vadd.f32 %v4693_v1, %v1426_v19 }
 0x2cd   : > { %v1602_v28 = vpop.permute.xlu0 %1601  ;;  %v1608_v62 = vpop.permute.xlu1 %1607 }
 0x2ce   : > { %v1622_v53 = vadd.f32 %v1602_v28, %v1526_v44  ;;  %v1625_v55 = vadd.f32 %v1608_v62, %v1529_v47 }
 0x2d1   : > { %v1606_v43 = vpop.permute.xlu0 %1605  ;;  %v1634_v49 = vpop.permute.xlu1 %1633 }
 0x2d2   : > { %v1624_v54 = vadd.f32 %v1606_v43, %v1528_v29  ;;  %v4714_v4 = vadd.f32 %v1634_v49, %v1619_v56  ;;  %v4716_v48 = vadd.f32 %v1634_v49, %v1620_v3  ;;  %v4718_v11 = vadd.f32 %v1634_v49, %v1621_v27 }
 0x2d3   : > { %v4720_v50 = vadd.f32 %v1634_v49, %v1622_v53  ;;  %v4722_v18 = vadd.f32 %v1634_v49, %v1623_v52  ;;  %v4724_v0 = vadd.f32 %v1634_v49, %v1625_v55 }
 0x2d4   : > { %5991 = vst [vmem:[#allocation47_spill] sm:$0xff] %v4714_v4  ;;  %5992 = vst [vmem:[#allocation45_spill] sm:$0xff] %v4716_v48  ;;  %v4726_v45 = vadd.f32 %v1634_v49, %v1624_v54  ;;  %1647 = sbr.rel (%p3254_p2) target bundleno = 2282 (0x8ea), region = 68 }
 0x2d5   : > { %5993 = vst [vmem:[#allocation48_spill] sm:$0xff] %v4718_v11  ;;  %5994 = vst [vmem:[#allocation58_spill] sm:$0xff] %v4720_v50  ;;  %v1610_v58 = vpop.permute.xlu0 %1609 }
 0x2d6   : > { %5995 = vst [vmem:[#allocation21_spill] sm:$0xff] %v4722_v18  ;;  %5996 = vst [vmem:[#allocation49_spill] sm:$0xff] %v4724_v0  ;;  %v1626_v33 = vadd.f32 %v1610_v58, %v1530_v16 }
 0x2d7   : > { %5997 = vst [vmem:[#allocation18_spill] sm:$0xff] %v4726_v45 }
 0x2d8   : > { %v4729_v30 = vadd.f32 %v1634_v49, %v1626_v33 }
 0x2da   : > { %5998 = vst [vmem:[#allocation26_spill] sm:$0xff] %v4729_v30 }
 0x2db   : > { %v1654_v57 = vmax.f32 %v4724_v0, 0.0  ;;  %v1655_v31 = vmax.f32 %v4729_v30, 0.0  ;;  %v1648_v23 = vmax.f32 %v4714_v4, 0.0  ;;  %v1649_v21 = vmax.f32 %v4716_v48, 0.0  ;;  %s3590_s21 = smov 64   ;;  %v4753_v13 = vld [vmem:[%s5777_s1 + $0x8] sm:$0xff]  ;;  %s5999_s12 = scalar_lea.vmem %s5781_s5, %s6079_s13 }
 0x2dc   : > { %v1652_v5 = vmax.f32 %v4722_v18, 0.0  ;;  %v1653_v1 = vmax.f32 %v4726_v45, 0.0  ;;  %v1650_v39 = vmax.f32 %v4718_v11, 0.0  ;;  %v3589_v38 = vmov 0   ;;  %v3471_v60 = vld [vmem:[%s3771_s23 + $0x4] ss:$8 sps:$4 sm:$0xff]  }
 0x2dd   : > { %v1659_v25 = vpack.c.bf16 %v1655_v31, %v1654_v57  ;;  %v1656_v9 = vpack.c.bf16 %v1649_v21, %v1648_v23  ;;  %3428 = vset.pattern.permute.xlu1 %v3589_v38  ;;  %v1651_v10 = vmax.f32 %v4720_v50, 0.0  ;;  %1728 = vmatprep.mubr.bf16.mxu0 %v3589_v38  ;;  %v3473_v26 = vld [vmem:[%s3771_s23] ss:$8 sps:$4 sm:$0xff]   ;;  %v4765_v41 = vld [vmem:[%s5777_s1 + $0x10] sm:$0xff]  ;;  %v3591_v32 = vmov 1   ;;  %v4781_v24 = vld [vmem:[%s5777_s1 + $0x18] sm:$0xff] }
 0x2de   : > { %1758 = vmatprep.mubr.bf16.mxu1 %v3589_v38  ;;  %3427 = vset.pattern.permute.xlu0 %v3589_v38  ;;  %v1658_v35 = vpack.c.bf16 %v1653_v1, %v1652_v5  ;;  %v4758_v37 = vld [vmem:[%s5777_s1] sm:$0xff]  ;;  %v4770_v46 = vld [vmem:[%s5777_s1 + $0x30] sm:$0xff]  ;;  %v3592_v40 = vmov 2   ;;  %v3593_v2 = vmov 6   ;;  %v3594_v36 = vmov 3   ;;  %v4809_v22 = vld [vmem:[%s5777_s1 + $0x28] sm:$0xff] }
 0x2df   : > { %1672 = vrot.lane.b32.xlu1 %v1659_v25, %s3590_s21  ;;  %1666 = vrot.lane.b32.xlu0 %v1656_v9, %s3590_s21  ;;  %v1657_v42 = vpack.c.bf16 %v1651_v10, %v1650_v39  ;;  %v4792_v61 = vld [vmem:[%s5777_s1 + $0x20] sm:$0xff]  ;;  %v4815_v6 = vld [vmem:[%s5777_s1 + $0x38] sm:$0xff]  ;;  %v3595_v59 = vmov 5   ;;  %v3596_v7 = vmov 7   ;;  %v3597_v14 = vmov 8   ;;  %s3598_s28 = smov 112  }
 0x2e0   : > { %1696 = vmatprep.subr.bf16.mxu0 %v3471_v60  ;;  %3299 = vmatprep.subr.bf16.mxu1 %v3471_v60  ;;  %v3261_v28 = vld [vmem:[%s5999_s12] ss:$0 sm:$0xff]  ;;  %s3599_s29 = smov 96   ;;  %s3600_s15 = smov 80   ;;  %vm3605_vm4 = vmmov 0   ;;  %vm2690_vm5 = vcmask 654848  }
 0x2e1   : > { %1697 = vmatpush1.bf16.msra.mxu0 %v3473_v26  ;;  %3300 = vmatpush1.bf16.msra.mxu1 %v3473_v26  ;;  %s3601_s30 = smov 48   ;;  %s3602_s27 = smov 32   ;;  %vm2798_vm6 = vcmask 1043456   ;;  %vm2794_vm7 = vcmask 31744  }
 0x2e2   : > { %s3603_s0 = smov 16  }
 0x2e3   : > { %1670 = vrot.lane.b32.xlu1 %v1658_v35, %s3590_s21  ;;  %1668 = vrot.lane.b32.xlu0 %v1657_v42, %s3590_s21 }
 0x2e7   : > { %1800 = vperm.xlu1 %3428, %v4753_v13   ;;  %1795 = vperm.xlu0 %3427, %v4758_v37  }
 0x2eb   : > { %1805 = vperm.xlu1 %3428, %v4765_v41   ;;  %1825 = vperm.xlu0 %3427, %v4770_v46  }
 0x2ef   : > { %3429 = vset.pattern.permute.xlu1 %v3591_v32  ;;  %3439 = vset.pattern.permute.xlu0 %v3591_v32 }
 0x2f0   : > { %1918 = vperm.xlu1 %3429, %v4753_v13   ;;  %1914 = vperm.xlu0 %3439, %v4758_v37  }
 0x2f4   : > { %3430 = vset.pattern.permute.xlu1 %v3589_v38  ;;  %1922 = vperm.xlu0 %3439, %v4765_v41  }
 0x2f5   : > { %1810 = vperm.xlu1 %3430, %v4781_v24  }
 0x2f8   : > { %1938 = vperm.xlu0 %3439, %v4770_v46  }
 0x2f9   : > { %3431 = vset.pattern.permute.xlu1 %v3592_v40 }
 0x2fa   : > { %2034 = vperm.xlu1 %3431, %v4758_v37  }
 0x2fc   : > { %3447 = vset.pattern.permute.xlu0 %v3593_v2 }
 0x2fd   : > { %2402 = vperm.xlu0 %3447, %v4765_v41  }
 0x2fe   : > { %3432 = vset.pattern.permute.xlu1 %v3589_v38 }
 0x2ff   : > { %1815 = vperm.xlu1 %3432, %v4792_v61  }
 0x301   : > { %3448 = vset.pattern.permute.xlu0 %v3592_v40 }
 0x302   : > { %2038 = vperm.xlu0 %3448, %v4753_v13  }
 0x303   : > { %3433 = vset.pattern.permute.xlu1 %v3591_v32 }
 0x304   : > { %1926 = vperm.xlu1 %3433, %v4781_v24  }
 0x306   : > { %2042 = vperm.xlu0 %3448, %v4765_v41  }
 0x308   : > { %3434 = vset.pattern.permute.xlu1 %v3594_v36 }
 0x309   : > { %2154 = vperm.xlu1 %3434, %v4758_v37  }
 0x30a   : > { %2050 = vperm.xlu0 %3448, %v4792_v61  }
 0x30d   : > { %3435 = vset.pattern.permute.xlu1 %v3589_v38 }
 0x30e   : > { %1820 = vperm.xlu1 %3435, %v4809_v22   ;;  %2062 = vperm.xlu0 %3448, %v4815_v6  }
 0x312   : > { %3436 = vset.pattern.permute.xlu1 %v3591_v32  ;;  %3456 = vset.pattern.permute.xlu0 %v3594_v36 }
 0x313   : > { %1930 = vperm.xlu1 %3436, %v4792_v61   ;;  %2158 = vperm.xlu0 %3456, %v4753_v13  }
 0x317   : > { %3437 = vset.pattern.permute.xlu1 %v3592_v40  ;;  %2162 = vperm.xlu0 %3456, %v4765_v41  }
 0x318   : > { %2046 = vperm.xlu1 %3437, %v4781_v24  }
 0x31b   : > { %2182 = vperm.xlu0 %3456, %v4815_v6  }
 0x31c   : > { %3438 = vset.pattern.permute.xlu1 %v3595_v59 }
 0x31d   : > { %2274 = vperm.xlu1 %3438, %v4758_v37  }
 0x31f   : > { %3461 = vset.pattern.permute.xlu0 %v3595_v59 }
 0x320   : > { %2278 = vperm.xlu0 %3461, %v4753_v13  }
 0x321   : > { %3440 = vset.pattern.permute.xlu1 %v3591_v32 }
 0x322   : > { %1934 = vperm.xlu1 %3440, %v4809_v22  }
 0x324   : > { %2282 = vperm.xlu0 %3461, %v4765_v41  }
 0x326   : > { %3441 = vset.pattern.permute.xlu1 %v3594_v36 }
 0x327   : > { %2166 = vperm.xlu1 %3441, %v4781_v24  }
 0x328   : > { %2302 = vperm.xlu0 %3461, %v4815_v6  }
 0x32b   : > { %3442 = vset.pattern.permute.xlu1 %v3593_v2 }
 0x32c   : > { %2394 = vperm.xlu1 %3442, %v4758_v37   ;;  %3465 = vset.pattern.permute.xlu0 %v3596_v7 }
 0x32d   : > { %2506 = vperm.xlu0 %3465, %v4765_v41  }
 0x330   : > { %2398 = vperm.xlu1 %3442, %v4753_v13  }
 0x331   : > { %2510 = vperm.xlu0 %3465, %v4781_v24  }
 0x334   : > { %3443 = vset.pattern.permute.xlu1 %v3589_v38 }
 0x335   : > { %1830 = vperm.xlu1 %3443, %v4815_v6   ;;  %2514 = vperm.xlu0 %3465, %v4792_v61  }
 0x339   : > { %3444 = vset.pattern.permute.xlu1 %v3592_v40  ;;  %2518 = vperm.xlu0 %3465, %v4809_v22  }
 0x33a   : > { %2054 = vperm.xlu1 %3444, %v4809_v22  }
 0x33d   : > { %2522 = vperm.xlu0 %3465, %v4770_v46  }
 0x33e   : > { %3445 = vset.pattern.permute.xlu1 %v3594_v36 }
 0x33f   : > { %2170 = vperm.xlu1 %3445, %v4792_v61  }
 0x341   : > { %2526 = vperm.xlu0 %3465, %v4815_v6  }
 0x343   : > { %3446 = vset.pattern.permute.xlu1 %v3595_v59 }
 0x344   : > { %2286 = vperm.xlu1 %3446, %v4781_v24  }
 0x345   : > { %3470 = vset.pattern.permute.xlu0 %v3597_v14 }
 0x346   : > { %2679 = vrot.lane.b32.xlu0 %v3261_v28, %s3590_s21 }
 0x348   : > { %3449 = vset.pattern.permute.xlu1 %v3596_v7 }
 0x349   : > { %2498 = vperm.xlu1 %3449, %v4758_v37  }
 0x34d   : > { %2502 = vperm.xlu1 %3449, %v4753_v13  }
 0x351   : > { %v1673_v51 = vpop.permute.xlu1 %1672  ;;  %3450 = vset.pattern.permute.xlu1 %v3591_v32  ;;  %v1667_v17 = vpop.permute.xlu0 %1666 }
 0x352   : > { %3260 = vmatmul.mubr.msk.bf16.vlgmr.msra.gmra.mrb[0].mxu1 %vm633_vm1, %v1673_v51  ;;  %1942 = vperm.xlu1 %3450, %v4815_v6  }
 0x353   : > { %3257 = vmatmul.mubr.msk.bf16.vlgmr.msra.gmra.mrb[0].mxu0 %vm633_vm1, %v1667_v17 }
 0x354   : > { %1738 = vmatprep.mubr.bf16.mxu0 %v3589_v38 }
 0x355   : > { %v1669_v20 = vpop.permute.xlu0 %1668  ;;  %v1671_v12 = vpop.permute.xlu1 %1670 }
 0x356   : > { %3451 = vset.pattern.permute.xlu1 %v3592_v40 }
 0x357   : > { %2058 = vperm.xlu1 %3451, %v4770_v46  }
 0x35b   : > { %3258 = vmatmul.mubr.msk.bf16.gmra.mrb[4].mxu0 %vm633_vm1, %v1669_v20  ;;  %3452 = vset.pattern.permute.xlu1 %v3594_v36 }
 0x35c   : > { %2174 = vperm.xlu1 %3452, %v4809_v22   ;;  %1748 = vmatprep.mubr.bf16.mxu0 %v3589_v38 }
 0x360   : > { %3453 = vset.pattern.permute.xlu1 %v3595_v59 }
 0x361   : > { %2290 = vperm.xlu1 %3453, %v4792_v61  }
 0x363   : > { %3259 = vmatmul.mubr.msk.bf16.gmra.mrb[8].mxu0 %vm633_vm1, %v1671_v12 }
 0x365   : > { %3454 = vset.pattern.permute.xlu1 %v3593_v2 }
 0x366   : > { %2406 = vperm.xlu1 %3454, %v4781_v24   ;;  %v4889_v34 = vpop.permute.xlu1 %1800  ;;  %v4938_v33 = vpop.permute.xlu0 %1795 }
 0x36a   : > { %3455 = vset.pattern.permute.xlu1 %v3597_v14  ;;  %v4899_v62 = vpop.permute.xlu1 %1805  ;;  %v4942_v31 = vpop.permute.xlu0 %1825 }
 0x36b   : > { %2594 = vperm.xlu1 %3455, %v4758_v37  }
 0x36f   : > { %2598 = vperm.xlu1 %3455, %v4753_v13   ;;  %v4903_v15 = vpop.permute.xlu1 %1918  ;;  %v4946_v21 = vpop.permute.xlu0 %1914 }
 0x373   : > { %3457 = vset.pattern.permute.xlu1 %v3594_v36  ;;  %v4950_v1 = vpop.permute.xlu0 %1922 }
 0x374   : > { %2178 = vperm.xlu1 %3457, %v4770_v46   ;;  %v4906_v8 = vpop.permute.xlu1 %1810 }
 0x377   : > { %v4956_v9 = vpop.permute.xlu0 %1938 }
 0x378   : > { %3458 = vset.pattern.permute.xlu1 %v3595_v59 }
 0x379   : > { %2294 = vperm.xlu1 %3458, %v4809_v22   ;;  %v4908_v44 = vpop.permute.xlu1 %2034 }
 0x37c   : > { %v5011_v20 = vpop.permute.xlu0 %2402 }
 0x37d   : > { %3459 = vset.pattern.permute.xlu1 %v3593_v2 }
 0x37e   : > { %2410 = vperm.xlu1 %3459, %v4792_v61   ;;  %v4910_v47 = vpop.permute.xlu1 %1815 }
 0x381   : > { %v5045_v30 = vpop.permute.xlu0 %2038 }
 0x382   : > { %3460 = vset.pattern.permute.xlu1 %v3597_v14 }
 0x383   : > { %2602 = vperm.xlu1 %3460, %v4765_v41   ;;  %v4912_v29 = vpop.permute.xlu1 %1926 }
 0x387   : > { %3462 = vset.pattern.permute.xlu1 %v3595_v59 }
 0x388   : > { %2298 = vperm.xlu1 %3462, %v4770_v46   ;;  %v4914_v56 = vpop.permute.xlu1 %2154 }
 0x38c   : > { %3463 = vset.pattern.permute.xlu1 %v3593_v2 }
 0x38d   : > { %2414 = vperm.xlu1 %3463, %v4809_v22   ;;  %v4916_v19 = vpop.permute.xlu1 %1820 }
 0x391   : > { %3464 = vset.pattern.permute.xlu1 %v3597_v14 }
 0x392   : > { %2606 = vperm.xlu1 %3464, %v4781_v24   ;;  %v4918_v27 = vpop.permute.xlu1 %1930 }
 0x396   : > { %3466 = vset.pattern.permute.xlu1 %v3593_v2 }
 0x397   : > { %2418 = vperm.xlu1 %3466, %v4770_v46   ;;  %v4920_v3 = vpop.permute.xlu1 %2046 }
 0x39b   : > { %3467 = vset.pattern.permute.xlu1 %v3597_v14 }
 0x39c   : > { %2610 = vperm.xlu1 %3467, %v4792_v61   ;;  %v4922_v52 = vpop.permute.xlu1 %2274 }
 0x3a0   : > { %3468 = vset.pattern.permute.xlu1 %v3593_v2 }
 0x3a1   : > { %2422 = vperm.xlu1 %3468, %v4815_v6   ;;  %v4924_v53 = vpop.permute.xlu1 %1934 }
 0x3a5   : > { %3469 = vset.pattern.permute.xlu1 %v3597_v14 }
 0x3a6   : > { %2614 = vperm.xlu1 %3469, %v4809_v22   ;;  %v4926_v55 = vpop.permute.xlu1 %2166 }
 0x3aa   : > { %2618 = vperm.xlu1 %3469, %v4770_v46  }
 0x3ab   : > { %v4928_v43 = vpop.permute.xlu1 %2394 }
 0x3ae   : > { %2622 = vperm.xlu1 %3469, %v4815_v6  }
 0x3af   : > { %v4930_v49 = vpop.permute.xlu1 %2398 }
 0x3b4   : > { %v4932_v54 = vpop.permute.xlu1 %1830 }
 0x3b9   : > { %v4934_v16 = vpop.permute.xlu1 %2054 }
 0x3ba   : > { %6000 = vst [vmem:[#allocation75_spill] sm:$0xff] %v4934_v16 }
 0x3be   : > { %v4936_v58 = vpop.permute.xlu1 %2170 }
 0x3bf   : > { %6001 = vst [vmem:[#allocation76_spill] sm:$0xff] %v4936_v58 }
 0x3c3   : > { %v4940_v57 = vpop.permute.xlu1 %2286 }
 0x3c4   : > { %6002 = vst [vmem:[#allocation77_spill] sm:$0xff] %v4940_v57 }
 0x3c8   : > { %v4944_v23 = vpop.permute.xlu1 %2498 }
 0x3cc   : > { %v4948_v5 = vpop.permute.xlu1 %2502 }
 0x3d1   : > { %v4952_v39 = vpop.permute.xlu1 %1942 }
 0x3d6   : > { %v4974_v32 = vpop.permute.xlu1 %2058 }
 0x3d7   : > { %6005 = vst [vmem:[#allocation80_spill] sm:$0xff] %v4974_v32 }
 0x3db   : > { %v5013_v12 = vpop.permute.xlu1 %2174 }
 0x3dc   : > { %6009 = vst [vmem:[#allocation84_spill] sm:$0xff] %v5013_v12 }
 0x425   : > { %v4954_v25 = vpop.f32.mrb[0].mxu1 }
 0x426   : > { %v4958_v38 = vpop.f32.mrb[0].mxu0  ;;  %v4960_v10 = vpop.f32.mrb[1].mxu1  ;;  %v5825_v35 = vrot.slane %v4954_v25, 7 }
 0x427   : > { %v5824_v42 = vrot.slane %v4960_v10, 1  ;;  %1889 = vrot.lane.b32.xlu1 %v4958_v38, %s3598_s28  ;;  %1993 = vrot.lane.b32.xlu0 %v4958_v38, %s3599_s29  ;;  %v1732_v60 = vpop.f32.mrb[1].mxu0  ;;  %v4968_v26 = vpop.f32.mrb[2].mxu1  ;;  %v1769_v46 = vrot.slane %v4958_v38, 7 }
 0x428   : > { %6003 = vst [vmem:[#allocation78_spill] sm:$0xff] %v4968_v26  ;;  %v4970_v13 = vpop.f32.mrb[2].mxu0  ;;  %v1766_v37 = vpop.f32.mrb[3].mxu1  ;;  %v1776_v41 = vrot.slane %v4968_v26, 7  ;;  %v2577_v24 = vrot.slane %v1732_v60, 1 }
 0x429   : > { %6004 = vst [vmem:[#allocation79_spill] sm:$0xff] %v4970_v13  ;;  %v1736_v40 = vpop.f32.mrb[3].mxu0  ;;  %v2584_v61 = vrot.slane %v1766_v37, 1  ;;  %v1770_v2 = vrot.slane %v4970_v13, 7 }
 0x42a   : > { %v2578_v36 = vrot.slane %v1736_v40, 1  ;;  %v4981_v22 = vsel %vm729_vm2, %v5825_v35, %v1776_v41  ;;  %v4985_v6 = vsel %vm729_vm2, %v1776_v41, %v1769_v46  ;;  %v5043_v35 = vpop.permute.xlu1 %2290 }
 0x42b   : > { %v4991_v59 = vsel %vm978_vm3, %v5824_v42, %v2584_v61  ;;  %v4995_v7 = vsel %vm978_vm3, %v2584_v61, %v2577_v24  ;;  %2113 = vrot.lane.b32.xlu1 %v4958_v38, %s3600_s15  ;;  %2233 = vrot.lane.b32.xlu0 %v4958_v38, %s3601_s30  ;;  %v5007_v51 = vsel %vm729_vm2, %v1769_v46, %v1770_v2 }
 0x42c   : > { %6006 = vst [vmem:[#allocation81_spill] sm:$0xff] %v4991_v59  ;;  %6007 = vst [vmem:[#allocation82_spill] sm:$0xff] %v4995_v7  ;;  %v5003_v14 = vsel %vm978_vm3, %v2577_v24, %v2578_v36  ;;  %v6012_v7 = vrot.slane %v4954_v25, 7  ;;  %v1833_v16 = vmul.f32 %v4938_v33, %v4981_v22 }
 0x42d   : > { %6008 = vst [vmem:[#allocation83_spill] sm:$0xff] %v5003_v14  ;;  %6010 = vst [vmem:[#allocation85_spill] sm:$0xff] %v5043_v35  ;;  %v1835_v35 = vmul.f32 %v4899_v62, %v5007_v51 }
 0x42e   : > { %v5009_v17 = vpop.f32.mrb[4].mxu0  ;;  %v5065_v4 = vpop.permute.xlu1 %2406 }
 0x42f   : > { %2245 = vrot.lane.b32.xlu1 %v4954_v25, %s3601_s30  ;;  %2353 = vrot.lane.b32.xlu0 %v4958_v38, %s3602_s27  ;;  %v1742_v28 = vpop.f32.mrb[5].mxu0  ;;  %v1771_v60 = vrot.slane %v5009_v17, 7  ;;  %6011 = vst [vmem:[#allocation86_spill] sm:$0xff] %v5065_v4  ;;  %v1834_v4 = vmul.f32 %v4889_v34, %v4985_v6 }
 0x430   : > { %v2579_v37 = vrot.slane %v1742_v28, 1  ;;  %v5020_v41 = vpop.f32.mrb[6].mxu0 }
 0x431   : > { %v1746_v46 = vpop.f32.mrb[7].mxu0  ;;  %v5024_v24 = vsel %vm729_vm2, %v1770_v2, %v1771_v60  ;;  %v1772_v40 = vrot.slane %v5020_v41, 7 }
 0x432   : > { %v5029_v61 = vsel %vm978_vm3, %v2578_v36, %v2579_v37  ;;  %v2580_v42 = vrot.slane %v1746_v46, 1 }
 0x433   : > { %1901 = vrot.lane.b32.xlu1 %v4954_v25, %s3598_s28  ;;  %2005 = vrot.lane.b32.xlu0 %v4954_v25, %s3599_s29  ;;  %v5037_v28 = vsel %vm729_vm2, %v1771_v60, %v1772_v40 }
 0x434   : > { %v5041_v2 = vsel %vm978_vm3, %v2579_v37, %v2580_v42 }
 0x436   : > { %v5047_v36 = vpop.f32.mrb[8].mxu0 }
 0x437   : > { %2125 = vrot.lane.b32.xlu0 %v4954_v25, %s3600_s15  ;;  %1995 = vrot.lane.b32.xlu1 %v4970_v13, %s3599_s29  ;;  %v1752_v46 = vpop.f32.mrb[9].mxu0  ;;  %v1773_v60 = vrot.slane %v5047_v36, 7 }
 0x438   : > { %v2581_v0 = vrot.slane %v1752_v46, 1  ;;  %v5054_v45 = vpop.f32.mrb[10].mxu0  ;;  %v5071_v46 = vpop.permute.xlu0 %2042 }
 0x439   : > { %v1756_v37 = vpop.f32.mrb[11].mxu0  ;;  %v5058_v18 = vsel %vm729_vm2, %v1772_v40, %v1773_v60  ;;  %v1774_v50 = vrot.slane %v5054_v45, 7 }
 0x43a   : > { %v5063_v48 = vsel %vm978_vm3, %v2580_v42, %v2581_v0  ;;  %v2582_v11 = vrot.slane %v1756_v37, 1  ;;  %v6013_v37 = vrot.slane %v4960_v10, 1 }
 0x43b   : > { %2365 = vrot.lane.b32.xlu0 %v4954_v25, %s3602_s27  ;;  %1903 = vrot.lane.b32.xlu1 %v4968_v26, %s3598_s28  ;;  %v5075_v40 = vsel %vm729_vm2, %v1773_v60, %v1774_v50  ;;  %v5081_v42 = vsel %vm729_vm2, %v1774_v50, %v6012_v7  ;;  %v2595_v60 = vpop.permute.xlu1 %2594 }
 0x43c   : > { %v5087_v14 = vsel %vm978_vm3, %v2582_v11, %v6013_v37  ;;  %v5091_v59 = vsel %vm978_vm3, %v2581_v0, %v2582_v11  ;;  %v5097_v50 = vpop.permute.xlu0 %2050 }
 0x43f   : > { %2485 = vrot.lane.b32.xlu0 %v4954_v25, %s3603_s0  ;;  %2115 = vrot.lane.b32.xlu1 %v4970_v13, %s3600_s15  ;;  %v2599_v10 = vpop.permute.xlu1 %2598 }
 0x440   : > { %v5107_v11 = vpop.permute.xlu0 %2062  ;;  %v2626_v6 = vmul.f32 %v2599_v10, %v5041_v2 }
 0x443   : > { %2473 = vrot.lane.b32.xlu0 %v4958_v38, %s3603_s0  ;;  %2235 = vrot.lane.b32.xlu1 %v4970_v13, %s3601_s30  ;;  %v5113_v0 = vpop.permute.xlu1 %2178 }
 0x444   : > { %6014 = vst [vmem:[#allocation87_spill] sm:$0xff] %v5113_v0  ;;  %v5115_v7 = vpop.permute.xlu0 %2158 }
 0x447   : > { %2007 = vrot.lane.b32.xlu0 %v4968_v26, %s3599_s29  ;;  %2355 = vrot.lane.b32.xlu1 %v4970_v13, %s3602_s27  ;;  %v5121_v37 = vpop.permute.xlu1 %2294 }
 0x448   : > { %6015 = vst [vmem:[#allocation88_spill] sm:$0xff] %v5121_v37  ;;  %v5127_v12 = vpop.permute.xlu0 %2162 }
 0x44b   : > { %2127 = vrot.lane.b32.xlu0 %v4968_v26, %s3600_s15  ;;  %2247 = vrot.lane.b32.xlu1 %v4968_v26, %s3601_s30  ;;  %v5135_v0 = vpop.permute.xlu1 %2410 }
 0x44c   : > { %6016 = vst [vmem:[#allocation89_spill] sm:$0xff] %v5135_v0  ;;  %v5137_v37 = vpop.permute.xlu0 %2182 }
 0x44f   : > { %1891 = vrot.lane.b32.xlu0 %v4970_v13, %s3598_s28  ;;  %2367 = vrot.lane.b32.xlu1 %v4968_v26, %s3602_s27  ;;  %v2603_v33 = vpop.permute.xlu1 %2602 }
 0x450   : > { %v5144_v22 = vpop.permute.xlu0 %2278 }
 0x453   : > { %2475 = vrot.lane.b32.xlu0 %v4970_v13, %s3603_s0  ;;  %2487 = vrot.lane.b32.xlu1 %v4968_v26, %s3603_s0  ;;  %v2625_v26 = vmul.f32 %v2595_v60, %v5029_v61  ;;  %v1838_v61 = vmul.f32 %v4916_v19, %v5058_v18 }
 0x454   : > { %v5156_v34 = vpop.permute.xlu0 %2282 }
 0x457   : > { %1851 = vrot.lane.b32.xlu0 %v1834_v4, %s3590_s21  ;;  %1849 = vrot.lane.b32.xlu1 %v1833_v16, %s3590_s21  ;;  %v5154_v4 = vpop.permute.xlu1 %2298 }
 0x458   : > { %v5164_v16 = vpop.permute.xlu0 %2302 }
 0x45b   : > { %2117 = vrot.lane.b32.xlu0 %v5009_v17, %s3600_s15  ;;  %1853 = vrot.lane.b32.xlu1 %v1835_v35, %s3590_s21  ;;  %v5162_v62 = vpop.permute.xlu1 %2414 }
 0x45c   : > { %6017 = vst [vmem:[#allocation90_spill] sm:$0xff] %v5162_v62  ;;  %v5175_v51 = vpop.permute.xlu0 %2506 }
 0x45f   : > { %2237 = vrot.lane.b32.xlu0 %v5009_v17, %s3601_s30  ;;  %1997 = vrot.lane.b32.xlu1 %v5009_v17, %s3599_s29  ;;  %v2607_v35 = vpop.permute.xlu1 %2606 }
 0x460   : > { %v5182_v0 = vpop.permute.xlu0 %2510  ;;  %v2628_v19 = vmul.f32 %v2607_v35, %v5091_v59  ;;  %v1840_v59 = vmul.f32 %v4932_v54, %v5081_v42 }
 0x461   : > { %6018 = vst [vmem:[#allocation91_spill] sm:$0xff] %v5182_v0 }
 0x463   : > { %1893 = vrot.lane.b32.xlu0 %v5009_v17, %s3598_s28  ;;  %2477 = vrot.lane.b32.xlu1 %v5009_v17, %s3603_s0  ;;  %v5180_v62 = vpop.permute.xlu1 %2418 }
 0x464   : > { %v5192_v10 = vpop.permute.xlu0 %2514 }
 0x465   : > { %6019 = vst [vmem:[#allocation92_spill] sm:$0xff] %v5192_v10  ;;  %v1837_v10 = vmul.f32 %v4910_v47, %v5037_v28  ;;  %v1839_v28 = vmul.f32 %v4942_v31, %v5075_v40 }
 0x467   : > { %2357 = vrot.lane.b32.xlu0 %v5009_v17, %s3602_s27  ;;  %1999 = vrot.lane.b32.xlu1 %v5020_v41, %s3599_s29  ;;  %v2611_v2 = vpop.permute.xlu1 %2610 }
 0x468   : > { %v2519_v13 = vpop.permute.xlu0 %2518 }
 0x46b   : > { %2119 = vrot.lane.b32.xlu0 %v5020_v41, %s3600_s15  ;;  %2121 = vrot.lane.b32.xlu1 %v5047_v36, %s3600_s15  ;;  %v5200_v57 = vpop.permute.xlu1 %2422 }
 0x46f   : > { %2239 = vrot.lane.b32.xlu0 %v5020_v41, %s3601_s30  ;;  %1897 = vrot.lane.b32.xlu1 %v5047_v36, %s3598_s28 }
 0x473   : > { %1895 = vrot.lane.b32.xlu0 %v5020_v41, %s3598_s28  ;;  %2643 = vrot.lane.b32.xlu1 %v2626_v6, %s3590_s21  ;;  %v1836_v6 = vmul.f32 %v4906_v8, %v5024_v24  ;;  %v5210_v8 = vpop.permute.xlu1 %2614  ;;  %v2523_v24 = vpop.permute.xlu0 %2522 }
 0x474   : > { %6020 = vst [vmem:[#allocation93_spill] sm:$0xff] %v5210_v8 }
 0x477   : > { %2359 = vrot.lane.b32.xlu0 %v5020_v41, %s3602_s27  ;;  %2003 = vrot.lane.b32.xlu1 %v5054_v45, %s3599_s29  ;;  %v5218_v60 = vpop.permute.xlu1 %2618  ;;  %v5220_v47 = vpop.permute.xlu0 %2526 }
 0x478   : > { %6021 = vst [vmem:[#allocation94_spill] sm:$0xff] %v5218_v60  ;;  %6022 = vst [vmem:[#allocation95_spill] sm:$0xff] %v5220_v47 }
 0x47b   : > { %2479 = vrot.lane.b32.xlu0 %v5020_v41, %s3603_s0  ;;  %2123 = vrot.lane.b32.xlu1 %v5054_v45, %s3600_s15  ;;  %v5230_v18 = vpop.permute.xlu0 %2679 }
 0x47c   : > { %6023 = vst [vmem:[#allocation96_spill] sm:$0xff] %v5230_v18 }
 0x47f   : > { %1855 = vrot.lane.b32.xlu0 %v1836_v6, %s3590_s21  ;;  %2243 = vrot.lane.b32.xlu1 %v5054_v45, %s3601_s30 }
 0x483   : > { %2641 = vrot.lane.b32.xlu0 %v2625_v26, %s3590_s21  ;;  %1899 = vrot.lane.b32.xlu1 %v5054_v45, %s3598_s28  ;;  %v2627_v26 = vmul.f32 %v2603_v33, %v5063_v48  ;;  %v5232_v48 = vpop.permute.xlu1 %2622  ;;  %v2629_v33 = vmul.f32 %v2611_v2, %v5087_v14 }
 0x484   : > { %6024 = vst [vmem:[#allocation97_spill] sm:$0xff] %v5232_v48 }
 0x487   : > { %1857 = vrot.lane.b32.xlu0 %v1837_v10, %s3590_s21  ;;  %2363 = vrot.lane.b32.xlu1 %v5054_v45, %s3602_s27 }
 0x48b   : > { %2001 = vrot.lane.b32.xlu0 %v5047_v36, %s3599_s29  ;;  %1859 = vrot.lane.b32.xlu1 %v1838_v61, %s3590_s21 }
 0x48f   : > { %2645 = vrot.lane.b32.xlu1 %v2627_v26, %s3590_s21  ;;  %2241 = vrot.lane.b32.xlu0 %v5047_v36, %s3601_s30 }
 0x493   : > { %1861 = vrot.lane.b32.xlu1 %v1839_v28, %s3590_s21  ;;  %2361 = vrot.lane.b32.xlu0 %v5047_v36, %s3602_s27 }
 0x497   : > { %2647 = vrot.lane.b32.xlu1 %v2628_v19, %s3590_s21  ;;  %2481 = vrot.lane.b32.xlu0 %v5047_v36, %s3603_s0 }
 0x499   : > { %v1890_v10 = vpop.permute.xlu1 %1889  ;;  %v1994_v31 = vpop.permute.xlu0 %1993 }
 0x49a   : > { %v1946_v40 = vmul.f32 %v4903_v15, %v1890_v10 }
 0x49b   : > { %2649 = vrot.lane.b32.xlu1 %v2629_v33, %s3590_s21  ;;  %2483 = vrot.lane.b32.xlu0 %v5054_v45, %s3603_s0 }
 0x49d   : > { %v2114_v6 = vpop.permute.xlu1 %2113  ;;  %v5243_v61 = vpop.permute.xlu0 %2233 }
 0x49f   : > { %1963 = vrot.lane.b32.xlu1 %v1946_v40, %s3590_s21  ;;  %1863 = vrot.lane.b32.xlu0 %v1840_v59, %s3590_s21 }
 0x4a1   : > { %v5249_v14 = vpop.permute.xlu1 %2245  ;;  %v5251_v35 = vpop.permute.xlu0 %2353 }
 0x4a5   : > { %v1902_v2 = vpop.permute.xlu1 %1901  ;;  %v5253_v26 = vpop.permute.xlu0 %2005 }
 0x4a6   : > { %v1952_v28 = vmul.f32 %v4952_v39, %v1902_v2 }
 0x4a8   : > { %1975 = vrot.lane.b32.xlu0 %v1952_v28, %s3590_s21 }
 0x4a9   : > { %v5257_v15 = vpop.permute.xlu1 %1995  ;;  %v5259_v19 = vpop.permute.xlu0 %2125 }
 0x4ad   : > { %v1904_v54 = vpop.permute.xlu1 %1903  ;;  %v5261_v42 = vpop.permute.xlu0 %2365 }
 0x4ae   : > { %v1945_v39 = vmul.f32 %v4946_v21, %v1904_v54 }
 0x4b1   : > { %v5263_v33 = vpop.permute.xlu1 %2115  ;;  %v2486_v10 = vpop.permute.xlu0 %2485 }
 0x4b2   : > { %v2534_v40 = vmul.f32 %v2519_v13, %v2486_v10  ;;  %v2018_v10 = vrot.slane %v5257_v15, 1  ;;  %v2138_v58 = vrot.slane %v5263_v33, 7 }
 0x4b4   : > { %2555 = vrot.lane.b32.xlu0 %v2534_v40, %s3590_s21 }
 0x4b5   : > { %v5266_v59 = vpop.permute.xlu1 %2235  ;;  %v5268_v18 = vpop.permute.xlu0 %2473 }
 0x4b6   : > { %6025 = vst [vmem:[#allocation98_spill] sm:$0xff] %v5268_v18  ;;  %v2017_v18 = vrot.slane %v1994_v31, 1  ;;  %v2137_v31 = vrot.slane %v2114_v6, 7 }
 0x4b8   : > { %1961 = vrot.lane.b32.xlu0 %v1945_v39, %s3590_s21  ;;  %v2031_v0 = vsel %vm978_vm3, %v2017_v18, %v2018_v10 }
 0x4b9   : > { %v5272_v2 = vpop.permute.xlu1 %2355  ;;  %v2008_v28 = vpop.permute.xlu0 %2007 }
 0x4ba   : > { %v2024_v40 = vrot.slane %v2008_v28, 1 }
 0x4bd   : > { %v5274_v60 = vpop.permute.xlu1 %2247  ;;  %v2128_v48 = vpop.permute.xlu0 %2127 }
 0x4c1   : > { %v5276_v8 = vpop.permute.xlu1 %2367  ;;  %v1892_v47 = vpop.permute.xlu0 %1891 }
 0x4c2   : > { %v1947_v13 = vmul.f32 %v4950_v1, %v1892_v47  ;;  %v2032_v1 = vsel %vm978_vm3, %v2024_v40, %v2017_v18  ;;  %v2144_v47 = vrot.slane %v2128_v48, 7  ;;  %v2151_v18 = vsel %vm729_vm2, %v2137_v31, %v2138_v58 }
 0x4c3   : > { %v2258_v48 = vrot.slane %v5266_v59, 1 }
 0x4c4   : > { %1965 = vrot.lane.b32.xlu1 %v1947_v13, %s3590_s21  ;;  %v2065_v13 = vmul.f32 %v4908_v44, %v2032_v1  ;;  %v2152_v6 = vsel %vm729_vm2, %v2144_v47, %v2137_v31  ;;  %v2377_v44 = vrot.slane %v5251_v35, 7 }
 0x4c5   : > { %v2488_v21 = vpop.permute.xlu1 %2487  ;;  %v2476_v54 = vpop.permute.xlu0 %2475 }
 0x4c6   : > { %v2535_v39 = vmul.f32 %v2523_v24, %v2488_v21  ;;  %v2529_v32 = vmul.f32 %v4944_v23, %v2476_v54  ;;  %v2066_v23 = vmul.f32 %v5045_v30, %v2031_v0  ;;  %v2257_v30 = vrot.slane %v5243_v61, 1 }
 0x4c7   : > { %v2186_v54 = vmul.f32 %v5115_v7, %v2151_v18  ;;  %v2023_v7 = vrot.slane %v5253_v26, 1  ;;  %v2264_v18 = vrot.slane %v5274_v60, 1 }
 0x4c8   : > { %2557 = vrot.lane.b32.xlu1 %v2535_v39, %s3590_s21  ;;  %2545 = vrot.lane.b32.xlu0 %v2529_v32, %s3590_s21  ;;  %v2378_v32 = vrot.slane %v5272_v2, 7  ;;  %v2185_v39 = vmul.f32 %v4914_v56, %v2152_v6  ;;  %v2271_v31 = vsel %vm978_vm3, %v2257_v30, %v2258_v48  ;;  %v2143_v56 = vrot.slane %v5259_v19, 7 }
 0x4c9   : > { %v1850_v28 = vpop.permute.xlu1 %1849  ;;  %v5291_v24 = vpop.permute.xlu0 %1851 }
 0x4ca   : > { %v5296_v21 = vadd.f32 %v1850_v28, %v4958_v38  ;;  %v2391_v61 = vsel %vm729_vm2, %v2377_v44, %v2378_v32  ;;  %v2305_v28 = vmul.f32 %v4922_v52, %v2271_v31  ;;  %v2145_v6 = vsel %vm729_vm2, %v2143_v56, %v2144_v47 }
 0x4cb   : > { %v2263_v52 = vrot.slane %v5249_v14, 1  ;;  %v2192_v60 = vmul.f32 %v5137_v37, %v2145_v6  ;;  %v6044_v14 = vld [vmem:[#allocation93_spill] sm:$0xff] }
 0x4cc   : > { %2083 = vrot.lane.b32.xlu1 %v2066_v23, %s3590_s21  ;;  %2081 = vrot.lane.b32.xlu0 %v2065_v13, %s3590_s21  ;;  %v2425_v23 = vmul.f32 %v4928_v43, %v2391_v61  ;;  %v2025_v13 = vsel %vm978_vm3, %v2023_v7, %v2024_v40  ;;  %v2383_v43 = vrot.slane %v5261_v42, 7  ;;  %v6040_v42 = vld [vmem:[#allocation98_spill] sm:$0xff] }
 0x4cd   : > { %v1854_v38 = vpop.permute.xlu1 %1853  ;;  %v5310_v0 = vpop.permute.xlu0 %2117  ;;  %v2072_v40 = vmul.f32 %v5107_v11, %v2025_v13  ;;  %v2265_v47 = vsel %vm978_vm3, %v2263_v52, %v2264_v18 }
 0x4ce   : > { %v5315_v1 = vadd.f32 %v1854_v38, %v5009_v17  ;;  %v2384_v38 = vrot.slane %v5276_v8, 7  ;;  %v2311_v11 = vmul.f32 %v5154_v4, %v2265_v47 }
 0x4d0   : > { %2201 = vrot.lane.b32.xlu1 %v2185_v39, %s3590_s21  ;;  %2203 = vrot.lane.b32.xlu0 %v2186_v54, %s3590_s21  ;;  %v2385_v8 = vsel %vm729_vm2, %v2383_v43, %v2384_v38  ;;  %v2392_v4 = vsel %vm729_vm2, %v2384_v38, %v2377_v44  ;;  %v2139_v38 = vrot.slane %v5310_v0, 7 }
 0x4d1   : > { %v5329_v17 = vpop.permute.xlu1 %1997  ;;  %v5331_v35 = vpop.permute.xlu0 %2237  ;;  %v2431_v37 = vmul.f32 %v5180_v62, %v2385_v8 }
 0x4d2   : > { %v2019_v47 = vrot.slane %v5329_v17, 1  ;;  %v2259_v0 = vrot.slane %v5331_v35, 1 }
 0x4d4   : > { %2321 = vrot.lane.b32.xlu1 %v2305_v28, %s3590_s21  ;;  %2441 = vrot.lane.b32.xlu0 %v2425_v23, %s3590_s21  ;;  %v2272_v28 = vsel %vm978_vm3, %v2264_v18, %v2257_v30  ;;  %v2432_v18 = vmul.f32 %v5200_v57, %v2392_v4  ;;  %v2030_v57 = vsel %vm978_vm3, %v2018_v10, %v2019_v47 }
 0x4d5   : > { %v2478_v54 = vpop.permute.xlu1 %2477  ;;  %v1894_v39 = vpop.permute.xlu0 %1893  ;;  %v2312_v6 = vmul.f32 %v5164_v16, %v2272_v28 }
 0x4d8   : > { %2215 = vrot.lane.b32.xlu1 %v2192_v60, %s3590_s21  ;;  %2095 = vrot.lane.b32.xlu0 %v2072_v40, %s3590_s21  ;;  %v1948_v40 = vmul.f32 %v4912_v29, %v1894_v39  ;;  %v2530_v60 = vmul.f32 %v4948_v5, %v2478_v54  ;;  %v2067_v54 = vmul.f32 %v5071_v46, %v2030_v57 }
 0x4d9   : > { %v5361_v31 = vpop.permute.xlu1 %1999  ;;  %v5363_v61 = vpop.permute.xlu0 %2357  ;;  %v2270_v46 = vsel %vm978_vm3, %v2258_v48, %v2259_v0 }
 0x4da   : > { %v2379_v15 = vrot.slane %v5363_v61, 7  ;;  %v2306_v59 = vmul.f32 %v5144_v22, %v2270_v46 }
 0x4dc   : > { %2453 = vrot.lane.b32.xlu1 %v2431_v37, %s3590_s21  ;;  %2333 = vrot.lane.b32.xlu0 %v2311_v11, %s3590_s21  ;;  %v2390_v33 = vsel %vm729_vm2, %v2378_v32, %v2379_v15 }
 0x4dd   : > { %v5371_v23 = vpop.permute.xlu1 %2121  ;;  %v5373_v13 = vpop.permute.xlu0 %2119  ;;  %v2426_v48 = vmul.f32 %v4930_v49, %v2390_v33 }
 0x4de   : > { %v2140_v35 = vrot.slane %v5373_v13, 7 }
 0x4e0   : > { %2335 = vrot.lane.b32.xlu0 %v2312_v6, %s3590_s21  ;;  %1967 = vrot.lane.b32.xlu1 %v1948_v40, %s3590_s21  ;;  %v2149_v32 = vsel %vm729_vm2, %v2139_v38, %v2140_v35 }
 0x4e1   : > { %v1898_v62 = vpop.permute.xlu1 %1897  ;;  %v5381_v30 = vpop.permute.xlu0 %2239 }
 0x4e2   : > { %v2260_v61 = vrot.slane %v5381_v30, 1  ;;  %v1950_v4 = vmul.f32 %v4924_v53, %v1898_v62 }
 0x4e4   : > { %2455 = vrot.lane.b32.xlu0 %v2432_v18, %s3590_s21  ;;  %2547 = vrot.lane.b32.xlu1 %v2530_v60, %s3590_s21  ;;  %v2269_v22 = vsel %vm978_vm3, %v2259_v0, %v2260_v61  ;;  %v6026_v0 = vld [vmem:[#allocation76_spill] sm:$0xff] }
 0x4e5   : > { %v5388_v29 = vpop.permute.xlu1 %2643  ;;  %v1896_v16 = vpop.permute.xlu0 %1895  ;;  %v2307_v30 = vmul.f32 %v5156_v34, %v2269_v22  ;;  %v6032_v22 = vld [vmem:[#allocation85_spill] sm:$0xff] }
 0x4e6   : > { %v1949_v44 = vmul.f32 %v4918_v27, %v1896_v16  ;;  %v2150_v27 = vsel %vm729_vm2, %v2138_v58, %v2139_v38  ;;  %v2020_v58 = vrot.slane %v5361_v31, 1 }
 0x4e7   : > { %v2187_v8 = vmul.f32 %v5127_v12, %v2150_v27 }
 0x4e8   : > { %1969 = vrot.lane.b32.xlu0 %v1949_v44, %s3590_s21  ;;  %v2029_v2 = vsel %vm978_vm3, %v2019_v47, %v2020_v58  ;;  %v2141_v44 = vrot.slane %v5371_v23, 7 }
 0x4e9   : > { %v5397_v5 = vpop.permute.xlu1 %2003  ;;  %v5399_v17 = vpop.permute.xlu0 %2359  ;;  %v2068_v49 = vmul.f32 %v4920_v3, %v2029_v2  ;;  %v6030_v2 = vld [vmem:[#allocation79_spill] sm:$0xff] }
 0x4ea   : > { %v2380_v13 = vrot.slane %v5399_v17, 7  ;;  %v2022_v27 = vrot.slane %v5397_v5, 1 }
 0x4ec   : > { %2085 = vrot.lane.b32.xlu0 %v2067_v54, %s3590_s21  ;;  %v2148_v54 = vsel %vm729_vm2, %v2140_v35, %v2141_v44  ;;  %v6029_v35 = vld [vmem:[#allocation92_spill] sm:$0xff] }
 0x4ed   : > { %v5409_v10 = vpop.permute.xlu1 %2123  ;;  %v2480_v39 = vpop.permute.xlu0 %2479 }
 0x4ee   : > { %v2531_v11 = vmul.f32 %v5175_v51, %v2480_v39  ;;  %v6027_v39 = vld [vmem:[#allocation91_spill] sm:$0xff] }
 0x4f0   : > { %2205 = vrot.lane.b32.xlu0 %v2187_v8, %s3590_s21  ;;  %2549 = vrot.lane.b32.xlu1 %v2531_v11, %s3590_s21 }
 0x4f1   : > { %v5425_v12 = vpop.permute.xlu1 %2243  ;;  %v1856_v51 = vpop.permute.xlu0 %1855 }
 0x4f2   : > { %v5430_v31 = vadd.f32 %v1856_v51, %v5020_v41  ;;  %v2188_v41 = vmul.f32 %v4926_v55, %v2149_v32  ;;  %v2389_v55 = vsel %vm729_vm2, %v2379_v15, %v2380_v13  ;;  %v2189_v15 = vmul.f32 %v6026_v0, %v2148_v54  ;;  %v6038_v54 = vld [vmem:[#allocation84_spill] sm:$0xff] }
 0x4f3   : > { %v2427_v47 = vmul.f32 %v5011_v20, %v2389_v55  ;;  %v2262_v5 = vrot.slane %v5425_v12, 1  ;;  %v1874_v32 = vadd.f32 %v5291_v24, %v6030_v2  ;;  %v2714_v2 = vld [vmem:[%s3776_s26 + $0x8] sm:$0xff] }
 0x4f4   : > { %2323 = vrot.lane.b32.xlu0 %v2306_v59, %s3590_s21  ;;  %2443 = vrot.lane.b32.xlu1 %v2426_v48, %s3590_s21  ;;  %v2142_v59 = vrot.slane %v5409_v10, 7 }
 0x4f5   : > { %v1900_v37 = vpop.permute.xlu1 %1899  ;;  %v5439_v28 = vpop.permute.xlu0 %2641 }
 0x4f6   : > { %v1951_v62 = vmul.f32 %v4956_v9, %v1900_v37 }
 0x4f8   : > { %2207 = vrot.lane.b32.xlu0 %v2188_v41, %s3590_s21  ;;  %2087 = vrot.lane.b32.xlu1 %v2068_v49, %s3590_s21  ;;  %v6031_v49 = vld [vmem:[#allocation77_spill] sm:$0xff] }
 0x4f9   : > { %v5448_v6 = vpop.permute.xlu1 %2363  ;;  %v1858_v40 = vpop.permute.xlu0 %1857 }
 0x4fa   : > { %v5453_v3 = vadd.f32 %v1858_v40, %v5047_v36  ;;  %v2382_v55 = vrot.slane %v5448_v6, 7  ;;  %v2147_v6 = vsel %vm729_vm2, %v2141_v44, %v2142_v59 }
 0x4fc   : > { %1971 = vrot.lane.b32.xlu0 %v1950_v4, %s3590_s21  ;;  %2325 = vrot.lane.b32.xlu1 %v2307_v30, %s3590_s21  ;;  %v6033_v4 = vld [vmem:[#allocation78_spill] sm:$0xff] }
 0x4fd   : > { %v1860_v18 = vpop.permute.xlu1 %1859  ;;  %v2002_v60 = vpop.permute.xlu0 %2001 }
 0x4fe   : > { %v5461_v16 = vadd.f32 %v1860_v18, %v5054_v45  ;;  %v2021_v53 = vrot.slane %v2002_v60, 1  ;;  %v6034_v18 = vld [vmem:[#allocation87_spill] sm:$0xff] }
 0x500   : > { %2445 = vrot.lane.b32.xlu1 %v2427_v47, %s3590_s21  ;;  %v2028_v38 = vsel %vm978_vm3, %v2020_v58, %v2021_v53  ;;  %v6028_v58 = vld [vmem:[#allocation80_spill] sm:$0xff]  ;;  %v6035_v47 = vld [vmem:[#allocation86_spill] sm:$0xff] }
 0x501   : > { %v5464_v34 = vpop.permute.xlu1 %2645  ;;  %v2242_v36 = vpop.permute.xlu0 %2241  ;;  %v2069_v45 = vmul.f32 %v5097_v50, %v2028_v38  ;;  %v6037_v38 = vld [vmem:[#allocation89_spill] sm:$0xff] }
 0x502   : > { %v2261_v50 = vrot.slane %v2242_v36, 1 }
 0x504   : > { %1973 = vrot.lane.b32.xlu1 %v1951_v62, %s3590_s21  ;;  %v2267_v26 = vsel %vm978_vm3, %v2261_v50, %v2262_v5  ;;  %v2027_v62 = vsel %vm978_vm3, %v2021_v53, %v2022_v27  ;;  %v2386_v53 = vsel %vm729_vm2, %v2382_v55, %v2383_v43  ;;  %v6041_v43 = vld [vmem:[#allocation95_spill] sm:$0xff] }
 0x505   : > { %v1862_v57 = vpop.permute.xlu1 %1861  ;;  %v2362_v20 = vpop.permute.xlu0 %2361  ;;  %v2309_v10 = vmul.f32 %v6032_v22, %v2267_v26  ;;  %v2536_v44 = vmul.f32 %v6041_v43, %v6040_v42 }
 0x506   : > { %v5473_v17 = vadd.f32 %v1862_v57, %v4954_v25  ;;  %v2026_v25 = vsel %vm978_vm3, %v2022_v27, %v2023_v7  ;;  %v2268_v7 = vsel %vm978_vm3, %v2260_v61, %v2261_v50  ;;  %v2381_v48 = vrot.slane %v2362_v20, 7 }
 0x507   : > { %v2071_v33 = vmul.f32 %v6028_v58, %v2026_v25  ;;  %v2308_v41 = vmul.f32 %v6031_v49, %v2268_v7  ;;  %v2146_v61 = vsel %vm729_vm2, %v2142_v59, %v2143_v56  ;;  %v6036_v56 = vld [vmem:[#allocation75_spill] sm:$0xff]  ;;  %v2190_v27 = vmul.f32 %v6038_v54, %v2147_v6  ;;  %v6043_v25 = vld [vmem:[#allocation81_spill] sm:$0xff] }
 0x508   : > { %2089 = vrot.lane.b32.xlu1 %v2069_v45, %s3590_s21  ;;  %v2388_v24 = vsel %vm729_vm2, %v2380_v13, %v2381_v48  ;;  %v2191_v60 = vmul.f32 %v6034_v18, %v2146_v61  ;;  %v2387_v19 = vsel %vm729_vm2, %v2381_v48, %v2382_v55  ;;  %v2070_v13 = vmul.f32 %v6036_v56, %v2027_v62  ;;  %v2713_v48 = vld [vmem:[%s3776_s26] sm:$0xff] }
 0x509   : > { %v5479_v9 = vpop.permute.xlu1 %2647  ;;  %v2482_v23 = vpop.permute.xlu0 %2481  ;;  %v2428_v36 = vmul.f32 %v6035_v47, %v2388_v24  ;;  %v2429_v57 = vmul.f32 %v6037_v38, %v2387_v19  ;;  %v2630_v50 = vmul.f32 %v6044_v14, %v6043_v25  ;;  %v3606_v49 = vmov 0.0  }
 0x50a   : > { %v2532_v8 = vmul.f32 %v6027_v39, %v2482_v23  ;;  %v6039_v23 = vld [vmem:[#allocation90_spill] sm:$0xff]  ;;  %v6042_v39 = vld [vmem:[#allocation88_spill] sm:$0xff]  ;;  %3286 = vmatprep.mubr.msk.f32.mxu1 %vm3605_vm4, %v3606_v49 }
 0x50b   : > { %v2430_v0 = vmul.f32 %v6039_v23, %v2386_v53 }
 0x50c   : > { %2209 = vrot.lane.b32.xlu1 %v2189_v15, %s3590_s21  ;;  %2551 = vrot.lane.b32.xlu0 %v2532_v8, %s3590_s21  ;;  %v2266_v15 = vsel %vm978_vm3, %v2262_v5, %v2263_v52  ;;  %v6046_v52 = vld [vmem:[#allocation97_spill] sm:$0xff] }
 0x50d   : > { %v5490_v11 = vpop.permute.xlu1 %2649  ;;  %v2484_v46 = vpop.permute.xlu0 %2483  ;;  %v2310_v8 = vmul.f32 %v6042_v39, %v2266_v15 }
 0x50e   : > { %v2533_v51 = vmul.f32 %v6029_v35, %v2484_v46  ;;  %v6045_v46 = vld [vmem:[#allocation83_spill] sm:$0xff]  ;;  %v6048_v35 = vld [vmem:[#allocation94_spill] sm:$0xff] }
 0x50f   : > { %v2632_v5 = vmul.f32 %v6046_v52, %v6045_v46 }
 0x510   : > { %2093 = vrot.lane.b32.xlu1 %v2071_v33, %s3590_s21  ;;  %2553 = vrot.lane.b32.xlu0 %v2533_v51, %s3590_s21  ;;  %v6047_v33 = vld [vmem:[#allocation82_spill] sm:$0xff] }
 0x511   : > { %v1964_v12 = vpop.permute.xlu1 %1963  ;;  %v1864_v37 = vpop.permute.xlu0 %1863  ;;  %v2631_v51 = vmul.f32 %v6048_v35, %v6047_v33 }
 0x512   : > { %v5505_v40 = vadd.f32 %v1964_v12, %v1874_v32  ;;  %v1880_v30 = vadd.f32 %v1864_v37, %v6033_v4  ;;  %v3604_v12 = vmov 0.0|0.0   ;;  %v3295_v37 = vpack.c.bf16 %v2714_v2, %v2713_v48 }
 0x513   : > { %3294 = vmatprep.subr.bf16.mxu1 %v3604_v12 }
 0x514   : > { %2329 = vrot.lane.b32.xlu1 %v2309_v10, %s3590_s21  ;;  %2327 = vrot.lane.b32.xlu0 %v2308_v41, %s3590_s21 }
 0x515   : > { %3296 = vmatpush3.bf16.msra.mxu1 %v3295_v37 }
 0x516   : > { %3289 = vmatprep.subr.mxu1 %v3606_v49 }
 0x518   : > { %2213 = vrot.lane.b32.xlu1 %v2191_v60, %s3590_s21  ;;  %2447 = vrot.lane.b32.xlu0 %v2428_v36, %s3590_s21 }
 0x51a   : > { %v1976_v20 = vpop.permute.xlu0 %1975 }
 0x51b   : > { %v1992_v45 = vadd.f32 %v1976_v20, %v1880_v30 }
 0x51c   : > { %2449 = vrot.lane.b32.xlu1 %v2429_v57, %s3590_s21  ;;  %2091 = vrot.lane.b32.xlu0 %v2070_v13, %s3590_s21 }
 0x520   : > { %2451 = vrot.lane.b32.xlu1 %v2430_v0, %s3590_s21  ;;  %2211 = vrot.lane.b32.xlu0 %v2190_v27, %s3590_s21 }
 0x524   : > { %2559 = vrot.lane.b32.xlu1 %v2536_v44, %s3590_s21  ;;  %2331 = vrot.lane.b32.xlu0 %v2310_v8, %s3590_s21 }
 0x526   : > { %v5552_v58 = vpop.permute.xlu0 %2555 }
 0x528   : > { %2655 = vrot.lane.b32.xlu1 %v2632_v5, %s3590_s21  ;;  %2651 = vrot.lane.b32.xlu0 %v2630_v50, %s3590_s21 }
 0x52a   : > { %v1962_v59 = vpop.permute.xlu0 %1961 }
 0x52b   : > { %v1985_v26 = vadd.f32 %v1962_v59, %v5296_v21 }
 0x52c   : > { %2653 = vrot.lane.b32.xlu0 %v2631_v51, %s3590_s21 }
 0x536   : > { %v1966_v7 = vpop.permute.xlu1 %1965 }
 0x537   : > { %v1987_v32 = vadd.f32 %v1966_v7, %v5315_v1 }
 0x53a   : > { %v5565_v41 = vpop.permute.xlu1 %2557  ;;  %v2546_v22 = vpop.permute.xlu0 %2545 }
 0x53e   : > { %v2084_v21 = vpop.permute.xlu1 %2083  ;;  %v2082_v10 = vpop.permute.xlu0 %2081 }
 0x53f   : > { %v2105_v4 = vadd.f32 %v2082_v10, %v1985_v26  ;;  %v2106_v52 = vadd.f32 %v2084_v21, %v5505_v40 }
 0x542   : > { %v2202_v30 = vpop.permute.xlu1 %2201  ;;  %v2204_v61 = vpop.permute.xlu0 %2203 }
 0x543   : > { %v2225_v1 = vadd.f32 %v2202_v30, %v2105_v4  ;;  %v2226_v5 = vadd.f32 %v2204_v61, %v2106_v52 }
 0x546   : > { %v2322_v24 = vpop.permute.xlu1 %2321  ;;  %v2442_v55 = vpop.permute.xlu0 %2441 }
 0x547   : > { %v2345_v18 = vadd.f32 %v2322_v24, %v2225_v1 }
 0x549   : > { %v2465_v60 = vadd.f32 %v2442_v55, %v2345_v18 }
 0x54a   : > { %v2096_v47 = vpop.permute.xlu0 %2095  ;;  %v2216_v19 = vpop.permute.xlu1 %2215 }
 0x54b   : > { %v2569_v36 = vadd.f32 %v2546_v22, %v2465_v60  ;;  %v2112_v62 = vadd.f32 %v2096_v47, %v1992_v45 }
 0x54d   : > { %v5568_v56 = vadd.f32 %v2216_v19, %v2112_v62 }
 0x54e   : > { %v5570_v13 = vpop.permute.xlu0 %2333  ;;  %v5572_v38 = vpop.permute.xlu1 %2453 }
 0x552   : > { %v5574_v57 = vpop.permute.xlu0 %2335  ;;  %v1968_v6 = vpop.permute.xlu1 %1967 }
 0x553   : > { %v1988_v33 = vadd.f32 %v1968_v6, %v5430_v31 }
 0x556   : > { %v5576_v20 = vpop.permute.xlu0 %2455  ;;  %v2548_v54 = vpop.permute.xlu1 %2547 }
 0x55a   : > { %v1970_v53 = vpop.permute.xlu0 %1969 }
 0x55b   : > { %v1989_v37 = vadd.f32 %v1970_v53, %v5453_v3 }
 0x55e   : > { %v2086_v27 = vpop.permute.xlu0 %2085 }
 0x55f   : > { %v2107_v59 = vadd.f32 %v2086_v27, %v1987_v32  ;;  %v2665_v27 = vadd.f32 %v5439_v28, %v2569_v36 }
 0x562   : > { %v2550_v23 = vpop.permute.xlu1 %2549  ;;  %v2206_v15 = vpop.permute.xlu0 %2205 }
 0x563   : > { %v2227_v48 = vadd.f32 %v2206_v15, %v2107_v59 }
 0x566   : > { %v2444_v0 = vpop.permute.xlu1 %2443  ;;  %v2324_v45 = vpop.permute.xlu0 %2323 }
 0x567   : > { %v2346_v26 = vadd.f32 %v2324_v45, %v2226_v5 }
 0x569   : > { %v2466_v22 = vadd.f32 %v2444_v0, %v2346_v26 }
 0x56a   : > { %v2088_v42 = vpop.permute.xlu1 %2087  ;;  %v2208_v39 = vpop.permute.xlu0 %2207 }
 0x56b   : > { %v2108_v7 = vadd.f32 %v2088_v42, %v1988_v33  ;;  %v2570_v61 = vadd.f32 %v2548_v54, %v2466_v22 }
 0x56d   : > { %v2228_v10 = vadd.f32 %v2208_v39, %v2108_v7  ;;  %v2666_v19 = vadd.f32 %v5388_v29, %v2570_v61 }
 0x56e   : > { %v2326_v43 = vpop.permute.xlu1 %2325  ;;  %v1972_v25 = vpop.permute.xlu0 %1971 }
 0x56f   : > { %v2347_v4 = vadd.f32 %v2326_v43, %v2227_v48  ;;  %v1990_v0 = vadd.f32 %v1972_v25, %v5461_v16  ;;  %v6049_v43 = vld [vmem:[#allocation96_spill] sm:$0xff] }
 0x570   : > { %v5591_v29 = vadd.f32 %v6049_v43, %v2665_v27 }
 0x572   : > { %v2446_v44 = vpop.permute.xlu1 %2445  ;;  %v2691_v52 = vsel %vm2690_vm5, %v5591_v29, 0.0 }
 0x573   : > { %v2467_v30 = vadd.f32 %v2446_v44, %v2347_v4 }
 0x575   : > { %v2571_v18 = vadd.f32 %v2550_v23, %v2467_v30 }
 0x576   : > { %v1974_v8 = vpop.permute.xlu1 %1973 }
 0x577   : > { %v1991_v32 = vadd.f32 %v1974_v8, %v5473_v17  ;;  %v2667_v15 = vadd.f32 %v5464_v34, %v2571_v18  ;;  %v5587_v17 = vadd.f32 %v6049_v43, %v2666_v19  ;;  %v2352_v8 = vadd.f32 %v5574_v57, %v5568_v56 }
 0x579   : > { %v5594_v28 = vadd.f32 %v6049_v43, %v2667_v15 }
 0x57a   : > { %v2090_v14 = vpop.permute.xlu1 %2089 }
 0x57b   : > { %v2109_v1 = vadd.f32 %v2090_v14, %v1989_v37 }
 0x57e   : > { %v2210_v50 = vpop.permute.xlu1 %2209  ;;  %v2552_v46 = vpop.permute.xlu0 %2551 }
 0x57f   : > { %v2229_v31 = vadd.f32 %v2210_v50, %v2109_v1 }
 0x582   : > { %v2094_v35 = vpop.permute.xlu1 %2093  ;;  %v2554_v51 = vpop.permute.xlu0 %2553 }
 0x583   : > { %v2111_v3 = vadd.f32 %v2094_v35, %v1991_v32 }
 0x586   : > { %v2330_v2 = vpop.permute.xlu1 %2329  ;;  %v2328_v12 = vpop.permute.xlu0 %2327 }
 0x587   : > { %v2348_v24 = vadd.f32 %v2328_v12, %v2228_v10  ;;  %v2349_v60 = vadd.f32 %v2330_v2, %v2229_v31 }
 0x58a   : > { %v2214_v40 = vpop.permute.xlu1 %2213  ;;  %v2448_v21 = vpop.permute.xlu0 %2447 }
 0x58b   : > { %v2468_v55 = vadd.f32 %v2448_v21, %v2348_v24  ;;  %v2231_v54 = vadd.f32 %v2214_v40, %v2111_v3 }
 0x58d   : > { %v2572_v6 = vadd.f32 %v2552_v46, %v2468_v55  ;;  %v2351_v16 = vadd.f32 %v5570_v13, %v2231_v54  ;;  %v2472_v13 = vadd.f32 %v5576_v20, %v2352_v8 }
 0x58e   : > { %v2450_v47 = vpop.permute.xlu1 %2449  ;;  %v2092_v62 = vpop.permute.xlu0 %2091 }
 0x58f   : > { %v2469_v53 = vadd.f32 %v2450_v47, %v2349_v60  ;;  %v2668_v44 = vadd.f32 %v5479_v9, %v2572_v6  ;;  %v2110_v39 = vadd.f32 %v2092_v62, %v1990_v0  ;;  %v2692_v9 = vsel %vm2690_vm5, %v5587_v17, 0.0  ;;  %v2792_v6 = vld [vmem:[%s3786_s22] sm:$0xf] }
 0x590   : > { %v2471_v57 = vadd.f32 %v5572_v38, %v2351_v16  ;;  %v2693_v33 = vadd.f32 %v2692_v9, %v2691_v52  ;;  %v2888_v16 = vsub.s32 0, %v3959_v63 }
 0x591   : > { %v2573_v42 = vadd.f32 %v2554_v51, %v2469_v53  ;;  %v5603_v50 = vadd.f32 %v6049_v43, %v2668_v44  ;;  %v2715_v53 = vld [vmem:[%s569_s20] sm:$0x1] }
 0x592   : > { %v2452_v45 = vpop.permute.xlu1 %2451  ;;  %v2212_v23 = vpop.permute.xlu0 %2211  ;;  %v2575_v37 = vadd.f32 %v5565_v41, %v2471_v57 }
 0x593   : > { %v2669_v34 = vadd.f32 %v5490_v11, %v2573_v42  ;;  %v2230_v36 = vadd.f32 %v2212_v23, %v2110_v39  ;;  %v2694_v11 = vsel %vm2690_vm5, %v5594_v28, 0.0  ;;  %v2696_v59 = vsel %vm2690_vm5, %v5603_v50, 0.0  ;;  %v2793_v42 = vld [vmem:[%s584_s18] sm:$0x1] }
 0x594   : > { %v2695_v48 = vadd.f32 %v2694_v11, %v2693_v33  ;;  %v2881_v33 = vld [vmem:[#allocation2 + $0x18] sm:$0xff] }
 0x595   : > { %v5611_v5 = vadd.f32 %v6049_v43, %v2669_v34 }
 0x596   : > { %v2560_v25 = vpop.permute.xlu1 %2559  ;;  %v2332_v14 = vpop.permute.xlu0 %2331  ;;  %v2697_v22 = vadd.f32 %v2696_v59, %v2695_v48  ;;  %v2882_v48 = vld [vmem:[#allocation2 + $0x20] sm:$0xff] }
 0x597   : > { %v2350_v46 = vadd.f32 %v2332_v14, %v2230_v36  ;;  %v2576_v26 = vadd.f32 %v2560_v25, %v2472_v13  ;;  %v2698_v2 = vsel %vm2690_vm5, %v5611_v5, 0.0  ;;  %v2878_v13 = vld [vmem:[#allocation2] sm:$0xff] }
 0x598   : > { %v2699_v30 = vadd.f32 %v2698_v2, %v2697_v22  ;;  %v2885_v22 = vld [vmem:[#allocation2 + $0x38] sm:$0xff] }
 0x599   : > { %v2470_v56 = vadd.f32 %v2452_v45, %v2350_v46 }
 0x59a   : > { %v2656_v35 = vpop.permute.xlu1 %2655  ;;  %v2652_v51 = vpop.permute.xlu0 %2651 }
 0x59b   : > { %v2574_v7 = vadd.f32 %v5552_v58, %v2470_v56  ;;  %v2672_v20 = vadd.f32 %v2656_v35, %v2576_v26  ;;  %v2880_v35 = vld [vmem:[#allocation2 + $0x10] sm:$0xff] }
 0x59d   : > { %v2670_v12 = vadd.f32 %v2652_v51, %v2574_v7  ;;  %v2689_v1 = vadd.f32 %v6049_v43, %v2672_v20  ;;  %v2883_v7 = vld [vmem:[#allocation2 + $0x28] sm:$0xff] }
 0x59e   : > { %v2654_v10 = vpop.permute.xlu0 %2653 }
 0x59f   : > { %v2687_v38 = vadd.f32 %v6049_v43, %v2670_v12  ;;  %v2671_v4 = vadd.f32 %v2654_v10, %v2575_v37  ;;  %v2704_v31 = vsel %vm2690_vm5, %v2689_v1, 0.0  ;;  %v2884_v10 = vld [vmem:[#allocation2 + $0x30] sm:$0xff] }
 0x5a1   : > { %v2700_v24 = vsel %vm2690_vm5, %v2687_v38, 0.0  ;;  %v2688_v58 = vadd.f32 %v6049_v43, %v2671_v4 }
 0x5a2   : > { %v2701_v40 = vadd.f32 %v2700_v24, %v2699_v30 }
 0x5a3   : > { %v2702_v21 = vsel %vm2690_vm5, %v2688_v58, 0.0 }
 0x5a4   : > { %v2703_v61 = vadd.f32 %v2702_v21, %v2701_v40 }
 0x5a6   : > { %v2705_v41 = vadd.f32 %v2704_v31, %v2703_v61 }
 0x5a8   : > { %v2706_v55 = vrot.slane %v2705_v41, 4 }
 0x5aa   : > { %v2707_v18 = vadd.f32 %v2706_v55, %v2705_v41 }
 0x5ac   : > { %v2708_v32 = vrot.slane %v2707_v18, 2 }
 0x5ae   : > { %v2709_v60 = vadd.f32 %v2708_v32, %v2707_v18 }
 0x5b0   : > { %v2710_v47 = vrot.slane %v2709_v60, 1 }
 0x5b2   : > { %v2711_v62 = vadd.f32 %v2710_v47, %v2709_v60 }
 0x5b4   : > { %v2712_v19 = vmul.f32 0.015625, %v2711_v62 }
 0x5b6   : > { %2717 = vrot.lane.b32.xlu0 %v2712_v19, %s3590_s21 }
 0x628   : > { %v2718_v3 = vpop.permute.xlu0 %2717 }
 0x629   : > { %3287 = vmatmul.mubr.msk.f32.vlgmr.msra.gmra.mrb[4].mxu1 %vm633_vm1, %v2718_v3 }
 0x62a   : > { %3291 = vmatprep.mubr.msk.f32.mxu1 %vm3605_vm4, %v3606_v49  ;;  %3290 = vmatpush3.msk.msra.mxu1 %vm2798_vm6, %v2792_v6 }
 0x6fc   : > { %v2787_v27 = vpop.f32.mrb[4].mxu1 }
 0x6fd   : > { %v2788_v0 = vadd.f32 %v2787_v27, %v2715_v53  ;;  %v3288_v15 = vpop.f32.mrb[5].mxu1 }
 0x6ff   : > { %v2791_v54 = vmax.f32 %v2788_v0, 0.0 }
 0x701   : > { %3292 = vmatmul.mubr.msk.f32.vlgmr.msra.gmra.mrb[6].mxu1 %vm2794_vm7, %v2791_v54 }
 0x7d4   : > { %v2868_v49 = vpop.f32.mrb[6].mxu1 }
 0x7d5   : > { %v2869_v45 = vadd.f32 %v2868_v49, %v2793_v42  ;;  %v3293_v23 = vpop.f32.mrb[7].mxu1 }
 0x7d7   : > { %v3265_v43 = vmul.f32 -1.442695, %v2869_v45 }
 0x7d9   : > { %3474 = vpow2.f32 %v3265_v43 }
 0x7e3   : > { %v3475_v44 = vpop.eup %3474 }
 0x7e4   : > { %v2875_v39 = vadd.f32 1.0, %v3475_v44 }
 0x7e6   : > { %3476 = vrcp.f32 %v2875_v39 }
 0x7f0   : > { %v3477_v34 = vpop.eup %3476 }
 0x7f1   : > { %v2889_v36 = vrot.slane %v3477_v34, %v2888_v16 }
 0x7f3   : > { %2891 = vrot.lane.b32.xlu1 %v2889_v36, %s3590_s21 }
 0x865   : > { %v2892_v8 = vpop.permute.xlu1 %2891 }
 0x866   : > { %v2895_v25 = vmul.f32 %v2892_v8, %v5587_v17  ;;  %v2894_v14 = vmul.f32 %v2892_v8, %v5591_v29  ;;  %v2897_v9 = vmul.f32 %v2892_v8, %v5603_v50  ;;  %v2896_v46 = vmul.f32 %v2892_v8, %v5594_v28  ;;  %v2879_v50 = vld [vmem:[#allocation2 + $0x8] sm:$0xff] }
 0x867   : > { %v2899_v63 = vmul.f32 %v2892_v8, %v2687_v38  ;;  %v2898_v52 = vmul.f32 %v2892_v8, %v5611_v5  ;;  %v2901_v17 = vmul.f32 %v2892_v8, %v2689_v1  ;;  %v2900_v29 = vmul.f32 %v2892_v8, %v2688_v58 }
 0x868   : > { %2912 = vrot.lane.b32.xlu1 %v2895_v25, %s3590_s21  ;;  %2910 = vrot.lane.b32.xlu0 %v2894_v14, %s3590_s21 }
 0x86c   : > { %2916 = vrot.lane.b32.xlu1 %v2897_v9, %s3590_s21  ;;  %2914 = vrot.lane.b32.xlu0 %v2896_v46, %s3590_s21 }
 0x870   : > { %2920 = vrot.lane.b32.xlu1 %v2899_v63, %s3590_s21  ;;  %2918 = vrot.lane.b32.xlu0 %v2898_v52, %s3590_s21 }
 0x874   : > { %2924 = vrot.lane.b32.xlu1 %v2901_v17, %s3590_s21  ;;  %2922 = vrot.lane.b32.xlu0 %v2900_v29, %s3590_s21 }
 0x8da   : > { %v2913_v28 = vpop.permute.xlu1 %2912  ;;  %v2911_v11 = vpop.permute.xlu0 %2910 }
 0x8db   : > { %v2935_v56 = vadd.f32 %v2913_v28, %v2879_v50  ;;  %v2934_v57 = vadd.f32 %v2911_v11, %v2878_v13 }
 0x8dd   : > { %2943 = vst.msk [vmem:[#allocation2 + $0x8] sm:$0xff] %vm633_vm1, %v2935_v56  ;;  %2942 = vst.msk [vmem:[#allocation2] sm:$0xff] %vm633_vm1, %v2934_v57 }
 0x8de   : > { %v2917_v5 = vpop.permute.xlu1 %2916  ;;  %v2915_v51 = vpop.permute.xlu0 %2914 }
 0x8df   : > { %v2937_v59 = vadd.f32 %v2917_v5, %v2881_v33  ;;  %v2936_v26 = vadd.f32 %v2915_v51, %v2880_v35 }
 0x8e1   : > { %2945 = vst.msk [vmem:[#allocation2 + $0x18] sm:$0xff] %vm633_vm1, %v2937_v59  ;;  %2944 = vst.msk [vmem:[#allocation2 + $0x10] sm:$0xff] %vm633_vm1, %v2936_v26 }
 0x8e2   : > { %v2921_v20 = vpop.permute.xlu1 %2920  ;;  %v2919_v2 = vpop.permute.xlu0 %2918 }
 0x8e3   : > { %v2939_v12 = vadd.f32 %v2921_v20, %v2883_v7  ;;  %v2938_v37 = vadd.f32 %v2919_v2, %v2882_v48 }
 0x8e5   : > { %2947 = vst.msk [vmem:[#allocation2 + $0x28] sm:$0xff] %vm633_vm1, %v2939_v12  ;;  %2946 = vst.msk [vmem:[#allocation2 + $0x20] sm:$0xff] %vm633_vm1, %v2938_v37 }
 0x8e6   : > { %v2925_v38 = vpop.permute.xlu1 %2924  ;;  %v2923_v4 = vpop.permute.xlu0 %2922 }
 0x8e7   : > { %v2941_v30 = vadd.f32 %v2925_v38, %v2885_v22  ;;  %v2940_v1 = vadd.f32 %v2923_v4, %v2884_v10 }
 0x8e9   : > { %2949 = vst.msk [vmem:[#allocation2 + $0x38] sm:$0xff] %vm633_vm1, %v2941_v30  ;;  %2948 = vst.msk [vmem:[#allocation2 + $0x30] sm:$0xff] %vm633_vm1, %v2940_v1 }
 0x8ea PF: > { %p3266_p4 = scmp.ne.s32.totalorder %s3556_s16, 2 }
 0x8eb   : > { %v2954_v24 = vld [vmem:[%s3748_s24] sm:$0xff] (!%p3266_p4)  ;;  %v2956_v58 = vld [vmem:[%s3748_s24 + $0x10] sm:$0xff] (!%p3266_p4)  ;;  %s3607_s13 = smov (!%p3266_p4), 64   ;;  %v2955_v40 = vld [vmem:[%s3748_s24 + $0x8] sm:$0xff] (!%p3266_p4) }
 0x8ec   : > { %2953 = sbr.rel (%p3266_p4) target bundleno = 2533 (0x9e5), region = 72  ;;  %2970 = vrot.lane.b32.xlu0 (!%p3266_p4), %v2954_v24, %s3607_s13  ;;  %2974 = vrot.lane.b32.xlu1 (!%p3266_p4), %v2956_v58, %s3607_s13  ;;  %v2957_v21 = vld [vmem:[%s3748_s24 + $0x18] sm:$0xff] (!%p3266_p4)  ;;  %v2959_v61 = vld [vmem:[%s3748_s24 + $0x28] sm:$0xff] (!%p3266_p4)  ;;  %v6050_v60 = vld [vmem:[#allocation47_spill] sm:$0xff] (!%p3266_p4) }
 0x8ed   : > { %v2958_v31 = vld [vmem:[%s3748_s24 + $0x20] sm:$0xff] (!%p3266_p4)  ;;  %v2961_v41 = vld [vmem:[%s3748_s24 + $0x38] sm:$0xff] (!%p3266_p4)  ;;  %v2960_v55 = vld [vmem:[%s3748_s24 + $0x30] sm:$0xff] (!%p3266_p4) }
 0x8ee   : > { %v6051_v62 = vld [vmem:[#allocation48_spill] sm:$0xff] (!%p3266_p4)  ;;  %v6052_v53 = vld [vmem:[#allocation45_spill] sm:$0xff] (!%p3266_p4)  ;;  %v6053_v0 = vld [vmem:[#allocation58_spill] sm:$0xff] (!%p3266_p4) }
 0x8ef   : > { %v6054_v49 = vld [vmem:[#allocation21_spill] sm:$0xff] (!%p3266_p4)  ;;  %v6055_v23 = vld [vmem:[#allocation18_spill] sm:$0xff] (!%p3266_p4) }
 0x8f0   : > { %2972 = vrot.lane.b32.xlu0 (!%p3266_p4), %v2955_v40, %s3607_s13  ;;  %2976 = vrot.lane.b32.xlu1 (!%p3266_p4), %v2957_v21, %s3607_s13  ;;  %v6056_v16 = vld [vmem:[#allocation49_spill] sm:$0xff] (!%p3266_p4)  ;;  %v6057_v36 = vld [vmem:[#allocation26_spill] sm:$0xff] (!%p3266_p4) }
 0x8f4   : > { %2980 = vrot.lane.b32.xlu1 %v2959_v61, %s3607_s13  ;;  %2978 = vrot.lane.b32.xlu0 %v2958_v31, %s3607_s13 }
 0x8f8   : > { %2984 = vrot.lane.b32.xlu1 %v2961_v41, %s3607_s13  ;;  %2982 = vrot.lane.b32.xlu0 %v2960_v55, %s3607_s13 }
 0x95e   : > { %v2971_v18 = vpop.permute.xlu0 %2970  ;;  %v2975_v32 = vpop.permute.xlu1 %2974 }
 0x95f   : > { %v2994_v47 = vadd.f32 %v2971_v18, %v6050_v60  ;;  %v2996_v19 = vadd.f32 %v2975_v32, %v6051_v62 }
 0x961   : > { %3010 = vrot.lane.b32.xlu0 %v2994_v47, %s3607_s13 }
 0x962   : > { %v2973_v3 = vpop.permute.xlu0 %2972  ;;  %v2977_v6 = vpop.permute.xlu1 %2976 }
 0x963   : > { %v2995_v27 = vadd.f32 %v2973_v3, %v6052_v53  ;;  %v2997_v15 = vadd.f32 %v2977_v6, %v6053_v0 }
 0x965   : > { %3014 = vrot.lane.b32.xlu0 %v2996_v19, %s3607_s13  ;;  %3012 = vrot.lane.b32.xlu1 %v2995_v27, %s3607_s13 }
 0x966   : > { %v2981_v54 = vpop.permute.xlu1 %2980  ;;  %v2979_v42 = vpop.permute.xlu0 %2978 }
 0x967   : > { %v2998_v45 = vadd.f32 %v2979_v42, %v6054_v49  ;;  %v2999_v43 = vadd.f32 %v2981_v54, %v6055_v23 }
 0x969   : > { %3016 = vrot.lane.b32.xlu1 %v2997_v15, %s3607_s13  ;;  %3018 = vrot.lane.b32.xlu0 %v2998_v45, %s3607_s13 }
 0x96a   : > { %v2985_v44 = vpop.permute.xlu1 %2984  ;;  %v2983_v39 = vpop.permute.xlu0 %2982 }
 0x96b   : > { %v3000_v34 = vadd.f32 %v2983_v39, %v6056_v16  ;;  %v3001_v8 = vadd.f32 %v2985_v44, %v6057_v36 }
 0x96d   : > { %3020 = vrot.lane.b32.xlu1 %v2999_v43, %s3607_s13  ;;  %3022 = vrot.lane.b32.xlu0 %v3000_v34, %s3607_s13 }
 0x971   : > { %3024 = vrot.lane.b32.xlu1 %v3001_v8, %s3607_s13 }
 0x9d3   : > { %v3011_v25 = vpop.permute.xlu0 %3010 }
 0x9d4   : > { %3034 = vst.msk [vmem:[%s3792_s19] sm:$0xff] %vm633_vm1, %v3011_v25 }
 0x9d7   : > { %v3013_v14 = vpop.permute.xlu1 %3012  ;;  %v3015_v9 = vpop.permute.xlu0 %3014 }
 0x9d8   : > { %3035 = vst.msk [vmem:[%s3792_s19 + $0x8] sm:$0xff] %vm633_vm1, %v3013_v14  ;;  %3036 = vst.msk [vmem:[%s3792_s19 + $0x10] sm:$0xff] %vm633_vm1, %v3015_v9 }
 0x9db   : > { %v3017_v46 = vpop.permute.xlu1 %3016  ;;  %v3019_v63 = vpop.permute.xlu0 %3018 }
 0x9dc   : > { %3037 = vst.msk [vmem:[%s3792_s19 + $0x18] sm:$0xff] %vm633_vm1, %v3017_v46  ;;  %3038 = vst.msk [vmem:[%s3792_s19 + $0x20] sm:$0xff] %vm633_vm1, %v3019_v63 }
 0x9df   : > { %v3021_v52 = vpop.permute.xlu1 %3020  ;;  %v3023_v17 = vpop.permute.xlu0 %3022 }
 0x9e0   : > { %3039 = vst.msk [vmem:[%s3792_s19 + $0x28] sm:$0xff] %vm633_vm1, %v3021_v52  ;;  %3040 = vst.msk [vmem:[%s3792_s19 + $0x30] sm:$0xff] %vm633_vm1, %v3023_v17 }
 0x9e3   : > { %v3025_v29 = vpop.permute.xlu1 %3024 }
 0x9e4   : > { %3041 = vst.msk [vmem:[%s3792_s19 + $0x38] sm:$0xff] %vm633_vm1, %v3025_v29 }
 0x9e5 PF: > { %s6058_s16 = sld [smem:[#allocation7_spill]]  ;;  %s3276_s24 = sshll.u32 %s3560_s17, 10 }
 0x9e6   : > { %s6060_s21 = sld [smem:[#allocation101_spill]]  ;;  %s3056_s11 = sshll.u32 %s3792_s19, 4  ;;  %s5720_s11 = int_to_ptr.vmem [resolvable:$true] %s3056_s11 }
 0x9e7   : > { %s3478_s28 = scalar_lea.vmem %s5720_s11, 1024  ;;  %s3608_s17 = smov [#allocation3]  }
 0x9e8   : > { %p3479_p5 = scmp.ne.s32.totalorder %s5720_s11, %s3478_s28  ;;  %s3482_s29 = sshll.u32 %s3608_s17, 4  ;;  %s3483_s29 = int_to_ptr.vmem [resolvable:$false] %s3482_s29 }
 0x9e9   : > { %s3484_s15 = scalar_lea.vmem %s3483_s29, 2048  ;;  %p3485_p8 = scmp.lt.s32.totalorder %s5720_s11, %s3483_s29 }
 0x9ea   : > { %p3480_p6 = pnand %p3479_p5, %p3715_p3  ;;  %p3486_p10 = scmp.lt.s32.totalorder %s3484_s15, %s3478_s28 }
 0x9eb   : > { %s6061_s23 = sand.u32 1, %s6058_s16  }
 0x9ec   : > { %s5717_s25 = scalar_lea.hbm %s6060_s21, %s3276_s24  ;;  %s5724_s12 = scalar_lea.sflag [#allocation4], %s6061_s23 }
 0x9ed   : > { %p3481_p7 = pneg %p3480_p6  ;;  %p3487_p11 = por %p3486_p10, %p3485_p8 }
 0x9ef   : > { %p3488_p12 = pnand %p3487_p11, %p3481_p7 }
 0x9f1   : > { %3491 = shalt.err (!%p3488_p12)
}
 0x9f2   : > { %s3492_s19 = scalar_lea.hbm %s5717_s25, 1024  ;;  %s3496_s0 = scalar_lea.hbm %s6060_s21, 2048 }
 0x9f3   : > { %p3493_p13 = scmp.ne.s32.totalorder %s5717_s25, %s3492_s19  ;;  %p3497_p2 = scmp.lt.u32.totalorder %s5717_s25, %s6060_s21 }
 0x9f4   : > { %p3498_p4 = scmp.lt.u32.totalorder %s3496_s0, %s3492_s19  ;;  %p3500_p6 = scmp.lt.u32.totalorder %s3492_s19, %s5717_s25 }
 0x9f5   : > { %p3494_p0 = pnand %p3493_p13, %p3715_p3 }
 0x9f6   : > { %p3499_p5 = por %p3498_p4, %p3497_p2 }
 0x9f7   : > { %p3495_p1 = pneg %p3494_p0 }
 0x9f8   : > { %p3501_p7 = por %p3500_p6, %p3499_p5 }
 0x9fa   : > { %p3502_p8 = pnand %p3501_p7, %p3495_p1 }
 0x9fc   : > { %3505 = shalt.err (!%p3502_p8)
}
 0x9fd   : > { %s3609_s10 = smov 128   ;;  %s3610_s14 = smov 8  }
 0x9fe   : > { %3301 = dma.vmem_to_hbm [thread:$0]  (%p3715_p3), %s5720_s11, 1024, %s5717_s25, %s5724_s12, %s3609_s10, %s3609_s10, %s3610_s14  }
 0x9ff PF: > { %s6062_s13 = sld [smem:[#allocation11_spill]]  ;;  %s6063_s16 = sld [smem:[#allocation6_spill]] }
 0xa05   : > { %p3307_p10 = scmp.ge.s32.totalorder %s6062_s13, 2  ;;  %s3071_s22 = sand.u32 1, %s6063_s16  }
 0xa06   : > { %s3072_s18 = scalar_lea.sflag [#allocation4], %s3071_s22 }
 0xa07   : > { %p3304_p11 = pnand %p3307_p10, %p3725_p9 }
 0xa09   : > { %3539 = dma.done.wait (!%p3304_p11), %s3072_s18, 1024  }
 0xa0a   : > { %3541 = vsyncadd (!%p3304_p11), %s3072_s18, 4294966272  ;;  %s23_s20 = sadd.s32 1, %s6062_s13   ;;  %s6065_s13 = sld [smem:[#allocation7_spill]] }
 0xa0b   : > { %p20_p12 = scmp.ge.s32.totalorder %s23_s20, 8   ;;  %s6066_s14 = sld [smem:[#allocation8_spill]] }
 0xa0c   : > { %s6067_s15 = sld [smem:[#allocation16_spill]]  ;;  %s6068_s16 = sld [smem:[#allocation9_spill]] }
 0xa0d   : > { %s6069_s17 = sld [smem:[#allocation10_spill]]  ;;  %s6070_s18 = sld [smem:[#allocation12_spill]] }
 0xa0e   : > { %s6071_s19 = sld [smem:[#allocation14_spill]]  ;;  %22 = sbr.rel (!%p20_p12) target bundleno = 9 (0x9), region = 131 }
 0xa15   :  { %3077 = vsyncpa [#allocation4], 1 }
 0xa16   :  { %3079 = vsyncpa [#allocation4 + $0x1], 1 }

</bundles_post_ra>
